<compile_context>
chip_gen: v6e
topology: v6e:2x2x1
jax: 0.10.0
libtpu: 0.0.40
codegen_flags: <defaults>
</compile_context>

<pallas_src>
import functools
import itertools

import numpy as np
import jax
import jax.numpy as jnp
from jax.experimental import pallas as pl
from jax.experimental.pallas import tpu as pltpu


def _round_up(x, m):
    return ((x + m - 1) // m) * m


def _fast_recip(x):
    """EUP approximate reciprocal + one Newton-Raphson step (~f32 accurate)."""
    r = pl.reciprocal(x, approx=True)
    return r * (2.0 - x * r)


def _cost_kernel(w_class, w_poly, w_dir, p_pred, p_tgt,
                 logits_ref, pxy_ref, onehot_t_ref, txy_t_ref,
                 cost_ref, rmin_ref):
    """Combined matching cost tile [tile_nq, tile_t] (targets on lanes).

    logits_ref   : [tile_nq, C]      flattened prediction logits
    pxy_ref      : [tile_nq, 2*P]    pred polyline coords (cols 0..P-1 = x, P..2P-1 = y)
    onehot_t_ref : [C, tile_t]       transposed one-hot of target class ids
    txy_t_ref    : [2*Pt, tile_t]    target coords per point (rows 0..Pt-1 = x)
    cost_ref     : [tile_nq, tile_t] output cost tile
    rmin_ref     : [P, tile_nq, tile_t] VMEM scratch: per-pred-point running min
    """
    pxy = pxy_ref[...]                       # [nq, 2P]
    txy = txy_t_ref[...]                     # [2Pt, tile_t]
    nq = pxy.shape[0]
    tpad = txy.shape[1]

    wa = jnp.float32(w_poly * 0.5 / p_pred)  # mean over pred points
    wb = jnp.float32(w_poly * 0.5 / p_tgt)   # mean over target points

    acc = jnp.zeros((nq, tpad), jnp.float32)

    # ---- Chamfer polyline cost, lane-dense, each pairwise distance computed once.
    for q in range(p_tgt):
        # Hoist the sublane broadcast of this target point out of the pred loop.
        tx_b = jnp.broadcast_to(txy[q:q + 1, :], (nq, tpad))
        ty_b = jnp.broadcast_to(txy[p_tgt + q:p_tgt + q + 1, :], (nq, tpad))
        col_min = None
        for p in range(p_pred):
            d = (jnp.abs(pxy[:, p:p + 1] - tx_b) +
                 jnp.abs(pxy[:, p_pred + p:p_pred + p + 1] - ty_b))  # [nq, tpad]
            col_min = d if col_min is None else jnp.minimum(col_min, d)
            if q == 0:
                rmin_ref[p] = d
            else:
                rmin_ref[p] = jnp.minimum(rmin_ref[p], d)
        acc = acc + wb * col_min             # min over pred points, per target point

    row_sum = rmin_ref[0]                    # min over target points, per pred point
    for p in range(1, p_pred):
        row_sum = row_sum + rmin_ref[p]
    acc = acc + wa * row_sum

    # ---- direction cost: 1 - cos(start->end vectors)
    pdx = pxy[:, p_pred - 1:p_pred] - pxy[:, 0:1]                    # [nq, 1]
    pdy = pxy[:, 2 * p_pred - 1:2 * p_pred] - pxy[:, p_pred:p_pred + 1]
    tdx = txy[p_tgt - 1:p_tgt, :] - txy[0:1, :]                      # [1, tpad]
    tdy = txy[2 * p_tgt - 1:2 * p_tgt, :] - txy[p_tgt:p_tgt + 1, :]
    pinv = _fast_recip(jnp.sqrt(pdx * pdx + pdy * pdy) + 1e-6)       # [nq, 1]
    tinv = _fast_recip(jnp.sqrt(tdx * tdx + tdy * tdy) + 1e-6)       # [1, tpad]
    cos = (pdx * tdx + pdy * tdy) * (pinv * tinv)                    # [nq, tpad]
    acc = acc + w_dir * (1.0 - cos)

    # ---- classification cost: -softmax(logits)[:, tgt_ids] via one-hot matmul
    logits = logits_ref[...]
    m = jnp.max(logits, axis=-1, keepdims=True)
    e = jnp.exp(logits - m)
    prob = e * _fast_recip(jnp.sum(e, axis=-1, keepdims=True))       # [nq, C]
    acc = acc - w_class * jnp.dot(prob, onehot_t_ref[...],
                                  preferred_element_type=jnp.float32)

    cost_ref[...] = acc


def compute_cost_matrix(pred_logits, pred_polylines, tgt_ids, tgt_polylines,
                        cost_class=1.0, cost_polyline=1.0, cost_direction=1.0,
                        max_tile_nq=128, tile_t=128):
    """Flatten batch, pad to lane-dense tiles, run the Pallas kernel."""
    B, Q, C = pred_logits.shape
    P = pred_polylines.shape[2]
    Pt = tgt_polylines.shape[1]
    T = int(tgt_ids.shape[0])
    NQ = B * Q

    if T == 0:
        return jnp.zeros((B, Q, 0), jnp.float32)

    tile_nq = min(max_tile_nq, _round_up(NQ, 8))
    NQ_pad = _round_up(NQ, tile_nq)
    T_pad = _round_up(T, tile_t)

    logits = pred_logits.reshape(NQ, C).astype(jnp.float32)
    logits = jnp.pad(logits, ((0, NQ_pad - NQ), (0, 0)))

    pred_poly = pred_polylines.reshape(NQ, P, 2).astype(jnp.float32)
    # Packed pred coords: [NQ_pad, 2P] (cols 0..P-1 = x, P..2P-1 = y).
    pxy = jnp.concatenate([pred_poly[:, :, 0], pred_poly[:, :, 1]], axis=1)
    pxy = jnp.pad(pxy, ((0, NQ_pad - NQ), (0, 0)))

    tgt_poly = tgt_polylines.astype(jnp.float32)          # [T, Pt, 2]
    # Packed, transposed target coords: [2Pt, T_pad] (rows 0..Pt-1 = x per point).
    txy = jnp.concatenate([tgt_poly[:, :, 0].T, tgt_poly[:, :, 1].T], axis=0)
    txy = jnp.pad(txy, ((0, 0), (0, T_pad - T)))

    # Pre-transposed one-hot: [C, T_pad] (padded target columns are all-zero).
    onehot_t = jax.nn.one_hot(tgt_ids, C, dtype=jnp.float32).T
    onehot_t = jnp.pad(onehot_t, ((0, 0), (0, T_pad - T)))

    kernel = functools.partial(_cost_kernel,
                               float(cost_class), float(cost_polyline),
                               float(cost_direction), int(P), int(Pt))

    grid = (NQ_pad // tile_nq, T_pad // tile_t)
    cost = pl.pallas_call(
        kernel,
        out_shape=jax.ShapeDtypeStruct((NQ_pad, T_pad), jnp.float32),
        grid_spec=pltpu.PrefetchScalarGridSpec(
            num_scalar_prefetch=0,
            grid=grid,
            in_specs=[
                pl.BlockSpec((tile_nq, C), lambda i, j: (i, 0)),
                pl.BlockSpec((tile_nq, 2 * P), lambda i, j: (i, 0)),
                pl.BlockSpec((C, tile_t), lambda i, j: (0, j)),
                pl.BlockSpec((2 * Pt, tile_t), lambda i, j: (0, j)),
            ],
            out_specs=pl.BlockSpec((tile_nq, tile_t), lambda i, j: (i, j)),
            scratch_shapes=[pltpu.VMEM((P, tile_nq, tile_t), jnp.float32)],
        ),
        compiler_params=pltpu.CompilerParams(
            dimension_semantics=("parallel", "parallel"),
            vmem_limit_bytes=32 * 1024 * 1024,
        ),
    )(logits, pxy, onehot_t, txy)
    return cost[:NQ, :T].reshape(B, Q, T)


# ---------------------------------------------------------------------------
# Host-side linear sum assignment (shortest augmenting path, O(n^3)).
# TODO(synk): the Hungarian assignment is sequential/data-dependent; it has no
# clean Pallas equivalent and runs on the host.
# ---------------------------------------------------------------------------
def _solve_rectangular_lsap(cost):
    """LAP for cost[nr, nc] with nr <= nc. Returns col4row (column per row)."""
    nr, nc = cost.shape
    u = np.zeros(nr, dtype=np.float64)
    v = np.zeros(nc, dtype=np.float64)
    col4row = np.full(nr, -1, dtype=np.int64)
    row4col = np.full(nc, -1, dtype=np.int64)

    for cur_row in range(nr):
        shortest = np.full(nc, np.inf, dtype=np.float64)
        path = np.full(nc, -1, dtype=np.int64)
        on_sr = np.zeros(nr, dtype=bool)
        on_sc = np.zeros(nc, dtype=bool)
        min_val = 0.0
        i = cur_row
        sink = -1
        while sink == -1:
            on_sr[i] = True
            cols = np.where(~on_sc)[0]
            d = min_val + cost[i, cols] - u[i] - v[cols]
            better = d < shortest[cols]
            bcols = cols[better]
            shortest[bcols] = d[better]
            path[bcols] = i
            j = cols[np.argmin(shortest[cols])]
            min_val = shortest[j]
            if row4col[j] == -1:
                sink = j
            else:
                on_sc[j] = True
                i = row4col[j]
        # dual updates
        u[cur_row] += min_val
        other = on_sr.copy()
        other[cur_row] = False
        if other.any():
            u[other] += min_val - shortest[col4row[other]]
        v[on_sc] -= min_val - shortest[on_sc]
        # augment along the alternating path
        j = sink
        while True:
            i = path[j]
            row4col[j] = i
            col4row[i], j = j, col4row[i]
            if i == cur_row:
                break
    return col4row


def _linear_sum_assignment(cost):
    """Minimal numpy reimplementation of scipy.optimize.linear_sum_assignment."""
    cost = np.asarray(cost, dtype=np.float64)
    nr, nc = cost.shape
    if nr == 0 or nc == 0:
        return np.zeros(0, dtype=np.int64), np.zeros(0, dtype=np.int64)
    if nr > nc:
        col4row = _solve_rectangular_lsap(cost.T)        # len nc, entries = rows
        rows = col4row.astype(np.int64)
        cols = np.arange(nc, dtype=np.int64)
        order = np.argsort(rows)
        return rows[order], cols[order]
    col4row = _solve_rectangular_lsap(cost)
    return np.arange(nr, dtype=np.int64), col4row.astype(np.int64)


def hungarian_match(outputs, targets,
                    cost_class=1.0, cost_polyline=1.0, cost_direction=1.0):
    """Mirrors HungarianMatcher.forward (returns cost matrix + matched indices)."""
    tgt_ids = jnp.concatenate([t["labels"] for t in targets], axis=0)
    tgt_polylines = jnp.concatenate([t["polylines"] for t in targets], axis=0)
    C = compute_cost_matrix(outputs["pred_logits"], outputs["pred_polylines"],
                            tgt_ids, tgt_polylines,
                            cost_class, cost_polyline, cost_direction)
    C = jax.block_until_ready(C)
    C_np = np.asarray(C)
    sizes = [int(t["labels"].shape[0]) for t in targets]
    indices, off = [], 0
    for b, sz in enumerate(sizes):
        if sz == 0:
            indices.append((np.zeros(0, np.int64), np.zeros(0, np.int64)))
        else:
            indices.append(_linear_sum_assignment(C_np[b, :, off:off + sz]))
        off += sz
    return C, indices


# ---------------------------------------------------------------------------
# Validation helpers (host-only, tiny shapes).
# ---------------------------------------------------------------------------
def _brute_force_lsa(cost):
    """Exact assignment by enumeration for tiny [Q, M], Q >= M (oracle only)."""
    Q, M = cost.shape
    best_rows, best_cost = None, np.inf
    for rows in itertools.permutations(range(Q), M):
        c = cost[list(rows), np.arange(M)].sum()
        if c < best_cost:
            best_cost, best_rows = c, rows
    rows = np.asarray(best_rows, dtype=np.int64)
    cols = np.arange(M, dtype=np.int64)
    order = np.argsort(rows)
    return rows[order], cols[order]


def _reference_cost(pred_logits, pred_polylines, tgt_ids, tgt_polylines,
                    wc, wp, wd):
    """Pure-numpy reference replicating the PyTorch double loop."""
    B, Q, Cc = pred_logits.shape
    P = pred_polylines.shape[2]
    logits = pred_logits.reshape(B * Q, Cc)
    prob = np.exp(logits - logits.max(-1, keepdims=True))
    prob = prob / prob.sum(-1, keepdims=True)
    out_poly = pred_polylines.reshape(B * Q, P, 2)
    T = tgt_ids.shape[0]
    cost = np.zeros((B * Q, T), np.float32)
    for i in range(B * Q):
        for j in range(T):
            cc = -prob[i, tgt_ids[j]]
            d = np.abs(out_poly[i][:, None, :] - tgt_polylines[j][None, :, :]).sum(-1)
            cp = (d.min(1).mean() + d.min(0).mean()) / 2.0
            pd = out_poly[i][-1] - out_poly[i][0]
            td = tgt_polylines[j][-1] - tgt_polylines[j][0]
            pd = pd / (np.linalg.norm(pd) + 1e-6)
            td = td / (np.linalg.norm(td) + 1e-6)
            cd = 1.0 - float(np.dot(pd, td))
            cost[i, j] = wc * cc + wp * cp + wd * cd
    return cost.reshape(B, Q, T)


if __name__ == "__main__":
    B, Q, C, P = 2, 8, 4, 8          # batch, queries, classes, points/polyline
    n_tgt = [3, 3]                   # targets per batch element

    key = jax.random.PRNGKey(0)
    k1, k2, k3, k4 = jax.random.split(key, 4)
    pred_logits = jax.random.normal(k1, (B, Q, C), dtype=jnp.float32)
    pred_polylines = jax.random.uniform(k2, (B, Q, P, 2), dtype=jnp.float32)

    targets = []
    lkeys = jax.random.split(k3, B)
    pkeys = jax.random.split(k4, B)
    for b in range(B):
        targets.append({
            "labels": jax.random.randint(lkeys[b], (n_tgt[b],), 0, C,
                                         dtype=jnp.int32),
            "polylines": jax.random.uniform(pkeys[b], (n_tgt[b], P, 2),
                                            dtype=jnp.float32),
        })

    outputs = {"pred_logits": pred_logits, "pred_polylines": pred_polylines}
    cost, indices = hungarian_match(outputs, targets,
                                    cost_class=1.0, cost_polyline=1.0,
                                    cost_direction=1.0)
    cost = jax.block_until_ready(cost)

    # 1) Validate the kernel-produced cost matrix against a numpy reference.
    #    (Tolerance slightly loosened vs. exact math because the softmax and
    #    direction normalizations use the EUP approximate reciprocal + 1 Newton
    #    step; the matrix is only used for argmin ranking.)
    tgt_ids_np = np.concatenate([np.asarray(t["labels"]) for t in targets])
    tgt_poly_np = np.concatenate([np.asarray(t["polylines"]) for t in targets])
    ref = _reference_cost(np.asarray(pred_logits), np.asarray(pred_polylines),
                          tgt_ids_np, tgt_poly_np, 1.0, 1.0, 1.0)
    np.testing.assert_allclose(np.asarray(cost), ref, rtol=1e-3, atol=1e-3)

    # 2) Validate the assignment: the LAP solver must reach the same optimal
    #    objective as exhaustive enumeration on each batch's cost slice.
    cost_np = np.asarray(cost)
    off = 0
    for b, sz in enumerate(n_tgt):
        rows, cols = indices[b]
        assert rows.shape[0] == sz and cols.shape[0] == sz
        assert len(set(rows.tolist())) == sz          # distinct query rows
        sub = cost_np[b, :, off:off + sz]
        lap_total = sub[rows, cols].sum()
        bf_rows, bf_cols = _brute_force_lsa(sub)
        bf_total = sub[bf_rows, bf_cols].sum()
        assert abs(lap_total - bf_total) < 1e-5, (lap_total, bf_total)
        off += sz

    print("KERNEL_OK")
</pallas_src>

<mosaic_0001>
module attributes {stable_mosaic.version = 11 : i64} {
  func.func @_cost_kernel(%arg0: i32, %arg1: i32, %arg2: memref<16x4xf32, #tpu.memory_space<vmem>>, %arg3: memref<16x16xf32, #tpu.memory_space<vmem>>, %arg4: memref<4x128xf32, #tpu.memory_space<vmem>>, %arg5: memref<16x128xf32, #tpu.memory_space<vmem>>, %arg6: memref<16x128xf32, #tpu.memory_space<vmem>>, %arg7: memref<8x16x128xf32, #tpu.memory_space<vmem>>) attributes {dimension_semantics = [#tpu.dimension_semantics<parallel>, #tpu.dimension_semantics<parallel>], iteration_bounds = array<i64: 1, 1>, scalar_prefetch = 0 : i64, scratch_operands = 1 : i64, tpu.core_type = #tpu.core_type<tc>, window_params = [{transform_indices = @transform_0, window_bounds = array<i64: 16, 4>}, {transform_indices = @transform_1, window_bounds = array<i64: 16, 16>}, {transform_indices = @transform_2, window_bounds = array<i64: 4, 128>}, {transform_indices = @transform_3, window_bounds = array<i64: 16, 128>}, {transform_indices = @transform_4, window_bounds = array<i64: 16, 128>}]} {
    %c0 = arith.constant 0 : index
    %c0_0 = arith.constant 0 : index
    %0 = vector.load %arg3[%c0, %c0_0] : memref<16x16xf32, #tpu.memory_space<vmem>>, vector<16x16xf32>
    %c0_1 = arith.constant 0 : index
    %c0_2 = arith.constant 0 : index
    %1 = vector.load %arg5[%c0_1, %c0_2] : memref<16x128xf32, #tpu.memory_space<vmem>>, vector<16x128xf32>
    %cst = arith.constant 0.000000e+00 : f32
    %2 = vector.broadcast %cst : f32 to vector<16x128xf32>
    %3 = vector.extract_strided_slice %1 {offsets = [0, 0], sizes = [1, 128], strides = [1, 1]} : vector<16x128xf32> to vector<1x128xf32>
    %4 = vector.shape_cast %3 : vector<1x128xf32> to vector<1x128xf32>
    %5 = vector.broadcast %4 : vector<1x128xf32> to vector<16x128xf32>
    %6 = vector.extract_strided_slice %1 {offsets = [8, 0], sizes = [1, 128], strides = [1, 1]} : vector<16x128xf32> to vector<1x128xf32>
    %7 = vector.shape_cast %6 : vector<1x128xf32> to vector<1x128xf32>
    %8 = vector.broadcast %7 : vector<1x128xf32> to vector<16x128xf32>
    %9 = vector.extract_strided_slice %0 {offsets = [0, 0], sizes = [16, 1], strides = [1, 1]} : vector<16x16xf32> to vector<16x1xf32>
    %10 = vector.broadcast %9 : vector<16x1xf32> to vector<16x128xf32>
    %11 = arith.subf %10, %5 : vector<16x128xf32>
    %12 = math.absf %11 : vector<16x128xf32>
    %13 = vector.extract_strided_slice %0 {offsets = [0, 8], sizes = [16, 1], strides = [1, 1]} : vector<16x16xf32> to vector<16x1xf32>
    %14 = vector.broadcast %13 : vector<16x1xf32> to vector<16x128xf32>
    %15 = arith.subf %14, %8 : vector<16x128xf32>
    %16 = math.absf %15 : vector<16x128xf32>
    %17 = arith.addf %12, %16 : vector<16x128xf32>
    %c0_3 = arith.constant 0 : index
    %c0_4 = arith.constant 0 : index
    %c0_5 = arith.constant 0 : index
    %18 = vector.load %arg7[%c0_3, %c0_4, %c0_5] : memref<8x16x128xf32, #tpu.memory_space<vmem>>, vector<1x16x128xf32>
    %19 = vector.shape_cast %18 : vector<1x16x128xf32> to vector<16x128xf32>
    %20 = vector.shape_cast %17 : vector<16x128xf32> to vector<1x16x128xf32>
    tpu.vector_store %arg7[%c0_3, %c0_4, %c0_5], %20 {strides = array<i32>} : memref<8x16x128xf32, #tpu.memory_space<vmem>>, vector<1x16x128xf32>,
    %21 = vector.extract_strided_slice %0 {offsets = [0, 1], sizes = [16, 1], strides = [1, 1]} : vector<16x16xf32> to vector<16x1xf32>
    %22 = vector.broadcast %21 : vector<16x1xf32> to vector<16x128xf32>
    %23 = arith.subf %22, %5 : vector<16x128xf32>
    %24 = math.absf %23 : vector<16x128xf32>
    %25 = vector.extract_strided_slice %0 {offsets = [0, 9], sizes = [16, 1], strides = [1, 1]} : vector<16x16xf32> to vector<16x1xf32>
    %26 = vector.broadcast %25 : vector<16x1xf32> to vector<16x128xf32>
    %27 = arith.subf %26, %8 : vector<16x128xf32>
    %28 = math.absf %27 : vector<16x128xf32>
    %29 = arith.addf %24, %28 : vector<16x128xf32>
    %30 = arith.minimumf %17, %29 : vector<16x128xf32>
    %c1 = arith.constant 1 : index
    %c0_6 = arith.constant 0 : index
    %c0_7 = arith.constant 0 : index
    %31 = vector.load %arg7[%c1, %c0_6, %c0_7] : memref<8x16x128xf32, #tpu.memory_space<vmem>>, vector<1x16x128xf32>
    %32 = vector.shape_cast %31 : vector<1x16x128xf32> to vector<16x128xf32>
    %33 = vector.shape_cast %29 : vector<16x128xf32> to vector<1x16x128xf32>
    tpu.vector_store %arg7[%c1, %c0_6, %c0_7], %33 {strides = array<i32>} : memref<8x16x128xf32, #tpu.memory_space<vmem>>, vector<1x16x128xf32>,
    %34 = vector.extract_strided_slice %0 {offsets = [0, 2], sizes = [16, 1], strides = [1, 1]} : vector<16x16xf32> to vector<16x1xf32>
    %35 = vector.broadcast %34 : vector<16x1xf32> to vector<16x128xf32>
    %36 = arith.subf %35, %5 : vector<16x128xf32>
    %37 = math.absf %36 : vector<16x128xf32>
    %38 = vector.extract_strided_slice %0 {offsets = [0, 10], sizes = [16, 1], strides = [1, 1]} : vector<16x16xf32> to vector<16x1xf32>
    %39 = vector.broadcast %38 : vector<16x1xf32> to vector<16x128xf32>
    %40 = arith.subf %39, %8 : vector<16x128xf32>
    %41 = math.absf %40 : vector<16x128xf32>
    %42 = arith.addf %37, %41 : vector<16x128xf32>
    %43 = arith.minimumf %30, %42 : vector<16x128xf32>
    %c2 = arith.constant 2 : index
    %c0_8 = arith.constant 0 : index
    %c0_9 = arith.constant 0 : index
    %44 = vector.load %arg7[%c2, %c0_8, %c0_9] : memref<8x16x128xf32, #tpu.memory_space<vmem>>, vector<1x16x128xf32>
    %45 = vector.shape_cast %44 : vector<1x16x128xf32> to vector<16x128xf32>
    %46 = vector.shape_cast %42 : vector<16x128xf32> to vector<1x16x128xf32>
    tpu.vector_store %arg7[%c2, %c0_8, %c0_9], %46 {strides = array<i32>} : memref<8x16x128xf32, #tpu.memory_space<vmem>>, vector<1x16x128xf32>,
    %47 = vector.extract_strided_slice %0 {offsets = [0, 3], sizes = [16, 1], strides = [1, 1]} : vector<16x16xf32> to vector<16x1xf32>
    %48 = vector.broadcast %47 : vector<16x1xf32> to vector<16x128xf32>
    %49 = arith.subf %48, %5 : vector<16x128xf32>
    %50 = math.absf %49 : vector<16x128xf32>
    %51 = vector.extract_strided_slice %0 {offsets = [0, 11], sizes = [16, 1], strides = [1, 1]} : vector<16x16xf32> to vector<16x1xf32>
    %52 = vector.broadcast %51 : vector<16x1xf32> to vector<16x128xf32>
    %53 = arith.subf %52, %8 : vector<16x128xf32>
    %54 = math.absf %53 : vector<16x128xf32>
    %55 = arith.addf %50, %54 : vector<16x128xf32>
    %56 = arith.minimumf %43, %55 : vector<16x128xf32>
    %c3 = arith.constant 3 : index
    %c0_10 = arith.constant 0 : index
    %c0_11 = arith.constant 0 : index
    %57 = vector.load %arg7[%c3, %c0_10, %c0_11] : memref<8x16x128xf32, #tpu.memory_space<vmem>>, vector<1x16x128xf32>
    %58 = vector.shape_cast %57 : vector<1x16x128xf32> to vector<16x128xf32>
    %59 = vector.shape_cast %55 : vector<16x128xf32> to vector<1x16x128xf32>
    tpu.vector_store %arg7[%c3, %c0_10, %c0_11], %59 {strides = array<i32>} : memref<8x16x128xf32, #tpu.memory_space<vmem>>, vector<1x16x128xf32>,
    %60 = vector.extract_strided_slice %0 {offsets = [0, 4], sizes = [16, 1], strides = [1, 1]} : vector<16x16xf32> to vector<16x1xf32>
    %61 = vector.broadcast %60 : vector<16x1xf32> to vector<16x128xf32>
    %62 = arith.subf %61, %5 : vector<16x128xf32>
    %63 = math.absf %62 : vector<16x128xf32>
    %64 = vector.extract_strided_slice %0 {offsets = [0, 12], sizes = [16, 1], strides = [1, 1]} : vector<16x16xf32> to vector<16x1xf32>
    %65 = vector.broadcast %64 : vector<16x1xf32> to vector<16x128xf32>
    %66 = arith.subf %65, %8 : vector<16x128xf32>
    %67 = math.absf %66 : vector<16x128xf32>
    %68 = arith.addf %63, %67 : vector<16x128xf32>
    %69 = arith.minimumf %56, %68 : vector<16x128xf32>
    %c4 = arith.constant 4 : index
    %c0_12 = arith.constant 0 : index
    %c0_13 = arith.constant 0 : index
    %70 = vector.load %arg7[%c4, %c0_12, %c0_13] : memref<8x16x128xf32, #tpu.memory_space<vmem>>, vector<1x16x128xf32>
    %71 = vector.shape_cast %70 : vector<1x16x128xf32> to vector<16x128xf32>
    %72 = vector.shape_cast %68 : vector<16x128xf32> to vector<1x16x128xf32>
    tpu.vector_store %arg7[%c4, %c0_12, %c0_13], %72 {strides = array<i32>} : memref<8x16x128xf32, #tpu.memory_space<vmem>>, vector<1x16x128xf32>,
    %73 = vector.extract_strided_slice %0 {offsets = [0, 5], sizes = [16, 1], strides = [1, 1]} : vector<16x16xf32> to vector<16x1xf32>
    %74 = vector.broadcast %73 : vector<16x1xf32> to vector<16x128xf32>
    %75 = arith.subf %74, %5 : vector<16x128xf32>
    %76 = math.absf %75 : vector<16x128xf32>
    %77 = vector.extract_strided_slice %0 {offsets = [0, 13], sizes = [16, 1], strides = [1, 1]} : vector<16x16xf32> to vector<16x1xf32>
    %78 = vector.broadcast %77 : vector<16x1xf32> to vector<16x128xf32>
    %79 = arith.subf %78, %8 : vector<16x128xf32>
    %80 = math.absf %79 : vector<16x128xf32>
    %81 = arith.addf %76, %80 : vector<16x128xf32>
    %82 = arith.minimumf %69, %81 : vector<16x128xf32>
    %c5 = arith.constant 5 : index
    %c0_14 = arith.constant 0 : index
    %c0_15 = arith.constant 0 : index
    %83 = vector.load %arg7[%c5, %c0_14, %c0_15] : memref<8x16x128xf32, #tpu.memory_space<vmem>>, vector<1x16x128xf32>
    %84 = vector.shape_cast %83 : vector<1x16x128xf32> to vector<16x128xf32>
    %85 = vector.shape_cast %81 : vector<16x128xf32> to vector<1x16x128xf32>
    tpu.vector_store %arg7[%c5, %c0_14, %c0_15], %85 {strides = array<i32>} : memref<8x16x128xf32, #tpu.memory_space<vmem>>, vector<1x16x128xf32>,
    %86 = vector.extract_strided_slice %0 {offsets = [0, 6], sizes = [16, 1], strides = [1, 1]} : vector<16x16xf32> to vector<16x1xf32>
    %87 = vector.broadcast %86 : vector<16x1xf32> to vector<16x128xf32>
    %88 = arith.subf %87, %5 : vector<16x128xf32>
    %89 = math.absf %88 : vector<16x128xf32>
    %90 = vector.extract_strided_slice %0 {offsets = [0, 14], sizes = [16, 1], strides = [1, 1]} : vector<16x16xf32> to vector<16x1xf32>
    %91 = vector.broadcast %90 : vector<16x1xf32> to vector<16x128xf32>
    %92 = arith.subf %91, %8 : vector<16x128xf32>
    %93 = math.absf %92 : vector<16x128xf32>
    %94 = arith.addf %89, %93 : vector<16x128xf32>
    %95 = arith.minimumf %82, %94 : vector<16x128xf32>
    %c6 = arith.constant 6 : index
    %c0_16 = arith.constant 0 : index
    %c0_17 = arith.constant 0 : index
    %96 = vector.load %arg7[%c6, %c0_16, %c0_17] : memref<8x16x128xf32, #tpu.memory_space<vmem>>, vector<1x16x128xf32>
    %97 = vector.shape_cast %96 : vector<1x16x128xf32> to vector<16x128xf32>
    %98 = vector.shape_cast %94 : vector<16x128xf32> to vector<1x16x128xf32>
    tpu.vector_store %arg7[%c6, %c0_16, %c0_17], %98 {strides = array<i32>} : memref<8x16x128xf32, #tpu.memory_space<vmem>>, vector<1x16x128xf32>,
    %99 = vector.extract_strided_slice %0 {offsets = [0, 7], sizes = [16, 1], strides = [1, 1]} : vector<16x16xf32> to vector<16x1xf32>
    %100 = vector.broadcast %99 : vector<16x1xf32> to vector<16x128xf32>
    %101 = arith.subf %100, %5 : vector<16x128xf32>
    %102 = math.absf %101 : vector<16x128xf32>
    %103 = vector.extract_strided_slice %0 {offsets = [0, 15], sizes = [16, 1], strides = [1, 1]} : vector<16x16xf32> to vector<16x1xf32>
    %104 = vector.broadcast %103 : vector<16x1xf32> to vector<16x128xf32>
    %105 = arith.subf %104, %8 : vector<16x128xf32>
    %106 = math.absf %105 : vector<16x128xf32>
    %107 = arith.addf %102, %106 : vector<16x128xf32>
    %108 = arith.minimumf %95, %107 : vector<16x128xf32>
    %c7 = arith.constant 7 : index
    %c0_18 = arith.constant 0 : index
    %c0_19 = arith.constant 0 : index
    %109 = vector.load %arg7[%c7, %c0_18, %c0_19] : memref<8x16x128xf32, #tpu.memory_space<vmem>>, vector<1x16x128xf32>
    %110 = vector.shape_cast %109 : vector<1x16x128xf32> to vector<16x128xf32>
    %111 = vector.shape_cast %107 : vector<16x128xf32> to vector<1x16x128xf32>
    tpu.vector_store %arg7[%c7, %c0_18, %c0_19], %111 {strides = array<i32>} : memref<8x16x128xf32, #tpu.memory_space<vmem>>, vector<1x16x128xf32>,
    %cst_20 = arith.constant 6.250000e-02 : f32
    %112 = vector.broadcast %cst_20 : f32 to vector<16x128xf32>
    %113 = arith.mulf %112, %108 : vector<16x128xf32>
    %114 = arith.addf %2, %113 : vector<16x128xf32>
    %115 = vector.extract_strided_slice %1 {offsets = [1, 0], sizes = [1, 128], strides = [1, 1]} : vector<16x128xf32> to vector<1x128xf32>
    %116 = vector.shape_cast %115 : vector<1x128xf32> to vector<1x128xf32>
    %117 = vector.broadcast %116 : vector<1x128xf32> to vector<16x128xf32>
    %118 = vector.extract_strided_slice %1 {offsets = [9, 0], sizes = [1, 128], strides = [1, 1]} : vector<16x128xf32> to vector<1x128xf32>
    %119 = vector.shape_cast %118 : vector<1x128xf32> to vector<1x128xf32>
    %120 = vector.broadcast %119 : vector<1x128xf32> to vector<16x128xf32>
    %121 = vector.extract_strided_slice %0 {offsets = [0, 0], sizes = [16, 1], strides = [1, 1]} : vector<16x16xf32> to vector<16x1xf32>
    %122 = vector.broadcast %121 : vector<16x1xf32> to vector<16x128xf32>
    %123 = arith.subf %122, %117 : vector<16x128xf32>
    %124 = math.absf %123 : vector<16x128xf32>
    %125 = vector.extract_strided_slice %0 {offsets = [0, 8], sizes = [16, 1], strides = [1, 1]} : vector<16x16xf32> to vector<16x1xf32>
    %126 = vector.broadcast %125 : vector<16x1xf32> to vector<16x128xf32>
    %127 = arith.subf %126, %120 : vector<16x128xf32>
    %128 = math.absf %127 : vector<16x128xf32>
    %129 = arith.addf %124, %128 : vector<16x128xf32>
    %c0_21 = arith.constant 0 : index
    %c0_22 = arith.constant 0 : index
    %c0_23 = arith.constant 0 : index
    %130 = vector.load %arg7[%c0_21, %c0_22, %c0_23] : memref<8x16x128xf32, #tpu.memory_space<vmem>>, vector<1x16x128xf32>
    %131 = vector.shape_cast %130 : vector<1x16x128xf32> to vector<16x128xf32>
    %132 = arith.minimumf %131, %129 : vector<16x128xf32>
    %c0_24 = arith.constant 0 : index
    %c0_25 = arith.constant 0 : index
    %c0_26 = arith.constant 0 : index
    %133 = vector.load %arg7[%c0_24, %c0_25, %c0_26] : memref<8x16x128xf32, #tpu.memory_space<vmem>>, vector<1x16x128xf32>
    %134 = vector.shape_cast %133 : vector<1x16x128xf32> to vector<16x128xf32>
    %135 = vector.shape_cast %132 : vector<16x128xf32> to vector<1x16x128xf32>
    tpu.vector_store %arg7[%c0_24, %c0_25, %c0_26], %135 {strides = array<i32>} : memref<8x16x128xf32, #tpu.memory_space<vmem>>, vector<1x16x128xf32>,
    %136 = vector.extract_strided_slice %0 {offsets = [0, 1], sizes = [16, 1], strides = [1, 1]} : vector<16x16xf32> to vector<16x1xf32>
    %137 = vector.broadcast %136 : vector<16x1xf32> to vector<16x128xf32>
    %138 = arith.subf %137, %117 : vector<16x128xf32>
    %139 = math.absf %138 : vector<16x128xf32>
    %140 = vector.extract_strided_slice %0 {offsets = [0, 9], sizes = [16, 1], strides = [1, 1]} : vector<16x16xf32> to vector<16x1xf32>
    %141 = vector.broadcast %140 : vector<16x1xf32> to vector<16x128xf32>
    %142 = arith.subf %141, %120 : vector<16x128xf32>
    %143 = math.absf %142 : vector<16x128xf32>
    %144 = arith.addf %139, %143 : vector<16x128xf32>
    %145 = arith.minimumf %129, %144 : vector<16x128xf32>
    %c1_27 = arith.constant 1 : index
    %c0_28 = arith.constant 0 : index
    %c0_29 = arith.constant 0 : index
    %146 = vector.load %arg7[%c1_27, %c0_28, %c0_29] : memref<8x16x128xf32, #tpu.memory_space<vmem>>, vector<1x16x128xf32>
    %147 = vector.shape_cast %146 : vector<1x16x128xf32> to vector<16x128xf32>
    %148 = arith.minimumf %147, %144 : vector<16x128xf32>
    %c1_30 = arith.constant 1 : index
    %c0_31 = arith.constant 0 : index
    %c0_32 = arith.constant 0 : index
    %149 = vector.load %arg7[%c1_30, %c0_31, %c0_32] : memref<8x16x128xf32, #tpu.memory_space<vmem>>, vector<1x16x128xf32>
    %150 = vector.shape_cast %149 : vector<1x16x128xf32> to vector<16x128xf32>
    %151 = vector.shape_cast %148 : vector<16x128xf32> to vector<1x16x128xf32>
    tpu.vector_store %arg7[%c1_30, %c0_31, %c0_32], %151 {strides = array<i32>} : memref<8x16x128xf32, #tpu.memory_space<vmem>>, vector<1x16x128xf32>,
    %152 = vector.extract_strided_slice %0 {offsets = [0, 2], sizes = [16, 1], strides = [1, 1]} : vector<16x16xf32> to vector<16x1xf32>
    %153 = vector.broadcast %152 : vector<16x1xf32> to vector<16x128xf32>
    %154 = arith.subf %153, %117 : vector<16x128xf32>
    %155 = math.absf %154 : vector<16x128xf32>
    %156 = vector.extract_strided_slice %0 {offsets = [0, 10], sizes = [16, 1], strides = [1, 1]} : vector<16x16xf32> to vector<16x1xf32>
    %157 = vector.broadcast %156 : vector<16x1xf32> to vector<16x128xf32>
    %158 = arith.subf %157, %120 : vector<16x128xf32>
    %159 = math.absf %158 : vector<16x128xf32>
    %160 = arith.addf %155, %159 : vector<16x128xf32>
    %161 = arith.minimumf %145, %160 : vector<16x128xf32>
    %c2_33 = arith.constant 2 : index
    %c0_34 = arith.constant 0 : index
    %c0_35 = arith.constant 0 : index
    %162 = vector.load %arg7[%c2_33, %c0_34, %c0_35] : memref<8x16x128xf32, #tpu.memory_space<vmem>>, vector<1x16x128xf32>
    %163 = vector.shape_cast %162 : vector<1x16x128xf32> to vector<16x128xf32>
    %164 = arith.minimumf %163, %160 : vector<16x128xf32>
    %c2_36 = arith.constant 2 : index
    %c0_37 = arith.constant 0 : index
    %c0_38 = arith.constant 0 : index
    %165 = vector.load %arg7[%c2_36, %c0_37, %c0_38] : memref<8x16x128xf32, #tpu.memory_space<vmem>>, vector<1x16x128xf32>
    %166 = vector.shape_cast %165 : vector<1x16x128xf32> to vector<16x128xf32>
    %167 = vector.shape_cast %164 : vector<16x128xf32> to vector<1x16x128xf32>
    tpu.vector_store %arg7[%c2_36, %c0_37, %c0_38], %167 {strides = array<i32>} : memref<8x16x128xf32, #tpu.memory_space<vmem>>, vector<1x16x128xf32>,
    %168 = vector.extract_strided_slice %0 {offsets = [0, 3], sizes = [16, 1], strides = [1, 1]} : vector<16x16xf32> to vector<16x1xf32>
    %169 = vector.broadcast %168 : vector<16x1xf32> to vector<16x128xf32>
    %170 = arith.subf %169, %117 : vector<16x128xf32>
    %171 = math.absf %170 : vector<16x128xf32>
    %172 = vector.extract_strided_slice %0 {offsets = [0, 11], sizes = [16, 1], strides = [1, 1]} : vector<16x16xf32> to vector<16x1xf32>
    %173 = vector.broadcast %172 : vector<16x1xf32> to vector<16x128xf32>
    %174 = arith.subf %173, %120 : vector<16x128xf32>
    %175 = math.absf %174 : vector<16x128xf32>
    %176 = arith.addf %171, %175 : vector<16x128xf32>
    %177 = arith.minimumf %161, %176 : vector<16x128xf32>
    %c3_39 = arith.constant 3 : index
    %c0_40 = arith.constant 0 : index
    %c0_41 = arith.constant 0 : index
    %178 = vector.load %arg7[%c3_39, %c0_40, %c0_41] : memref<8x16x128xf32, #tpu.memory_space<vmem>>, vector<1x16x128xf32>
    %179 = vector.shape_cast %178 : vector<1x16x128xf32> to vector<16x128xf32>
    %180 = arith.minimumf %179, %176 : vector<16x128xf32>
    %c3_42 = arith.constant 3 : index
    %c0_43 = arith.constant 0 : index
    %c0_44 = arith.constant 0 : index
    %181 = vector.load %arg7[%c3_42, %c0_43, %c0_44] : memref<8x16x128xf32, #tpu.memory_space<vmem>>, vector<1x16x128xf32>
    %182 = vector.shape_cast %181 : vector<1x16x128xf32> to vector<16x128xf32>
    %183 = vector.shape_cast %180 : vector<16x128xf32> to vector<1x16x128xf32>
    tpu.vector_store %arg7[%c3_42, %c0_43, %c0_44], %183 {strides = array<i32>} : memref<8x16x128xf32, #tpu.memory_space<vmem>>, vector<1x16x128xf32>,
    %184 = vector.extract_strided_slice %0 {offsets = [0, 4], sizes = [16, 1], strides = [1, 1]} : vector<16x16xf32> to vector<16x1xf32>
    %185 = vector.broadcast %184 : vector<16x1xf32> to vector<16x128xf32>
    %186 = arith.subf %185, %117 : vector<16x128xf32>
    %187 = math.absf %186 : vector<16x128xf32>
    %188 = vector.extract_strided_slice %0 {offsets = [0, 12], sizes = [16, 1], strides = [1, 1]} : vector<16x16xf32> to vector<16x1xf32>
    %189 = vector.broadcast %188 : vector<16x1xf32> to vector<16x128xf32>
    %190 = arith.subf %189, %120 : vector<16x128xf32>
    %191 = math.absf %190 : vector<16x128xf32>
    %192 = arith.addf %187, %191 : vector<16x128xf32>
    %193 = arith.minimumf %177, %192 : vector<16x128xf32>
    %c4_45 = arith.constant 4 : index
    %c0_46 = arith.constant 0 : index
    %c0_47 = arith.constant 0 : index
    %194 = vector.load %arg7[%c4_45, %c0_46, %c0_47] : memref<8x16x128xf32, #tpu.memory_space<vmem>>, vector<1x16x128xf32>
    %195 = vector.shape_cast %194 : vector<1x16x128xf32> to vector<16x128xf32>
    %196 = arith.minimumf %195, %192 : vector<16x128xf32>
    %c4_48 = arith.constant 4 : index
    %c0_49 = arith.constant 0 : index
    %c0_50 = arith.constant 0 : index
    %197 = vector.load %arg7[%c4_48, %c0_49, %c0_50] : memref<8x16x128xf32, #tpu.memory_space<vmem>>, vector<1x16x128xf32>
    %198 = vector.shape_cast %197 : vector<1x16x128xf32> to vector<16x128xf32>
    %199 = vector.shape_cast %196 : vector<16x128xf32> to vector<1x16x128xf32>
    tpu.vector_store %arg7[%c4_48, %c0_49, %c0_50], %199 {strides = array<i32>} : memref<8x16x128xf32, #tpu.memory_space<vmem>>, vector<1x16x128xf32>,
    %200 = vector.extract_strided_slice %0 {offsets = [0, 5], sizes = [16, 1], strides = [1, 1]} : vector<16x16xf32> to vector<16x1xf32>
    %201 = vector.broadcast %200 : vector<16x1xf32> to vector<16x128xf32>
    %202 = arith.subf %201, %117 : vector<16x128xf32>
    %203 = math.absf %202 : vector<16x128xf32>
    %204 = vector.extract_strided_slice %0 {offsets = [0, 13], sizes = [16, 1], strides = [1, 1]} : vector<16x16xf32> to vector<16x1xf32>
    %205 = vector.broadcast %204 : vector<16x1xf32> to vector<16x128xf32>
    %206 = arith.subf %205, %120 : vector<16x128xf32>
    %207 = math.absf %206 : vector<16x128xf32>
    %208 = arith.addf %203, %207 : vector<16x128xf32>
    %209 = arith.minimumf %193, %208 : vector<16x128xf32>
    %c5_51 = arith.constant 5 : index
    %c0_52 = arith.constant 0 : index
    %c0_53 = arith.constant 0 : index
    %210 = vector.load %arg7[%c5_51, %c0_52, %c0_53] : memref<8x16x128xf32, #tpu.memory_space<vmem>>, vector<1x16x128xf32>
    %211 = vector.shape_cast %210 : vector<1x16x128xf32> to vector<16x128xf32>
    %212 = arith.minimumf %211, %208 : vector<16x128xf32>
    %c5_54 = arith.constant 5 : index
    %c0_55 = arith.constant 0 : index
    %c0_56 = arith.constant 0 : index
    %213 = vector.load %arg7[%c5_54, %c0_55, %c0_56] : memref<8x16x128xf32, #tpu.memory_space<vmem>>, vector<1x16x128xf32>
    %214 = vector.shape_cast %213 : vector<1x16x128xf32> to vector<16x128xf32>
    %215 = vector.shape_cast %212 : vector<16x128xf32> to vector<1x16x128xf32>
    tpu.vector_store %arg7[%c5_54, %c0_55, %c0_56], %215 {strides = array<i32>} : memref<8x16x128xf32, #tpu.memory_space<vmem>>, vector<1x16x128xf32>,
    %216 = vector.extract_strided_slice %0 {offsets = [0, 6], sizes = [16, 1], strides = [1, 1]} : vector<16x16xf32> to vector<16x1xf32>
    %217 = vector.broadcast %216 : vector<16x1xf32> to vector<16x128xf32>
    %218 = arith.subf %217, %117 : vector<16x128xf32>
    %219 = math.absf %218 : vector<16x128xf32>
    %220 = vector.extract_strided_slice %0 {offsets = [0, 14], sizes = [16, 1], strides = [1, 1]} : vector<16x16xf32> to vector<16x1xf32>
    %221 = vector.broadcast %220 : vector<16x1xf32> to vector<16x128xf32>
    %222 = arith.subf %221, %120 : vector<16x128xf32>
    %223 = math.absf %222 : vector<16x128xf32>
    %224 = arith.addf %219, %223 : vector<16x128xf32>
    %225 = arith.minimumf %209, %224 : vector<16x128xf32>
    %c6_57 = arith.constant 6 : index
    %c0_58 = arith.constant 0 : index
    %c0_59 = arith.constant 0 : index
    %226 = vector.load %arg7[%c6_57, %c0_58, %c0_59] : memref<8x16x128xf32, #tpu.memory_space<vmem>>, vector<1x16x128xf32>
    %227 = vector.shape_cast %226 : vector<1x16x128xf32> to vector<16x128xf32>
    %228 = arith.minimumf %227, %224 : vector<16x128xf32>
    %c6_60 = arith.constant 6 : index
    %c0_61 = arith.constant 0 : index
    %c0_62 = arith.constant 0 : index
    %229 = vector.load %arg7[%c6_60, %c0_61, %c0_62] : memref<8x16x128xf32, #tpu.memory_space<vmem>>, vector<1x16x128xf32>
    %230 = vector.shape_cast %229 : vector<1x16x128xf32> to vector<16x128xf32>
    %231 = vector.shape_cast %228 : vector<16x128xf32> to vector<1x16x128xf32>
    tpu.vector_store %arg7[%c6_60, %c0_61, %c0_62], %231 {strides = array<i32>} : memref<8x16x128xf32, #tpu.memory_space<vmem>>, vector<1x16x128xf32>,
    %232 = vector.extract_strided_slice %0 {offsets = [0, 7], sizes = [16, 1], strides = [1, 1]} : vector<16x16xf32> to vector<16x1xf32>
    %233 = vector.broadcast %232 : vector<16x1xf32> to vector<16x128xf32>
    %234 = arith.subf %233, %117 : vector<16x128xf32>
    %235 = math.absf %234 : vector<16x128xf32>
    %236 = vector.extract_strided_slice %0 {offsets = [0, 15], sizes = [16, 1], strides = [1, 1]} : vector<16x16xf32> to vector<16x1xf32>
    %237 = vector.broadcast %236 : vector<16x1xf32> to vector<16x128xf32>
    %238 = arith.subf %237, %120 : vector<16x128xf32>
    %239 = math.absf %238 : vector<16x128xf32>
    %240 = arith.addf %235, %239 : vector<16x128xf32>
    %241 = arith.minimumf %225, %240 : vector<16x128xf32>
    %c7_63 = arith.constant 7 : index
    %c0_64 = arith.constant 0 : index
    %c0_65 = arith.constant 0 : index
    %242 = vector.load %arg7[%c7_63, %c0_64, %c0_65] : memref<8x16x128xf32, #tpu.memory_space<vmem>>, vector<1x16x128xf32>
    %243 = vector.shape_cast %242 : vector<1x16x128xf32> to vector<16x128xf32>
    %244 = arith.minimumf %243, %240 : vector<16x128xf32>
    %c7_66 = arith.constant 7 : index
    %c0_67 = arith.constant 0 : index
    %c0_68 = arith.constant 0 : index
    %245 = vector.load %arg7[%c7_66, %c0_67, %c0_68] : memref<8x16x128xf32, #tpu.memory_space<vmem>>, vector<1x16x128xf32>
    %246 = vector.shape_cast %245 : vector<1x16x128xf32> to vector<16x128xf32>
    %247 = vector.shape_cast %244 : vector<16x128xf32> to vector<1x16x128xf32>
    tpu.vector_store %arg7[%c7_66, %c0_67, %c0_68], %247 {strides = array<i32>} : memref<8x16x128xf32, #tpu.memory_space<vmem>>, vector<1x16x128xf32>,
    %cst_69 = arith.constant 6.250000e-02 : f32
    %248 = vector.broadcast %cst_69 : f32 to vector<16x128xf32>
    %249 = arith.mulf %248, %241 : vector<16x128xf32>
    %250 = arith.addf %114, %249 : vector<16x128xf32>
    %251 = vector.extract_strided_slice %1 {offsets = [2, 0], sizes = [1, 128], strides = [1, 1]} : vector<16x128xf32> to vector<1x128xf32>
    %252 = vector.shape_cast %251 : vector<1x128xf32> to vector<1x128xf32>
    %253 = vector.broadcast %252 : vector<1x128xf32> to vector<16x128xf32>
    %254 = vector.extract_strided_slice %1 {offsets = [10, 0], sizes = [1, 128], strides = [1, 1]} : vector<16x128xf32> to vector<1x128xf32>
    %255 = vector.shape_cast %254 : vector<1x128xf32> to vector<1x128xf32>
    %256 = vector.broadcast %255 : vector<1x128xf32> to vector<16x128xf32>
    %257 = vector.extract_strided_slice %0 {offsets = [0, 0], sizes = [16, 1], strides = [1, 1]} : vector<16x16xf32> to vector<16x1xf32>
    %258 = vector.broadcast %257 : vector<16x1xf32> to vector<16x128xf32>
    %259 = arith.subf %258, %253 : vector<16x128xf32>
    %260 = math.absf %259 : vector<16x128xf32>
    %261 = vector.extract_strided_slice %0 {offsets = [0, 8], sizes = [16, 1], strides = [1, 1]} : vector<16x16xf32> to vector<16x1xf32>
    %262 = vector.broadcast %261 : vector<16x1xf32> to vector<16x128xf32>
    %263 = arith.subf %262, %256 : vector<16x128xf32>
    %264 = math.absf %263 : vector<16x128xf32>
    %265 = arith.addf %260, %264 : vector<16x128xf32>
    %c0_70 = arith.constant 0 : index
    %c0_71 = arith.constant 0 : index
    %c0_72 = arith.constant 0 : index
    %266 = vector.load %arg7[%c0_70, %c0_71, %c0_72] : memref<8x16x128xf32, #tpu.memory_space<vmem>>, vector<1x16x128xf32>
    %267 = vector.shape_cast %266 : vector<1x16x128xf32> to vector<16x128xf32>
    %268 = arith.minimumf %267, %265 : vector<16x128xf32>
    %c0_73 = arith.constant 0 : index
    %c0_74 = arith.constant 0 : index
    %c0_75 = arith.constant 0 : index
    %269 = vector.load %arg7[%c0_73, %c0_74, %c0_75] : memref<8x16x128xf32, #tpu.memory_space<vmem>>, vector<1x16x128xf32>
    %270 = vector.shape_cast %269 : vector<1x16x128xf32> to vector<16x128xf32>
    %271 = vector.shape_cast %268 : vector<16x128xf32> to vector<1x16x128xf32>
    tpu.vector_store %arg7[%c0_73, %c0_74, %c0_75], %271 {strides = array<i32>} : memref<8x16x128xf32, #tpu.memory_space<vmem>>, vector<1x16x128xf32>,
    %272 = vector.extract_strided_slice %0 {offsets = [0, 1], sizes = [16, 1], strides = [1, 1]} : vector<16x16xf32> to vector<16x1xf32>
    %273 = vector.broadcast %272 : vector<16x1xf32> to vector<16x128xf32>
    %274 = arith.subf %273, %253 : vector<16x128xf32>
    %275 = math.absf %274 : vector<16x128xf32>
    %276 = vector.extract_strided_slice %0 {offsets = [0, 9], sizes = [16, 1], strides = [1, 1]} : vector<16x16xf32> to vector<16x1xf32>
    %277 = vector.broadcast %276 : vector<16x1xf32> to vector<16x128xf32>
    %278 = arith.subf %277, %256 : vector<16x128xf32>
    %279 = math.absf %278 : vector<16x128xf32>
    %280 = arith.addf %275, %279 : vector<16x128xf32>
    %281 = arith.minimumf %265, %280 : vector<16x128xf32>
    %c1_76 = arith.constant 1 : index
    %c0_77 = arith.constant 0 : index
    %c0_78 = arith.constant 0 : index
    %282 = vector.load %arg7[%c1_76, %c0_77, %c0_78] : memref<8x16x128xf32, #tpu.memory_space<vmem>>, vector<1x16x128xf32>
    %283 = vector.shape_cast %282 : vector<1x16x128xf32> to vector<16x128xf32>
    %284 = arith.minimumf %283, %280 : vector<16x128xf32>
    %c1_79 = arith.constant 1 : index
    %c0_80 = arith.constant 0 : index
    %c0_81 = arith.constant 0 : index
    %285 = vector.load %arg7[%c1_79, %c0_80, %c0_81] : memref<8x16x128xf32, #tpu.memory_space<vmem>>, vector<1x16x128xf32>
    %286 = vector.shape_cast %285 : vector<1x16x128xf32> to vector<16x128xf32>
    %287 = vector.shape_cast %284 : vector<16x128xf32> to vector<1x16x128xf32>
    tpu.vector_store %arg7[%c1_79, %c0_80, %c0_81], %287 {strides = array<i32>} : memref<8x16x128xf32, #tpu.memory_space<vmem>>, vector<1x16x128xf32>,
    %288 = vector.extract_strided_slice %0 {offsets = [0, 2], sizes = [16, 1], strides = [1, 1]} : vector<16x16xf32> to vector<16x1xf32>
    %289 = vector.broadcast %288 : vector<16x1xf32> to vector<16x128xf32>
    %290 = arith.subf %289, %253 : vector<16x128xf32>
    %291 = math.absf %290 : vector<16x128xf32>
    %292 = vector.extract_strided_slice %0 {offsets = [0, 10], sizes = [16, 1], strides = [1, 1]} : vector<16x16xf32> to vector<16x1xf32>
    %293 = vector.broadcast %292 : vector<16x1xf32> to vector<16x128xf32>
    %294 = arith.subf %293, %256 : vector<16x128xf32>
    %295 = math.absf %294 : vector<16x128xf32>
    %296 = arith.addf %291, %295 : vector<16x128xf32>
    %297 = arith.minimumf %281, %296 : vector<16x128xf32>
    %c2_82 = arith.constant 2 : index
    %c0_83 = arith.constant 0 : index
    %c0_84 = arith.constant 0 : index
    %298 = vector.load %arg7[%c2_82, %c0_83, %c0_84] : memref<8x16x128xf32, #tpu.memory_space<vmem>>, vector<1x16x128xf32>
    %299 = vector.shape_cast %298 : vector<1x16x128xf32> to vector<16x128xf32>
    %300 = arith.minimumf %299, %296 : vector<16x128xf32>
    %c2_85 = arith.constant 2 : index
    %c0_86 = arith.constant 0 : index
    %c0_87 = arith.constant 0 : index
    %301 = vector.load %arg7[%c2_85, %c0_86, %c0_87] : memref<8x16x128xf32, #tpu.memory_space<vmem>>, vector<1x16x128xf32>
    %302 = vector.shape_cast %301 : vector<1x16x128xf32> to vector<16x128xf32>
    %303 = vector.shape_cast %300 : vector<16x128xf32> to vector<1x16x128xf32>
    tpu.vector_store %arg7[%c2_85, %c0_86, %c0_87], %303 {strides = array<i32>} : memref<8x16x128xf32, #tpu.memory_space<vmem>>, vector<1x16x128xf32>,
    %304 = vector.extract_strided_slice %0 {offsets = [0, 3], sizes = [16, 1], strides = [1, 1]} : vector<16x16xf32> to vector<16x1xf32>
    %305 = vector.broadcast %304 : vector<16x1xf32> to vector<16x128xf32>
    %306 = arith.subf %305, %253 : vector<16x128xf32>
    %307 = math.absf %306 : vector<16x128xf32>
    %308 = vector.extract_strided_slice %0 {offsets = [0, 11], sizes = [16, 1], strides = [1, 1]} : vector<16x16xf32> to vector<16x1xf32>
    %309 = vector.broadcast %308 : vector<16x1xf32> to vector<16x128xf32>
    %310 = arith.subf %309, %256 : vector<16x128xf32>
    %311 = math.absf %310 : vector<16x128xf32>
    %312 = arith.addf %307, %311 : vector<16x128xf32>
    %313 = arith.minimumf %297, %312 : vector<16x128xf32>
    %c3_88 = arith.constant 3 : index
    %c0_89 = arith.constant 0 : index
    %c0_90 = arith.constant 0 : index
    %314 = vector.load %arg7[%c3_88, %c0_89, %c0_90] : memref<8x16x128xf32, #tpu.memory_space<vmem>>, vector<1x16x128xf32>
    %315 = vector.shape_cast %314 : vector<1x16x128xf32> to vector<16x128xf32>
    %316 = arith.minimumf %315, %312 : vector<16x128xf32>
    %c3_91 = arith.constant 3 : index
    %c0_92 = arith.constant 0 : index
    %c0_93 = arith.constant 0 : index
    %317 = vector.load %arg7[%c3_91, %c0_92, %c0_93] : memref<8x16x128xf32, #tpu.memory_space<vmem>>, vector<1x16x128xf32>
    %318 = vector.shape_cast %317 : vector<1x16x128xf32> to vector<16x128xf32>
    %319 = vector.shape_cast %316 : vector<16x128xf32> to vector<1x16x128xf32>
    tpu.vector_store %arg7[%c3_91, %c0_92, %c0_93], %319 {strides = array<i32>} : memref<8x16x128xf32, #tpu.memory_space<vmem>>, vector<1x16x128xf32>,
    %320 = vector.extract_strided_slice %0 {offsets = [0, 4], sizes = [16, 1], strides = [1, 1]} : vector<16x16xf32> to vector<16x1xf32>
    %321 = vector.broadcast %320 : vector<16x1xf32> to vector<16x128xf32>
    %322 = arith.subf %321, %253 : vector<16x128xf32>
    %323 = math.absf %322 : vector<16x128xf32>
    %324 = vector.extract_strided_slice %0 {offsets = [0, 12], sizes = [16, 1], strides = [1, 1]} : vector<16x16xf32> to vector<16x1xf32>
    %325 = vector.broadcast %324 : vector<16x1xf32> to vector<16x128xf32>
    %326 = arith.subf %325, %256 : vector<16x128xf32>
    %327 = math.absf %326 : vector<16x128xf32>
    %328 = arith.addf %323, %327 : vector<16x128xf32>
    %329 = arith.minimumf %313, %328 : vector<16x128xf32>
    %c4_94 = arith.constant 4 : index
    %c0_95 = arith.constant 0 : index
    %c0_96 = arith.constant 0 : index
    %330 = vector.load %arg7[%c4_94, %c0_95, %c0_96] : memref<8x16x128xf32, #tpu.memory_space<vmem>>, vector<1x16x128xf32>
    %331 = vector.shape_cast %330 : vector<1x16x128xf32> to vector<16x128xf32>
    %332 = arith.minimumf %331, %328 : vector<16x128xf32>
    %c4_97 = arith.constant 4 : index
    %c0_98 = arith.constant 0 : index
    %c0_99 = arith.constant 0 : index
    %333 = vector.load %arg7[%c4_97, %c0_98, %c0_99] : memref<8x16x128xf32, #tpu.memory_space<vmem>>, vector<1x16x128xf32>
    %334 = vector.shape_cast %333 : vector<1x16x128xf32> to vector<16x128xf32>
    %335 = vector.shape_cast %332 : vector<16x128xf32> to vector<1x16x128xf32>
    tpu.vector_store %arg7[%c4_97, %c0_98, %c0_99], %335 {strides = array<i32>} : memref<8x16x128xf32, #tpu.memory_space<vmem>>, vector<1x16x128xf32>,
    %336 = vector.extract_strided_slice %0 {offsets = [0, 5], sizes = [16, 1], strides = [1, 1]} : vector<16x16xf32> to vector<16x1xf32>
    %337 = vector.broadcast %336 : vector<16x1xf32> to vector<16x128xf32>
    %338 = arith.subf %337, %253 : vector<16x128xf32>
    %339 = math.absf %338 : vector<16x128xf32>
    %340 = vector.extract_strided_slice %0 {offsets = [0, 13], sizes = [16, 1], strides = [1, 1]} : vector<16x16xf32> to vector<16x1xf32>
    %341 = vector.broadcast %340 : vector<16x1xf32> to vector<16x128xf32>
    %342 = arith.subf %341, %256 : vector<16x128xf32>
    %343 = math.absf %342 : vector<16x128xf32>
    %344 = arith.addf %339, %343 : vector<16x128xf32>
    %345 = arith.minimumf %329, %344 : vector<16x128xf32>
    %c5_100 = arith.constant 5 : index
    %c0_101 = arith.constant 0 : index
    %c0_102 = arith.constant 0 : index
    %346 = vector.load %arg7[%c5_100, %c0_101, %c0_102] : memref<8x16x128xf32, #tpu.memory_space<vmem>>, vector<1x16x128xf32>
    %347 = vector.shape_cast %346 : vector<1x16x128xf32> to vector<16x128xf32>
    %348 = arith.minimumf %347, %344 : vector<16x128xf32>
    %c5_103 = arith.constant 5 : index
    %c0_104 = arith.constant 0 : index
    %c0_105 = arith.constant 0 : index
    %349 = vector.load %arg7[%c5_103, %c0_104, %c0_105] : memref<8x16x128xf32, #tpu.memory_space<vmem>>, vector<1x16x128xf32>
    %350 = vector.shape_cast %349 : vector<1x16x128xf32> to vector<16x128xf32>
    %351 = vector.shape_cast %348 : vector<16x128xf32> to vector<1x16x128xf32>
    tpu.vector_store %arg7[%c5_103, %c0_104, %c0_105], %351 {strides = array<i32>} : memref<8x16x128xf32, #tpu.memory_space<vmem>>, vector<1x16x128xf32>,
    %352 = vector.extract_strided_slice %0 {offsets = [0, 6], sizes = [16, 1], strides = [1, 1]} : vector<16x16xf32> to vector<16x1xf32>
    %353 = vector.broadcast %352 : vector<16x1xf32> to vector<16x128xf32>
    %354 = arith.subf %353, %253 : vector<16x128xf32>
    %355 = math.absf %354 : vector<16x128xf32>
    %356 = vector.extract_strided_slice %0 {offsets = [0, 14], sizes = [16, 1], strides = [1, 1]} : vector<16x16xf32> to vector<16x1xf32>
    %357 = vector.broadcast %356 : vector<16x1xf32> to vector<16x128xf32>
    %358 = arith.subf %357, %256 : vector<16x128xf32>
    %359 = math.absf %358 : vector<16x128xf32>
    %360 = arith.addf %355, %359 : vector<16x128xf32>
    %361 = arith.minimumf %345, %360 : vector<16x128xf32>
    %c6_106 = arith.constant 6 : index
    %c0_107 = arith.constant 0 : index
    %c0_108 = arith.constant 0 : index
    %362 = vector.load %arg7[%c6_106, %c0_107, %c0_108] : memref<8x16x128xf32, #tpu.memory_space<vmem>>, vector<1x16x128xf32>
    %363 = vector.shape_cast %362 : vector<1x16x128xf32> to vector<16x128xf32>
    %364 = arith.minimumf %363, %360 : vector<16x128xf32>
    %c6_109 = arith.constant 6 : index
    %c0_110 = arith.constant 0 : index
    %c0_111 = arith.constant 0 : index
    %365 = vector.load %arg7[%c6_109, %c0_110, %c0_111] : memref<8x16x128xf32, #tpu.memory_space<vmem>>, vector<1x16x128xf32>
    %366 = vector.shape_cast %365 : vector<1x16x128xf32> to vector<16x128xf32>
    %367 = vector.shape_cast %364 : vector<16x128xf32> to vector<1x16x128xf32>
    tpu.vector_store %arg7[%c6_109, %c0_110, %c0_111], %367 {strides = array<i32>} : memref<8x16x128xf32, #tpu.memory_space<vmem>>, vector<1x16x128xf32>,
    %368 = vector.extract_strided_slice %0 {offsets = [0, 7], sizes = [16, 1], strides = [1, 1]} : vector<16x16xf32> to vector<16x1xf32>
    %369 = vector.broadcast %368 : vector<16x1xf32> to vector<16x128xf32>
    %370 = arith.subf %369, %253 : vector<16x128xf32>
    %371 = math.absf %370 : vector<16x128xf32>
    %372 = vector.extract_strided_slice %0 {offsets = [0, 15], sizes = [16, 1], strides = [1, 1]} : vector<16x16xf32> to vector<16x1xf32>
    %373 = vector.broadcast %372 : vector<16x1xf32> to vector<16x128xf32>
    %374 = arith.subf %373, %256 : vector<16x128xf32>
    %375 = math.absf %374 : vector<16x128xf32>
    %376 = arith.addf %371, %375 : vector<16x128xf32>
    %377 = arith.minimumf %361, %376 : vector<16x128xf32>
    %c7_112 = arith.constant 7 : index
    %c0_113 = arith.constant 0 : index
    %c0_114 = arith.constant 0 : index
    %378 = vector.load %arg7[%c7_112, %c0_113, %c0_114] : memref<8x16x128xf32, #tpu.memory_space<vmem>>, vector<1x16x128xf32>
    %379 = vector.shape_cast %378 : vector<1x16x128xf32> to vector<16x128xf32>
    %380 = arith.minimumf %379, %376 : vector<16x128xf32>
    %c7_115 = arith.constant 7 : index
    %c0_116 = arith.constant 0 : index
    %c0_117 = arith.constant 0 : index
    %381 = vector.load %arg7[%c7_115, %c0_116, %c0_117] : memref<8x16x128xf32, #tpu.memory_space<vmem>>, vector<1x16x128xf32>
    %382 = vector.shape_cast %381 : vector<1x16x128xf32> to vector<16x128xf32>
    %383 = vector.shape_cast %380 : vector<16x128xf32> to vector<1x16x128xf32>
    tpu.vector_store %arg7[%c7_115, %c0_116, %c0_117], %383 {strides = array<i32>} : memref<8x16x128xf32, #tpu.memory_space<vmem>>, vector<1x16x128xf32>,
    %cst_118 = arith.constant 6.250000e-02 : f32
    %384 = vector.broadcast %cst_118 : f32 to vector<16x128xf32>
    %385 = arith.mulf %384, %377 : vector<16x128xf32>
    %386 = arith.addf %250, %385 : vector<16x128xf32>
    %387 = vector.extract_strided_slice %1 {offsets = [3, 0], sizes = [1, 128], strides = [1, 1]} : vector<16x128xf32> to vector<1x128xf32>
    %388 = vector.shape_cast %387 : vector<1x128xf32> to vector<1x128xf32>
    %389 = vector.broadcast %388 : vector<1x128xf32> to vector<16x128xf32>
    %390 = vector.extract_strided_slice %1 {offsets = [11, 0], sizes = [1, 128], strides = [1, 1]} : vector<16x128xf32> to vector<1x128xf32>
    %391 = vector.shape_cast %390 : vector<1x128xf32> to vector<1x128xf32>
    %392 = vector.broadcast %391 : vector<1x128xf32> to vector<16x128xf32>
    %393 = vector.extract_strided_slice %0 {offsets = [0, 0], sizes = [16, 1], strides = [1, 1]} : vector<16x16xf32> to vector<16x1xf32>
    %394 = vector.broadcast %393 : vector<16x1xf32> to vector<16x128xf32>
    %395 = arith.subf %394, %389 : vector<16x128xf32>
    %396 = math.absf %395 : vector<16x128xf32>
    %397 = vector.extract_strided_slice %0 {offsets = [0, 8], sizes = [16, 1], strides = [1, 1]} : vector<16x16xf32> to vector<16x1xf32>
    %398 = vector.broadcast %397 : vector<16x1xf32> to vector<16x128xf32>
    %399 = arith.subf %398, %392 : vector<16x128xf32>
    %400 = math.absf %399 : vector<16x128xf32>
    %401 = arith.addf %396, %400 : vector<16x128xf32>
    %c0_119 = arith.constant 0 : index
    %c0_120 = arith.constant 0 : index
    %c0_121 = arith.constant 0 : index
    %402 = vector.load %arg7[%c0_119, %c0_120, %c0_121] : memref<8x16x128xf32, #tpu.memory_space<vmem>>, vector<1x16x128xf32>
    %403 = vector.shape_cast %402 : vector<1x16x128xf32> to vector<16x128xf32>
    %404 = arith.minimumf %403, %401 : vector<16x128xf32>
    %c0_122 = arith.constant 0 : index
    %c0_123 = arith.constant 0 : index
    %c0_124 = arith.constant 0 : index
    %405 = vector.load %arg7[%c0_122, %c0_123, %c0_124] : memref<8x16x128xf32, #tpu.memory_space<vmem>>, vector<1x16x128xf32>
    %406 = vector.shape_cast %405 : vector<1x16x128xf32> to vector<16x128xf32>
    %407 = vector.shape_cast %404 : vector<16x128xf32> to vector<1x16x128xf32>
    tpu.vector_store %arg7[%c0_122, %c0_123, %c0_124], %407 {strides = array<i32>} : memref<8x16x128xf32, #tpu.memory_space<vmem>>, vector<1x16x128xf32>,
    %408 = vector.extract_strided_slice %0 {offsets = [0, 1], sizes = [16, 1], strides = [1, 1]} : vector<16x16xf32> to vector<16x1xf32>
    %409 = vector.broadcast %408 : vector<16x1xf32> to vector<16x128xf32>
    %410 = arith.subf %409, %389 : vector<16x128xf32>
    %411 = math.absf %410 : vector<16x128xf32>
    %412 = vector.extract_strided_slice %0 {offsets = [0, 9], sizes = [16, 1], strides = [1, 1]} : vector<16x16xf32> to vector<16x1xf32>
    %413 = vector.broadcast %412 : vector<16x1xf32> to vector<16x128xf32>
    %414 = arith.subf %413, %392 : vector<16x128xf32>
    %415 = math.absf %414 : vector<16x128xf32>
    %416 = arith.addf %411, %415 : vector<16x128xf32>
    %417 = arith.minimumf %401, %416 : vector<16x128xf32>
    %c1_125 = arith.constant 1 : index
    %c0_126 = arith.constant 0 : index
    %c0_127 = arith.constant 0 : index
    %418 = vector.load %arg7[%c1_125, %c0_126, %c0_127] : memref<8x16x128xf32, #tpu.memory_space<vmem>>, vector<1x16x128xf32>
    %419 = vector.shape_cast %418 : vector<1x16x128xf32> to vector<16x128xf32>
    %420 = arith.minimumf %419, %416 : vector<16x128xf32>
    %c1_128 = arith.constant 1 : index
    %c0_129 = arith.constant 0 : index
    %c0_130 = arith.constant 0 : index
    %421 = vector.load %arg7[%c1_128, %c0_129, %c0_130] : memref<8x16x128xf32, #tpu.memory_space<vmem>>, vector<1x16x128xf32>
    %422 = vector.shape_cast %421 : vector<1x16x128xf32> to vector<16x128xf32>
    %423 = vector.shape_cast %420 : vector<16x128xf32> to vector<1x16x128xf32>
    tpu.vector_store %arg7[%c1_128, %c0_129, %c0_130], %423 {strides = array<i32>} : memref<8x16x128xf32, #tpu.memory_space<vmem>>, vector<1x16x128xf32>,
    %424 = vector.extract_strided_slice %0 {offsets = [0, 2], sizes = [16, 1], strides = [1, 1]} : vector<16x16xf32> to vector<16x1xf32>
    %425 = vector.broadcast %424 : vector<16x1xf32> to vector<16x128xf32>
    %426 = arith.subf %425, %389 : vector<16x128xf32>
    %427 = math.absf %426 : vector<16x128xf32>
    %428 = vector.extract_strided_slice %0 {offsets = [0, 10], sizes = [16, 1], strides = [1, 1]} : vector<16x16xf32> to vector<16x1xf32>
    %429 = vector.broadcast %428 : vector<16x1xf32> to vector<16x128xf32>
    %430 = arith.subf %429, %392 : vector<16x128xf32>
    %431 = math.absf %430 : vector<16x128xf32>
    %432 = arith.addf %427, %431 : vector<16x128xf32>
    %433 = arith.minimumf %417, %432 : vector<16x128xf32>
    %c2_131 = arith.constant 2 : index
    %c0_132 = arith.constant 0 : index
    %c0_133 = arith.constant 0 : index
    %434 = vector.load %arg7[%c2_131, %c0_132, %c0_133] : memref<8x16x128xf32, #tpu.memory_space<vmem>>, vector<1x16x128xf32>
    %435 = vector.shape_cast %434 : vector<1x16x128xf32> to vector<16x128xf32>
    %436 = arith.minimumf %435, %432 : vector<16x128xf32>
    %c2_134 = arith.constant 2 : index
    %c0_135 = arith.constant 0 : index
    %c0_136 = arith.constant 0 : index
    %437 = vector.load %arg7[%c2_134, %c0_135, %c0_136] : memref<8x16x128xf32, #tpu.memory_space<vmem>>, vector<1x16x128xf32>
    %438 = vector.shape_cast %437 : vector<1x16x128xf32> to vector<16x128xf32>
    %439 = vector.shape_cast %436 : vector<16x128xf32> to vector<1x16x128xf32>
    tpu.vector_store %arg7[%c2_134, %c0_135, %c0_136], %439 {strides = array<i32>} : memref<8x16x128xf32, #tpu.memory_space<vmem>>, vector<1x16x128xf32>,
    %440 = vector.extract_strided_slice %0 {offsets = [0, 3], sizes = [16, 1], strides = [1, 1]} : vector<16x16xf32> to vector<16x1xf32>
    %441 = vector.broadcast %440 : vector<16x1xf32> to vector<16x128xf32>
    %442 = arith.subf %441, %389 : vector<16x128xf32>
    %443 = math.absf %442 : vector<16x128xf32>
    %444 = vector.extract_strided_slice %0 {offsets = [0, 11], sizes = [16, 1], strides = [1, 1]} : vector<16x16xf32> to vector<16x1xf32>
    %445 = vector.broadcast %444 : vector<16x1xf32> to vector<16x128xf32>
    %446 = arith.subf %445, %392 : vector<16x128xf32>
    %447 = math.absf %446 : vector<16x128xf32>
    %448 = arith.addf %443, %447 : vector<16x128xf32>
    %449 = arith.minimumf %433, %448 : vector<16x128xf32>
    %c3_137 = arith.constant 3 : index
    %c0_138 = arith.constant 0 : index
    %c0_139 = arith.constant 0 : index
    %450 = vector.load %arg7[%c3_137, %c0_138, %c0_139] : memref<8x16x128xf32, #tpu.memory_space<vmem>>, vector<1x16x128xf32>
    %451 = vector.shape_cast %450 : vector<1x16x128xf32> to vector<16x128xf32>
    %452 = arith.minimumf %451, %448 : vector<16x128xf32>
    %c3_140 = arith.constant 3 : index
    %c0_141 = arith.constant 0 : index
    %c0_142 = arith.constant 0 : index
    %453 = vector.load %arg7[%c3_140, %c0_141, %c0_142] : memref<8x16x128xf32, #tpu.memory_space<vmem>>, vector<1x16x128xf32>
    %454 = vector.shape_cast %453 : vector<1x16x128xf32> to vector<16x128xf32>
    %455 = vector.shape_cast %452 : vector<16x128xf32> to vector<1x16x128xf32>
    tpu.vector_store %arg7[%c3_140, %c0_141, %c0_142], %455 {strides = array<i32>} : memref<8x16x128xf32, #tpu.memory_space<vmem>>, vector<1x16x128xf32>,
    %456 = vector.extract_strided_slice %0 {offsets = [0, 4], sizes = [16, 1], strides = [1, 1]} : vector<16x16xf32> to vector<16x1xf32>
    %457 = vector.broadcast %456 : vector<16x1xf32> to vector<16x128xf32>
    %458 = arith.subf %457, %389 : vector<16x128xf32>
    %459 = math.absf %458 : vector<16x128xf32>
    %460 = vector.extract_strided_slice %0 {offsets = [0, 12], sizes = [16, 1], strides = [1, 1]} : vector<16x16xf32> to vector<16x1xf32>
    %461 = vector.broadcast %460 : vector<16x1xf32> to vector<16x128xf32>
    %462 = arith.subf %461, %392 : vector<16x128xf32>
    %463 = math.absf %462 : vector<16x128xf32>
    %464 = arith.addf %459, %463 : vector<16x128xf32>
    %465 = arith.minimumf %449, %464 : vector<16x128xf32>
    %c4_143 = arith.constant 4 : index
    %c0_144 = arith.constant 0 : index
    %c0_145 = arith.constant 0 : index
    %466 = vector.load %arg7[%c4_143, %c0_144, %c0_145] : memref<8x16x128xf32, #tpu.memory_space<vmem>>, vector<1x16x128xf32>
    %467 = vector.shape_cast %466 : vector<1x16x128xf32> to vector<16x128xf32>
    %468 = arith.minimumf %467, %464 : vector<16x128xf32>
    %c4_146 = arith.constant 4 : index
    %c0_147 = arith.constant 0 : index
    %c0_148 = arith.constant 0 : index
    %469 = vector.load %arg7[%c4_146, %c0_147, %c0_148] : memref<8x16x128xf32, #tpu.memory_space<vmem>>, vector<1x16x128xf32>
    %470 = vector.shape_cast %469 : vector<1x16x128xf32> to vector<16x128xf32>
    %471 = vector.shape_cast %468 : vector<16x128xf32> to vector<1x16x128xf32>
    tpu.vector_store %arg7[%c4_146, %c0_147, %c0_148], %471 {strides = array<i32>} : memref<8x16x128xf32, #tpu.memory_space<vmem>>, vector<1x16x128xf32>,
    %472 = vector.extract_strided_slice %0 {offsets = [0, 5], sizes = [16, 1], strides = [1, 1]} : vector<16x16xf32> to vector<16x1xf32>
    %473 = vector.broadcast %472 : vector<16x1xf32> to vector<16x128xf32>
    %474 = arith.subf %473, %389 : vector<16x128xf32>
    %475 = math.absf %474 : vector<16x128xf32>
    %476 = vector.extract_strided_slice %0 {offsets = [0, 13], sizes = [16, 1], strides = [1, 1]} : vector<16x16xf32> to vector<16x1xf32>
    %477 = vector.broadcast %476 : vector<16x1xf32> to vector<16x128xf32>
    %478 = arith.subf %477, %392 : vector<16x128xf32>
    %479 = math.absf %478 : vector<16x128xf32>
    %480 = arith.addf %475, %479 : vector<16x128xf32>
    %481 = arith.minimumf %465, %480 : vector<16x128xf32>
    %c5_149 = arith.constant 5 : index
    %c0_150 = arith.constant 0 : index
    %c0_151 = arith.constant 0 : index
    %482 = vector.load %arg7[%c5_149, %c0_150, %c0_151] : memref<8x16x128xf32, #tpu.memory_space<vmem>>, vector<1x16x128xf32>
    %483 = vector.shape_cast %482 : vector<1x16x128xf32> to vector<16x128xf32>
    %484 = arith.minimumf %483, %480 : vector<16x128xf32>
    %c5_152 = arith.constant 5 : index
    %c0_153 = arith.constant 0 : index
    %c0_154 = arith.constant 0 : index
    %485 = vector.load %arg7[%c5_152, %c0_153, %c0_154] : memref<8x16x128xf32, #tpu.memory_space<vmem>>, vector<1x16x128xf32>
    %486 = vector.shape_cast %485 : vector<1x16x128xf32> to vector<16x128xf32>
    %487 = vector.shape_cast %484 : vector<16x128xf32> to vector<1x16x128xf32>
    tpu.vector_store %arg7[%c5_152, %c0_153, %c0_154], %487 {strides = array<i32>} : memref<8x16x128xf32, #tpu.memory_space<vmem>>, vector<1x16x128xf32>,
    %488 = vector.extract_strided_slice %0 {offsets = [0, 6], sizes = [16, 1], strides = [1, 1]} : vector<16x16xf32> to vector<16x1xf32>
    %489 = vector.broadcast %488 : vector<16x1xf32> to vector<16x128xf32>
    %490 = arith.subf %489, %389 : vector<16x128xf32>
    %491 = math.absf %490 : vector<16x128xf32>
    %492 = vector.extract_strided_slice %0 {offsets = [0, 14], sizes = [16, 1], strides = [1, 1]} : vector<16x16xf32> to vector<16x1xf32>
    %493 = vector.broadcast %492 : vector<16x1xf32> to vector<16x128xf32>
    %494 = arith.subf %493, %392 : vector<16x128xf32>
    %495 = math.absf %494 : vector<16x128xf32>
    %496 = arith.addf %491, %495 : vector<16x128xf32>
    %497 = arith.minimumf %481, %496 : vector<16x128xf32>
    %c6_155 = arith.constant 6 : index
    %c0_156 = arith.constant 0 : index
    %c0_157 = arith.constant 0 : index
    %498 = vector.load %arg7[%c6_155, %c0_156, %c0_157] : memref<8x16x128xf32, #tpu.memory_space<vmem>>, vector<1x16x128xf32>
    %499 = vector.shape_cast %498 : vector<1x16x128xf32> to vector<16x128xf32>
    %500 = arith.minimumf %499, %496 : vector<16x128xf32>
    %c6_158 = arith.constant 6 : index
    %c0_159 = arith.constant 0 : index
    %c0_160 = arith.constant 0 : index
    %501 = vector.load %arg7[%c6_158, %c0_159, %c0_160] : memref<8x16x128xf32, #tpu.memory_space<vmem>>, vector<1x16x128xf32>
    %502 = vector.shape_cast %501 : vector<1x16x128xf32> to vector<16x128xf32>
    %503 = vector.shape_cast %500 : vector<16x128xf32> to vector<1x16x128xf32>
    tpu.vector_store %arg7[%c6_158, %c0_159, %c0_160], %503 {strides = array<i32>} : memref<8x16x128xf32, #tpu.memory_space<vmem>>, vector<1x16x128xf32>,
    %504 = vector.extract_strided_slice %0 {offsets = [0, 7], sizes = [16, 1], strides = [1, 1]} : vector<16x16xf32> to vector<16x1xf32>
    %505 = vector.broadcast %504 : vector<16x1xf32> to vector<16x128xf32>
    %506 = arith.subf %505, %389 : vector<16x128xf32>
    %507 = math.absf %506 : vector<16x128xf32>
    %508 = vector.extract_strided_slice %0 {offsets = [0, 15], sizes = [16, 1], strides = [1, 1]} : vector<16x16xf32> to vector<16x1xf32>
    %509 = vector.broadcast %508 : vector<16x1xf32> to vector<16x128xf32>
    %510 = arith.subf %509, %392 : vector<16x128xf32>
    %511 = math.absf %510 : vector<16x128xf32>
    %512 = arith.addf %507, %511 : vector<16x128xf32>
    %513 = arith.minimumf %497, %512 : vector<16x128xf32>
    %c7_161 = arith.constant 7 : index
    %c0_162 = arith.constant 0 : index
    %c0_163 = arith.constant 0 : index
    %514 = vector.load %arg7[%c7_161, %c0_162, %c0_163] : memref<8x16x128xf32, #tpu.memory_space<vmem>>, vector<1x16x128xf32>
    %515 = vector.shape_cast %514 : vector<1x16x128xf32> to vector<16x128xf32>
    %516 = arith.minimumf %515, %512 : vector<16x128xf32>
    %c7_164 = arith.constant 7 : index
    %c0_165 = arith.constant 0 : index
    %c0_166 = arith.constant 0 : index
    %517 = vector.load %arg7[%c7_164, %c0_165, %c0_166] : memref<8x16x128xf32, #tpu.memory_space<vmem>>, vector<1x16x128xf32>
    %518 = vector.shape_cast %517 : vector<1x16x128xf32> to vector<16x128xf32>
    %519 = vector.shape_cast %516 : vector<16x128xf32> to vector<1x16x128xf32>
    tpu.vector_store %arg7[%c7_164, %c0_165, %c0_166], %519 {strides = array<i32>} : memref<8x16x128xf32, #tpu.memory_space<vmem>>, vector<1x16x128xf32>,
    %cst_167 = arith.constant 6.250000e-02 : f32
    %520 = vector.broadcast %cst_167 : f32 to vector<16x128xf32>
    %521 = arith.mulf %520, %513 : vector<16x128xf32>
    %522 = arith.addf %386, %521 : vector<16x128xf32>
    %523 = vector.extract_strided_slice %1 {offsets = [4, 0], sizes = [1, 128], strides = [1, 1]} : vector<16x128xf32> to vector<1x128xf32>
    %524 = vector.shape_cast %523 : vector<1x128xf32> to vector<1x128xf32>
    %525 = vector.broadcast %524 : vector<1x128xf32> to vector<16x128xf32>
    %526 = vector.extract_strided_slice %1 {offsets = [12, 0], sizes = [1, 128], strides = [1, 1]} : vector<16x128xf32> to vector<1x128xf32>
    %527 = vector.shape_cast %526 : vector<1x128xf32> to vector<1x128xf32>
    %528 = vector.broadcast %527 : vector<1x128xf32> to vector<16x128xf32>
    %529 = vector.extract_strided_slice %0 {offsets = [0, 0], sizes = [16, 1], strides = [1, 1]} : vector<16x16xf32> to vector<16x1xf32>
    %530 = vector.broadcast %529 : vector<16x1xf32> to vector<16x128xf32>
    %531 = arith.subf %530, %525 : vector<16x128xf32>
    %532 = math.absf %531 : vector<16x128xf32>
    %533 = vector.extract_strided_slice %0 {offsets = [0, 8], sizes = [16, 1], strides = [1, 1]} : vector<16x16xf32> to vector<16x1xf32>
    %534 = vector.broadcast %533 : vector<16x1xf32> to vector<16x128xf32>
    %535 = arith.subf %534, %528 : vector<16x128xf32>
    %536 = math.absf %535 : vector<16x128xf32>
    %537 = arith.addf %532, %536 : vector<16x128xf32>
    %c0_168 = arith.constant 0 : index
    %c0_169 = arith.constant 0 : index
    %c0_170 = arith.constant 0 : index
    %538 = vector.load %arg7[%c0_168, %c0_169, %c0_170] : memref<8x16x128xf32, #tpu.memory_space<vmem>>, vector<1x16x128xf32>
    %539 = vector.shape_cast %538 : vector<1x16x128xf32> to vector<16x128xf32>
    %540 = arith.minimumf %539, %537 : vector<16x128xf32>
    %c0_171 = arith.constant 0 : index
    %c0_172 = arith.constant 0 : index
    %c0_173 = arith.constant 0 : index
    %541 = vector.load %arg7[%c0_171, %c0_172, %c0_173] : memref<8x16x128xf32, #tpu.memory_space<vmem>>, vector<1x16x128xf32>
    %542 = vector.shape_cast %541 : vector<1x16x128xf32> to vector<16x128xf32>
    %543 = vector.shape_cast %540 : vector<16x128xf32> to vector<1x16x128xf32>
    tpu.vector_store %arg7[%c0_171, %c0_172, %c0_173], %543 {strides = array<i32>} : memref<8x16x128xf32, #tpu.memory_space<vmem>>, vector<1x16x128xf32>,
    %544 = vector.extract_strided_slice %0 {offsets = [0, 1], sizes = [16, 1], strides = [1, 1]} : vector<16x16xf32> to vector<16x1xf32>
    %545 = vector.broadcast %544 : vector<16x1xf32> to vector<16x128xf32>
    %546 = arith.subf %545, %525 : vector<16x128xf32>
    %547 = math.absf %546 : vector<16x128xf32>
    %548 = vector.extract_strided_slice %0 {offsets = [0, 9], sizes = [16, 1], strides = [1, 1]} : vector<16x16xf32> to vector<16x1xf32>
    %549 = vector.broadcast %548 : vector<16x1xf32> to vector<16x128xf32>
    %550 = arith.subf %549, %528 : vector<16x128xf32>
    %551 = math.absf %550 : vector<16x128xf32>
    %552 = arith.addf %547, %551 : vector<16x128xf32>
    %553 = arith.minimumf %537, %552 : vector<16x128xf32>
    %c1_174 = arith.constant 1 : index
    %c0_175 = arith.constant 0 : index
    %c0_176 = arith.constant 0 : index
    %554 = vector.load %arg7[%c1_174, %c0_175, %c0_176] : memref<8x16x128xf32, #tpu.memory_space<vmem>>, vector<1x16x128xf32>
    %555 = vector.shape_cast %554 : vector<1x16x128xf32> to vector<16x128xf32>
    %556 = arith.minimumf %555, %552 : vector<16x128xf32>
    %c1_177 = arith.constant 1 : index
    %c0_178 = arith.constant 0 : index
    %c0_179 = arith.constant 0 : index
    %557 = vector.load %arg7[%c1_177, %c0_178, %c0_179] : memref<8x16x128xf32, #tpu.memory_space<vmem>>, vector<1x16x128xf32>
    %558 = vector.shape_cast %557 : vector<1x16x128xf32> to vector<16x128xf32>
    %559 = vector.shape_cast %556 : vector<16x128xf32> to vector<1x16x128xf32>
    tpu.vector_store %arg7[%c1_177, %c0_178, %c0_179], %559 {strides = array<i32>} : memref<8x16x128xf32, #tpu.memory_space<vmem>>, vector<1x16x128xf32>,
    %560 = vector.extract_strided_slice %0 {offsets = [0, 2], sizes = [16, 1], strides = [1, 1]} : vector<16x16xf32> to vector<16x1xf32>
    %561 = vector.broadcast %560 : vector<16x1xf32> to vector<16x128xf32>
    %562 = arith.subf %561, %525 : vector<16x128xf32>
    %563 = math.absf %562 : vector<16x128xf32>
    %564 = vector.extract_strided_slice %0 {offsets = [0, 10], sizes = [16, 1], strides = [1, 1]} : vector<16x16xf32> to vector<16x1xf32>
    %565 = vector.broadcast %564 : vector<16x1xf32> to vector<16x128xf32>
    %566 = arith.subf %565, %528 : vector<16x128xf32>
    %567 = math.absf %566 : vector<16x128xf32>
    %568 = arith.addf %563, %567 : vector<16x128xf32>
    %569 = arith.minimumf %553, %568 : vector<16x128xf32>
    %c2_180 = arith.constant 2 : index
    %c0_181 = arith.constant 0 : index
    %c0_182 = arith.constant 0 : index
    %570 = vector.load %arg7[%c2_180, %c0_181, %c0_182] : memref<8x16x128xf32, #tpu.memory_space<vmem>>, vector<1x16x128xf32>
    %571 = vector.shape_cast %570 : vector<1x16x128xf32> to vector<16x128xf32>
    %572 = arith.minimumf %571, %568 : vector<16x128xf32>
    %c2_183 = arith.constant 2 : index
    %c0_184 = arith.constant 0 : index
    %c0_185 = arith.constant 0 : index
    %573 = vector.load %arg7[%c2_183, %c0_184, %c0_185] : memref<8x16x128xf32, #tpu.memory_space<vmem>>, vector<1x16x128xf32>
    %574 = vector.shape_cast %573 : vector<1x16x128xf32> to vector<16x128xf32>
    %575 = vector.shape_cast %572 : vector<16x128xf32> to vector<1x16x128xf32>
    tpu.vector_store %arg7[%c2_183, %c0_184, %c0_185], %575 {strides = array<i32>} : memref<8x16x128xf32, #tpu.memory_space<vmem>>, vector<1x16x128xf32>,
    %576 = vector.extract_strided_slice %0 {offsets = [0, 3], sizes = [16, 1], strides = [1, 1]} : vector<16x16xf32> to vector<16x1xf32>
    %577 = vector.broadcast %576 : vector<16x1xf32> to vector<16x128xf32>
    %578 = arith.subf %577, %525 : vector<16x128xf32>
    %579 = math.absf %578 : vector<16x128xf32>
    %580 = vector.extract_strided_slice %0 {offsets = [0, 11], sizes = [16, 1], strides = [1, 1]} : vector<16x16xf32> to vector<16x1xf32>
    %581 = vector.broadcast %580 : vector<16x1xf32> to vector<16x128xf32>
    %582 = arith.subf %581, %528 : vector<16x128xf32>
    %583 = math.absf %582 : vector<16x128xf32>
    %584 = arith.addf %579, %583 : vector<16x128xf32>
    %585 = arith.minimumf %569, %584 : vector<16x128xf32>
    %c3_186 = arith.constant 3 : index
    %c0_187 = arith.constant 0 : index
    %c0_188 = arith.constant 0 : index
    %586 = vector.load %arg7[%c3_186, %c0_187, %c0_188] : memref<8x16x128xf32, #tpu.memory_space<vmem>>, vector<1x16x128xf32>
    %587 = vector.shape_cast %586 : vector<1x16x128xf32> to vector<16x128xf32>
    %588 = arith.minimumf %587, %584 : vector<16x128xf32>
    %c3_189 = arith.constant 3 : index
    %c0_190 = arith.constant 0 : index
    %c0_191 = arith.constant 0 : index
    %589 = vector.load %arg7[%c3_189, %c0_190, %c0_191] : memref<8x16x128xf32, #tpu.memory_space<vmem>>, vector<1x16x128xf32>
    %590 = vector.shape_cast %589 : vector<1x16x128xf32> to vector<16x128xf32>
    %591 = vector.shape_cast %588 : vector<16x128xf32> to vector<1x16x128xf32>
    tpu.vector_store %arg7[%c3_189, %c0_190, %c0_191], %591 {strides = array<i32>} : memref<8x16x128xf32, #tpu.memory_space<vmem>>, vector<1x16x128xf32>,
    %592 = vector.extract_strided_slice %0 {offsets = [0, 4], sizes = [16, 1], strides = [1, 1]} : vector<16x16xf32> to vector<16x1xf32>
    %593 = vector.broadcast %592 : vector<16x1xf32> to vector<16x128xf32>
    %594 = arith.subf %593, %525 : vector<16x128xf32>
    %595 = math.absf %594 : vector<16x128xf32>
    %596 = vector.extract_strided_slice %0 {offsets = [0, 12], sizes = [16, 1], strides = [1, 1]} : vector<16x16xf32> to vector<16x1xf32>
    %597 = vector.broadcast %596 : vector<16x1xf32> to vector<16x128xf32>
    %598 = arith.subf %597, %528 : vector<16x128xf32>
    %599 = math.absf %598 : vector<16x128xf32>
    %600 = arith.addf %595, %599 : vector<16x128xf32>
    %601 = arith.minimumf %585, %600 : vector<16x128xf32>
    %c4_192 = arith.constant 4 : index
    %c0_193 = arith.constant 0 : index
    %c0_194 = arith.constant 0 : index
    %602 = vector.load %arg7[%c4_192, %c0_193, %c0_194] : memref<8x16x128xf32, #tpu.memory_space<vmem>>, vector<1x16x128xf32>
    %603 = vector.shape_cast %602 : vector<1x16x128xf32> to vector<16x128xf32>
    %604 = arith.minimumf %603, %600 : vector<16x128xf32>
    %c4_195 = arith.constant 4 : index
    %c0_196 = arith.constant 0 : index
    %c0_197 = arith.constant 0 : index
    %605 = vector.load %arg7[%c4_195, %c0_196, %c0_197] : memref<8x16x128xf32, #tpu.memory_space<vmem>>, vector<1x16x128xf32>
    %606 = vector.shape_cast %605 : vector<1x16x128xf32> to vector<16x128xf32>
    %607 = vector.shape_cast %604 : vector<16x128xf32> to vector<1x16x128xf32>
    tpu.vector_store %arg7[%c4_195, %c0_196, %c0_197], %607 {strides = array<i32>} : memref<8x16x128xf32, #tpu.memory_space<vmem>>, vector<1x16x128xf32>,
    %608 = vector.extract_strided_slice %0 {offsets = [0, 5], sizes = [16, 1], strides = [1, 1]} : vector<16x16xf32> to vector<16x1xf32>
    %609 = vector.broadcast %608 : vector<16x1xf32> to vector<16x128xf32>
    %610 = arith.subf %609, %525 : vector<16x128xf32>
    %611 = math.absf %610 : vector<16x128xf32>
    %612 = vector.extract_strided_slice %0 {offsets = [0, 13], sizes = [16, 1], strides = [1, 1]} : vector<16x16xf32> to vector<16x1xf32>
    %613 = vector.broadcast %612 : vector<16x1xf32> to vector<16x128xf32>
    %614 = arith.subf %613, %528 : vector<16x128xf32>
    %615 = math.absf %614 : vector<16x128xf32>
    %616 = arith.addf %611, %615 : vector<16x128xf32>
    %617 = arith.minimumf %601, %616 : vector<16x128xf32>
    %c5_198 = arith.constant 5 : index
    %c0_199 = arith.constant 0 : index
    %c0_200 = arith.constant 0 : index
    %618 = vector.load %arg7[%c5_198, %c0_199, %c0_200] : memref<8x16x128xf32, #tpu.memory_space<vmem>>, vector<1x16x128xf32>
    %619 = vector.shape_cast %618 : vector<1x16x128xf32> to vector<16x128xf32>
    %620 = arith.minimumf %619, %616 : vector<16x128xf32>
    %c5_201 = arith.constant 5 : index
    %c0_202 = arith.constant 0 : index
    %c0_203 = arith.constant 0 : index
    %621 = vector.load %arg7[%c5_201, %c0_202, %c0_203] : memref<8x16x128xf32, #tpu.memory_space<vmem>>, vector<1x16x128xf32>
    %622 = vector.shape_cast %621 : vector<1x16x128xf32> to vector<16x128xf32>
    %623 = vector.shape_cast %620 : vector<16x128xf32> to vector<1x16x128xf32>
    tpu.vector_store %arg7[%c5_201, %c0_202, %c0_203], %623 {strides = array<i32>} : memref<8x16x128xf32, #tpu.memory_space<vmem>>, vector<1x16x128xf32>,
    %624 = vector.extract_strided_slice %0 {offsets = [0, 6], sizes = [16, 1], strides = [1, 1]} : vector<16x16xf32> to vector<16x1xf32>
    %625 = vector.broadcast %624 : vector<16x1xf32> to vector<16x128xf32>
    %626 = arith.subf %625, %525 : vector<16x128xf32>
    %627 = math.absf %626 : vector<16x128xf32>
    %628 = vector.extract_strided_slice %0 {offsets = [0, 14], sizes = [16, 1], strides = [1, 1]} : vector<16x16xf32> to vector<16x1xf32>
    %629 = vector.broadcast %628 : vector<16x1xf32> to vector<16x128xf32>
    %630 = arith.subf %629, %528 : vector<16x128xf32>
    %631 = math.absf %630 : vector<16x128xf32>
    %632 = arith.addf %627, %631 : vector<16x128xf32>
    %633 = arith.minimumf %617, %632 : vector<16x128xf32>
    %c6_204 = arith.constant 6 : index
    %c0_205 = arith.constant 0 : index
    %c0_206 = arith.constant 0 : index
    %634 = vector.load %arg7[%c6_204, %c0_205, %c0_206] : memref<8x16x128xf32, #tpu.memory_space<vmem>>, vector<1x16x128xf32>
    %635 = vector.shape_cast %634 : vector<1x16x128xf32> to vector<16x128xf32>
    %636 = arith.minimumf %635, %632 : vector<16x128xf32>
    %c6_207 = arith.constant 6 : index
    %c0_208 = arith.constant 0 : index
    %c0_209 = arith.constant 0 : index
    %637 = vector.load %arg7[%c6_207, %c0_208, %c0_209] : memref<8x16x128xf32, #tpu.memory_space<vmem>>, vector<1x16x128xf32>
    %638 = vector.shape_cast %637 : vector<1x16x128xf32> to vector<16x128xf32>
    %639 = vector.shape_cast %636 : vector<16x128xf32> to vector<1x16x128xf32>
    tpu.vector_store %arg7[%c6_207, %c0_208, %c0_209], %639 {strides = array<i32>} : memref<8x16x128xf32, #tpu.memory_space<vmem>>, vector<1x16x128xf32>,
    %640 = vector.extract_strided_slice %0 {offsets = [0, 7], sizes = [16, 1], strides = [1, 1]} : vector<16x16xf32> to vector<16x1xf32>
    %641 = vector.broadcast %640 : vector<16x1xf32> to vector<16x128xf32>
    %642 = arith.subf %641, %525 : vector<16x128xf32>
    %643 = math.absf %642 : vector<16x128xf32>
    %644 = vector.extract_strided_slice %0 {offsets = [0, 15], sizes = [16, 1], strides = [1, 1]} : vector<16x16xf32> to vector<16x1xf32>
    %645 = vector.broadcast %644 : vector<16x1xf32> to vector<16x128xf32>
    %646 = arith.subf %645, %528 : vector<16x128xf32>
    %647 = math.absf %646 : vector<16x128xf32>
    %648 = arith.addf %643, %647 : vector<16x128xf32>
    %649 = arith.minimumf %633, %648 : vector<16x128xf32>
    %c7_210 = arith.constant 7 : index
    %c0_211 = arith.constant 0 : index
    %c0_212 = arith.constant 0 : index
    %650 = vector.load %arg7[%c7_210, %c0_211, %c0_212] : memref<8x16x128xf32, #tpu.memory_space<vmem>>, vector<1x16x128xf32>
    %651 = vector.shape_cast %650 : vector<1x16x128xf32> to vector<16x128xf32>
    %652 = arith.minimumf %651, %648 : vector<16x128xf32>
    %c7_213 = arith.constant 7 : index
    %c0_214 = arith.constant 0 : index
    %c0_215 = arith.constant 0 : index
    %653 = vector.load %arg7[%c7_213, %c0_214, %c0_215] : memref<8x16x128xf32, #tpu.memory_space<vmem>>, vector<1x16x128xf32>
    %654 = vector.shape_cast %653 : vector<1x16x128xf32> to vector<16x128xf32>
    %655 = vector.shape_cast %652 : vector<16x128xf32> to vector<1x16x128xf32>
    tpu.vector_store %arg7[%c7_213, %c0_214, %c0_215], %655 {strides = array<i32>} : memref<8x16x128xf32, #tpu.memory_space<vmem>>, vector<1x16x128xf32>,
    %cst_216 = arith.constant 6.250000e-02 : f32
    %656 = vector.broadcast %cst_216 : f32 to vector<16x128xf32>
    %657 = arith.mulf %656, %649 : vector<16x128xf32>
    %658 = arith.addf %522, %657 : vector<16x128xf32>
    %659 = vector.extract_strided_slice %1 {offsets = [5, 0], sizes = [1, 128], strides = [1, 1]} : vector<16x128xf32> to vector<1x128xf32>
    %660 = vector.shape_cast %659 : vector<1x128xf32> to vector<1x128xf32>
    %661 = vector.broadcast %660 : vector<1x128xf32> to vector<16x128xf32>
    %662 = vector.extract_strided_slice %1 {offsets = [13, 0], sizes = [1, 128], strides = [1, 1]} : vector<16x128xf32> to vector<1x128xf32>
    %663 = vector.shape_cast %662 : vector<1x128xf32> to vector<1x128xf32>
    %664 = vector.broadcast %663 : vector<1x128xf32> to vector<16x128xf32>
    %665 = vector.extract_strided_slice %0 {offsets = [0, 0], sizes = [16, 1], strides = [1, 1]} : vector<16x16xf32> to vector<16x1xf32>
    %666 = vector.broadcast %665 : vector<16x1xf32> to vector<16x128xf32>
    %667 = arith.subf %666, %661 : vector<16x128xf32>
    %668 = math.absf %667 : vector<16x128xf32>
    %669 = vector.extract_strided_slice %0 {offsets = [0, 8], sizes = [16, 1], strides = [1, 1]} : vector<16x16xf32> to vector<16x1xf32>
    %670 = vector.broadcast %669 : vector<16x1xf32> to vector<16x128xf32>
    %671 = arith.subf %670, %664 : vector<16x128xf32>
    %672 = math.absf %671 : vector<16x128xf32>
    %673 = arith.addf %668, %672 : vector<16x128xf32>
    %c0_217 = arith.constant 0 : index
    %c0_218 = arith.constant 0 : index
    %c0_219 = arith.constant 0 : index
    %674 = vector.load %arg7[%c0_217, %c0_218, %c0_219] : memref<8x16x128xf32, #tpu.memory_space<vmem>>, vector<1x16x128xf32>
    %675 = vector.shape_cast %674 : vector<1x16x128xf32> to vector<16x128xf32>
    %676 = arith.minimumf %675, %673 : vector<16x128xf32>
    %c0_220 = arith.constant 0 : index
    %c0_221 = arith.constant 0 : index
    %c0_222 = arith.constant 0 : index
    %677 = vector.load %arg7[%c0_220, %c0_221, %c0_222] : memref<8x16x128xf32, #tpu.memory_space<vmem>>, vector<1x16x128xf32>
    %678 = vector.shape_cast %677 : vector<1x16x128xf32> to vector<16x128xf32>
    %679 = vector.shape_cast %676 : vector<16x128xf32> to vector<1x16x128xf32>
    tpu.vector_store %arg7[%c0_220, %c0_221, %c0_222], %679 {strides = array<i32>} : memref<8x16x128xf32, #tpu.memory_space<vmem>>, vector<1x16x128xf32>,
    %680 = vector.extract_strided_slice %0 {offsets = [0, 1], sizes = [16, 1], strides = [1, 1]} : vector<16x16xf32> to vector<16x1xf32>
    %681 = vector.broadcast %680 : vector<16x1xf32> to vector<16x128xf32>
    %682 = arith.subf %681, %661 : vector<16x128xf32>
    %683 = math.absf %682 : vector<16x128xf32>
    %684 = vector.extract_strided_slice %0 {offsets = [0, 9], sizes = [16, 1], strides = [1, 1]} : vector<16x16xf32> to vector<16x1xf32>
    %685 = vector.broadcast %684 : vector<16x1xf32> to vector<16x128xf32>
    %686 = arith.subf %685, %664 : vector<16x128xf32>
    %687 = math.absf %686 : vector<16x128xf32>
    %688 = arith.addf %683, %687 : vector<16x128xf32>
    %689 = arith.minimumf %673, %688 : vector<16x128xf32>
    %c1_223 = arith.constant 1 : index
    %c0_224 = arith.constant 0 : index
    %c0_225 = arith.constant 0 : index
    %690 = vector.load %arg7[%c1_223, %c0_224, %c0_225] : memref<8x16x128xf32, #tpu.memory_space<vmem>>, vector<1x16x128xf32>
    %691 = vector.shape_cast %690 : vector<1x16x128xf32> to vector<16x128xf32>
    %692 = arith.minimumf %691, %688 : vector<16x128xf32>
    %c1_226 = arith.constant 1 : index
    %c0_227 = arith.constant 0 : index
    %c0_228 = arith.constant 0 : index
    %693 = vector.load %arg7[%c1_226, %c0_227, %c0_228] : memref<8x16x128xf32, #tpu.memory_space<vmem>>, vector<1x16x128xf32>
    %694 = vector.shape_cast %693 : vector<1x16x128xf32> to vector<16x128xf32>
    %695 = vector.shape_cast %692 : vector<16x128xf32> to vector<1x16x128xf32>
    tpu.vector_store %arg7[%c1_226, %c0_227, %c0_228], %695 {strides = array<i32>} : memref<8x16x128xf32, #tpu.memory_space<vmem>>, vector<1x16x128xf32>,
    %696 = vector.extract_strided_slice %0 {offsets = [0, 2], sizes = [16, 1], strides = [1, 1]} : vector<16x16xf32> to vector<16x1xf32>
    %697 = vector.broadcast %696 : vector<16x1xf32> to vector<16x128xf32>
    %698 = arith.subf %697, %661 : vector<16x128xf32>
    %699 = math.absf %698 : vector<16x128xf32>
    %700 = vector.extract_strided_slice %0 {offsets = [0, 10], sizes = [16, 1], strides = [1, 1]} : vector<16x16xf32> to vector<16x1xf32>
    %701 = vector.broadcast %700 : vector<16x1xf32> to vector<16x128xf32>
    %702 = arith.subf %701, %664 : vector<16x128xf32>
    %703 = math.absf %702 : vector<16x128xf32>
    %704 = arith.addf %699, %703 : vector<16x128xf32>
    %705 = arith.minimumf %689, %704 : vector<16x128xf32>
    %c2_229 = arith.constant 2 : index
    %c0_230 = arith.constant 0 : index
    %c0_231 = arith.constant 0 : index
    %706 = vector.load %arg7[%c2_229, %c0_230, %c0_231] : memref<8x16x128xf32, #tpu.memory_space<vmem>>, vector<1x16x128xf32>
    %707 = vector.shape_cast %706 : vector<1x16x128xf32> to vector<16x128xf32>
    %708 = arith.minimumf %707, %704 : vector<16x128xf32>
    %c2_232 = arith.constant 2 : index
    %c0_233 = arith.constant 0 : index
    %c0_234 = arith.constant 0 : index
    %709 = vector.load %arg7[%c2_232, %c0_233, %c0_234] : memref<8x16x128xf32, #tpu.memory_space<vmem>>, vector<1x16x128xf32>
    %710 = vector.shape_cast %709 : vector<1x16x128xf32> to vector<16x128xf32>
    %711 = vector.shape_cast %708 : vector<16x128xf32> to vector<1x16x128xf32>
    tpu.vector_store %arg7[%c2_232, %c0_233, %c0_234], %711 {strides = array<i32>} : memref<8x16x128xf32, #tpu.memory_space<vmem>>, vector<1x16x128xf32>,
    %712 = vector.extract_strided_slice %0 {offsets = [0, 3], sizes = [16, 1], strides = [1, 1]} : vector<16x16xf32> to vector<16x1xf32>
    %713 = vector.broadcast %712 : vector<16x1xf32> to vector<16x128xf32>
    %714 = arith.subf %713, %661 : vector<16x128xf32>
    %715 = math.absf %714 : vector<16x128xf32>
    %716 = vector.extract_strided_slice %0 {offsets = [0, 11], sizes = [16, 1], strides = [1, 1]} : vector<16x16xf32> to vector<16x1xf32>
    %717 = vector.broadcast %716 : vector<16x1xf32> to vector<16x128xf32>
    %718 = arith.subf %717, %664 : vector<16x128xf32>
    %719 = math.absf %718 : vector<16x128xf32>
    %720 = arith.addf %715, %719 : vector<16x128xf32>
    %721 = arith.minimumf %705, %720 : vector<16x128xf32>
    %c3_235 = arith.constant 3 : index
    %c0_236 = arith.constant 0 : index
    %c0_237 = arith.constant 0 : index
    %722 = vector.load %arg7[%c3_235, %c0_236, %c0_237] : memref<8x16x128xf32, #tpu.memory_space<vmem>>, vector<1x16x128xf32>
    %723 = vector.shape_cast %722 : vector<1x16x128xf32> to vector<16x128xf32>
    %724 = arith.minimumf %723, %720 : vector<16x128xf32>
    %c3_238 = arith.constant 3 : index
    %c0_239 = arith.constant 0 : index
    %c0_240 = arith.constant 0 : index
    %725 = vector.load %arg7[%c3_238, %c0_239, %c0_240] : memref<8x16x128xf32, #tpu.memory_space<vmem>>, vector<1x16x128xf32>
    %726 = vector.shape_cast %725 : vector<1x16x128xf32> to vector<16x128xf32>
    %727 = vector.shape_cast %724 : vector<16x128xf32> to vector<1x16x128xf32>
    tpu.vector_store %arg7[%c3_238, %c0_239, %c0_240], %727 {strides = array<i32>} : memref<8x16x128xf32, #tpu.memory_space<vmem>>, vector<1x16x128xf32>,
    %728 = vector.extract_strided_slice %0 {offsets = [0, 4], sizes = [16, 1], strides = [1, 1]} : vector<16x16xf32> to vector<16x1xf32>
    %729 = vector.broadcast %728 : vector<16x1xf32> to vector<16x128xf32>
    %730 = arith.subf %729, %661 : vector<16x128xf32>
    %731 = math.absf %730 : vector<16x128xf32>
    %732 = vector.extract_strided_slice %0 {offsets = [0, 12], sizes = [16, 1], strides = [1, 1]} : vector<16x16xf32> to vector<16x1xf32>
    %733 = vector.broadcast %732 : vector<16x1xf32> to vector<16x128xf32>
    %734 = arith.subf %733, %664 : vector<16x128xf32>
    %735 = math.absf %734 : vector<16x128xf32>
    %736 = arith.addf %731, %735 : vector<16x128xf32>
    %737 = arith.minimumf %721, %736 : vector<16x128xf32>
    %c4_241 = arith.constant 4 : index
    %c0_242 = arith.constant 0 : index
    %c0_243 = arith.constant 0 : index
    %738 = vector.load %arg7[%c4_241, %c0_242, %c0_243] : memref<8x16x128xf32, #tpu.memory_space<vmem>>, vector<1x16x128xf32>
    %739 = vector.shape_cast %738 : vector<1x16x128xf32> to vector<16x128xf32>
    %740 = arith.minimumf %739, %736 : vector<16x128xf32>
    %c4_244 = arith.constant 4 : index
    %c0_245 = arith.constant 0 : index
    %c0_246 = arith.constant 0 : index
    %741 = vector.load %arg7[%c4_244, %c0_245, %c0_246] : memref<8x16x128xf32, #tpu.memory_space<vmem>>, vector<1x16x128xf32>
    %742 = vector.shape_cast %741 : vector<1x16x128xf32> to vector<16x128xf32>
    %743 = vector.shape_cast %740 : vector<16x128xf32> to vector<1x16x128xf32>
    tpu.vector_store %arg7[%c4_244, %c0_245, %c0_246], %743 {strides = array<i32>} : memref<8x16x128xf32, #tpu.memory_space<vmem>>, vector<1x16x128xf32>,
    %744 = vector.extract_strided_slice %0 {offsets = [0, 5], sizes = [16, 1], strides = [1, 1]} : vector<16x16xf32> to vector<16x1xf32>
    %745 = vector.broadcast %744 : vector<16x1xf32> to vector<16x128xf32>
    %746 = arith.subf %745, %661 : vector<16x128xf32>
    %747 = math.absf %746 : vector<16x128xf32>
    %748 = vector.extract_strided_slice %0 {offsets = [0, 13], sizes = [16, 1], strides = [1, 1]} : vector<16x16xf32> to vector<16x1xf32>
    %749 = vector.broadcast %748 : vector<16x1xf32> to vector<16x128xf32>
    %750 = arith.subf %749, %664 : vector<16x128xf32>
    %751 = math.absf %750 : vector<16x128xf32>
    %752 = arith.addf %747, %751 : vector<16x128xf32>
    %753 = arith.minimumf %737, %752 : vector<16x128xf32>
    %c5_247 = arith.constant 5 : index
    %c0_248 = arith.constant 0 : index
    %c0_249 = arith.constant 0 : index
    %754 = vector.load %arg7[%c5_247, %c0_248, %c0_249] : memref<8x16x128xf32, #tpu.memory_space<vmem>>, vector<1x16x128xf32>
    %755 = vector.shape_cast %754 : vector<1x16x128xf32> to vector<16x128xf32>
    %756 = arith.minimumf %755, %752 : vector<16x128xf32>
    %c5_250 = arith.constant 5 : index
    %c0_251 = arith.constant 0 : index
    %c0_252 = arith.constant 0 : index
    %757 = vector.load %arg7[%c5_250, %c0_251, %c0_252] : memref<8x16x128xf32, #tpu.memory_space<vmem>>, vector<1x16x128xf32>
    %758 = vector.shape_cast %757 : vector<1x16x128xf32> to vector<16x128xf32>
    %759 = vector.shape_cast %756 : vector<16x128xf32> to vector<1x16x128xf32>
    tpu.vector_store %arg7[%c5_250, %c0_251, %c0_252], %759 {strides = array<i32>} : memref<8x16x128xf32, #tpu.memory_space<vmem>>, vector<1x16x128xf32>,
    %760 = vector.extract_strided_slice %0 {offsets = [0, 6], sizes = [16, 1], strides = [1, 1]} : vector<16x16xf32> to vector<16x1xf32>
    %761 = vector.broadcast %760 : vector<16x1xf32> to vector<16x128xf32>
    %762 = arith.subf %761, %661 : vector<16x128xf32>
    %763 = math.absf %762 : vector<16x128xf32>
    %764 = vector.extract_strided_slice %0 {offsets = [0, 14], sizes = [16, 1], strides = [1, 1]} : vector<16x16xf32> to vector<16x1xf32>
    %765 = vector.broadcast %764 : vector<16x1xf32> to vector<16x128xf32>
    %766 = arith.subf %765, %664 : vector<16x128xf32>
    %767 = math.absf %766 : vector<16x128xf32>
    %768 = arith.addf %763, %767 : vector<16x128xf32>
    %769 = arith.minimumf %753, %768 : vector<16x128xf32>
    %c6_253 = arith.constant 6 : index
    %c0_254 = arith.constant 0 : index
    %c0_255 = arith.constant 0 : index
    %770 = vector.load %arg7[%c6_253, %c0_254, %c0_255] : memref<8x16x128xf32, #tpu.memory_space<vmem>>, vector<1x16x128xf32>
    %771 = vector.shape_cast %770 : vector<1x16x128xf32> to vector<16x128xf32>
    %772 = arith.minimumf %771, %768 : vector<16x128xf32>
    %c6_256 = arith.constant 6 : index
    %c0_257 = arith.constant 0 : index
    %c0_258 = arith.constant 0 : index
    %773 = vector.load %arg7[%c6_256, %c0_257, %c0_258] : memref<8x16x128xf32, #tpu.memory_space<vmem>>, vector<1x16x128xf32>
    %774 = vector.shape_cast %773 : vector<1x16x128xf32> to vector<16x128xf32>
    %775 = vector.shape_cast %772 : vector<16x128xf32> to vector<1x16x128xf32>
    tpu.vector_store %arg7[%c6_256, %c0_257, %c0_258], %775 {strides = array<i32>} : memref<8x16x128xf32, #tpu.memory_space<vmem>>, vector<1x16x128xf32>,
    %776 = vector.extract_strided_slice %0 {offsets = [0, 7], sizes = [16, 1], strides = [1, 1]} : vector<16x16xf32> to vector<16x1xf32>
    %777 = vector.broadcast %776 : vector<16x1xf32> to vector<16x128xf32>
    %778 = arith.subf %777, %661 : vector<16x128xf32>
    %779 = math.absf %778 : vector<16x128xf32>
    %780 = vector.extract_strided_slice %0 {offsets = [0, 15], sizes = [16, 1], strides = [1, 1]} : vector<16x16xf32> to vector<16x1xf32>
    %781 = vector.broadcast %780 : vector<16x1xf32> to vector<16x128xf32>
    %782 = arith.subf %781, %664 : vector<16x128xf32>
    %783 = math.absf %782 : vector<16x128xf32>
    %784 = arith.addf %779, %783 : vector<16x128xf32>
    %785 = arith.minimumf %769, %784 : vector<16x128xf32>
    %c7_259 = arith.constant 7 : index
    %c0_260 = arith.constant 0 : index
    %c0_261 = arith.constant 0 : index
    %786 = vector.load %arg7[%c7_259, %c0_260, %c0_261] : memref<8x16x128xf32, #tpu.memory_space<vmem>>, vector<1x16x128xf32>
    %787 = vector.shape_cast %786 : vector<1x16x128xf32> to vector<16x128xf32>
    %788 = arith.minimumf %787, %784 : vector<16x128xf32>
    %c7_262 = arith.constant 7 : index
    %c0_263 = arith.constant 0 : index
    %c0_264 = arith.constant 0 : index
    %789 = vector.load %arg7[%c7_262, %c0_263, %c0_264] : memref<8x16x128xf32, #tpu.memory_space<vmem>>, vector<1x16x128xf32>
    %790 = vector.shape_cast %789 : vector<1x16x128xf32> to vector<16x128xf32>
    %791 = vector.shape_cast %788 : vector<16x128xf32> to vector<1x16x128xf32>
    tpu.vector_store %arg7[%c7_262, %c0_263, %c0_264], %791 {strides = array<i32>} : memref<8x16x128xf32, #tpu.memory_space<vmem>>, vector<1x16x128xf32>,
    %cst_265 = arith.constant 6.250000e-02 : f32
    %792 = vector.broadcast %cst_265 : f32 to vector<16x128xf32>
    %793 = arith.mulf %792, %785 : vector<16x128xf32>
    %794 = arith.addf %658, %793 : vector<16x128xf32>
    %795 = vector.extract_strided_slice %1 {offsets = [6, 0], sizes = [1, 128], strides = [1, 1]} : vector<16x128xf32> to vector<1x128xf32>
    %796 = vector.shape_cast %795 : vector<1x128xf32> to vector<1x128xf32>
    %797 = vector.broadcast %796 : vector<1x128xf32> to vector<16x128xf32>
    %798 = vector.extract_strided_slice %1 {offsets = [14, 0], sizes = [1, 128], strides = [1, 1]} : vector<16x128xf32> to vector<1x128xf32>
    %799 = vector.shape_cast %798 : vector<1x128xf32> to vector<1x128xf32>
    %800 = vector.broadcast %799 : vector<1x128xf32> to vector<16x128xf32>
    %801 = vector.extract_strided_slice %0 {offsets = [0, 0], sizes = [16, 1], strides = [1, 1]} : vector<16x16xf32> to vector<16x1xf32>
    %802 = vector.broadcast %801 : vector<16x1xf32> to vector<16x128xf32>
    %803 = arith.subf %802, %797 : vector<16x128xf32>
    %804 = math.absf %803 : vector<16x128xf32>
    %805 = vector.extract_strided_slice %0 {offsets = [0, 8], sizes = [16, 1], strides = [1, 1]} : vector<16x16xf32> to vector<16x1xf32>
    %806 = vector.broadcast %805 : vector<16x1xf32> to vector<16x128xf32>
    %807 = arith.subf %806, %800 : vector<16x128xf32>
    %808 = math.absf %807 : vector<16x128xf32>
    %809 = arith.addf %804, %808 : vector<16x128xf32>
    %c0_266 = arith.constant 0 : index
    %c0_267 = arith.constant 0 : index
    %c0_268 = arith.constant 0 : index
    %810 = vector.load %arg7[%c0_266, %c0_267, %c0_268] : memref<8x16x128xf32, #tpu.memory_space<vmem>>, vector<1x16x128xf32>
    %811 = vector.shape_cast %810 : vector<1x16x128xf32> to vector<16x128xf32>
    %812 = arith.minimumf %811, %809 : vector<16x128xf32>
    %c0_269 = arith.constant 0 : index
    %c0_270 = arith.constant 0 : index
    %c0_271 = arith.constant 0 : index
    %813 = vector.load %arg7[%c0_269, %c0_270, %c0_271] : memref<8x16x128xf32, #tpu.memory_space<vmem>>, vector<1x16x128xf32>
    %814 = vector.shape_cast %813 : vector<1x16x128xf32> to vector<16x128xf32>
    %815 = vector.shape_cast %812 : vector<16x128xf32> to vector<1x16x128xf32>
    tpu.vector_store %arg7[%c0_269, %c0_270, %c0_271], %815 {strides = array<i32>} : memref<8x16x128xf32, #tpu.memory_space<vmem>>, vector<1x16x128xf32>,
    %816 = vector.extract_strided_slice %0 {offsets = [0, 1], sizes = [16, 1], strides = [1, 1]} : vector<16x16xf32> to vector<16x1xf32>
    %817 = vector.broadcast %816 : vector<16x1xf32> to vector<16x128xf32>
    %818 = arith.subf %817, %797 : vector<16x128xf32>
    %819 = math.absf %818 : vector<16x128xf32>
    %820 = vector.extract_strided_slice %0 {offsets = [0, 9], sizes = [16, 1], strides = [1, 1]} : vector<16x16xf32> to vector<16x1xf32>
    %821 = vector.broadcast %820 : vector<16x1xf32> to vector<16x128xf32>
    %822 = arith.subf %821, %800 : vector<16x128xf32>
    %823 = math.absf %822 : vector<16x128xf32>
    %824 = arith.addf %819, %823 : vector<16x128xf32>
    %825 = arith.minimumf %809, %824 : vector<16x128xf32>
    %c1_272 = arith.constant 1 : index
    %c0_273 = arith.constant 0 : index
    %c0_274 = arith.constant 0 : index
    %826 = vector.load %arg7[%c1_272, %c0_273, %c0_274] : memref<8x16x128xf32, #tpu.memory_space<vmem>>, vector<1x16x128xf32>
    %827 = vector.shape_cast %826 : vector<1x16x128xf32> to vector<16x128xf32>
    %828 = arith.minimumf %827, %824 : vector<16x128xf32>
    %c1_275 = arith.constant 1 : index
    %c0_276 = arith.constant 0 : index
    %c0_277 = arith.constant 0 : index
    %829 = vector.load %arg7[%c1_275, %c0_276, %c0_277] : memref<8x16x128xf32, #tpu.memory_space<vmem>>, vector<1x16x128xf32>
    %830 = vector.shape_cast %829 : vector<1x16x128xf32> to vector<16x128xf32>
    %831 = vector.shape_cast %828 : vector<16x128xf32> to vector<1x16x128xf32>
    tpu.vector_store %arg7[%c1_275, %c0_276, %c0_277], %831 {strides = array<i32>} : memref<8x16x128xf32, #tpu.memory_space<vmem>>, vector<1x16x128xf32>,
    %832 = vector.extract_strided_slice %0 {offsets = [0, 2], sizes = [16, 1], strides = [1, 1]} : vector<16x16xf32> to vector<16x1xf32>
    %833 = vector.broadcast %832 : vector<16x1xf32> to vector<16x128xf32>
    %834 = arith.subf %833, %797 : vector<16x128xf32>
    %835 = math.absf %834 : vector<16x128xf32>
    %836 = vector.extract_strided_slice %0 {offsets = [0, 10], sizes = [16, 1], strides = [1, 1]} : vector<16x16xf32> to vector<16x1xf32>
    %837 = vector.broadcast %836 : vector<16x1xf32> to vector<16x128xf32>
    %838 = arith.subf %837, %800 : vector<16x128xf32>
    %839 = math.absf %838 : vector<16x128xf32>
    %840 = arith.addf %835, %839 : vector<16x128xf32>
    %841 = arith.minimumf %825, %840 : vector<16x128xf32>
    %c2_278 = arith.constant 2 : index
    %c0_279 = arith.constant 0 : index
    %c0_280 = arith.constant 0 : index
    %842 = vector.load %arg7[%c2_278, %c0_279, %c0_280] : memref<8x16x128xf32, #tpu.memory_space<vmem>>, vector<1x16x128xf32>
    %843 = vector.shape_cast %842 : vector<1x16x128xf32> to vector<16x128xf32>
    %844 = arith.minimumf %843, %840 : vector<16x128xf32>
    %c2_281 = arith.constant 2 : index
    %c0_282 = arith.constant 0 : index
    %c0_283 = arith.constant 0 : index
    %845 = vector.load %arg7[%c2_281, %c0_282, %c0_283] : memref<8x16x128xf32, #tpu.memory_space<vmem>>, vector<1x16x128xf32>
    %846 = vector.shape_cast %845 : vector<1x16x128xf32> to vector<16x128xf32>
    %847 = vector.shape_cast %844 : vector<16x128xf32> to vector<1x16x128xf32>
    tpu.vector_store %arg7[%c2_281, %c0_282, %c0_283], %847 {strides = array<i32>} : memref<8x16x128xf32, #tpu.memory_space<vmem>>, vector<1x16x128xf32>,
    %848 = vector.extract_strided_slice %0 {offsets = [0, 3], sizes = [16, 1], strides = [1, 1]} : vector<16x16xf32> to vector<16x1xf32>
    %849 = vector.broadcast %848 : vector<16x1xf32> to vector<16x128xf32>
    %850 = arith.subf %849, %797 : vector<16x128xf32>
    %851 = math.absf %850 : vector<16x128xf32>
    %852 = vector.extract_strided_slice %0 {offsets = [0, 11], sizes = [16, 1], strides = [1, 1]} : vector<16x16xf32> to vector<16x1xf32>
    %853 = vector.broadcast %852 : vector<16x1xf32> to vector<16x128xf32>
    %854 = arith.subf %853, %800 : vector<16x128xf32>
    %855 = math.absf %854 : vector<16x128xf32>
    %856 = arith.addf %851, %855 : vector<16x128xf32>
    %857 = arith.minimumf %841, %856 : vector<16x128xf32>
    %c3_284 = arith.constant 3 : index
    %c0_285 = arith.constant 0 : index
    %c0_286 = arith.constant 0 : index
    %858 = vector.load %arg7[%c3_284, %c0_285, %c0_286] : memref<8x16x128xf32, #tpu.memory_space<vmem>>, vector<1x16x128xf32>
    %859 = vector.shape_cast %858 : vector<1x16x128xf32> to vector<16x128xf32>
    %860 = arith.minimumf %859, %856 : vector<16x128xf32>
    %c3_287 = arith.constant 3 : index
    %c0_288 = arith.constant 0 : index
    %c0_289 = arith.constant 0 : index
    %861 = vector.load %arg7[%c3_287, %c0_288, %c0_289] : memref<8x16x128xf32, #tpu.memory_space<vmem>>, vector<1x16x128xf32>
    %862 = vector.shape_cast %861 : vector<1x16x128xf32> to vector<16x128xf32>
    %863 = vector.shape_cast %860 : vector<16x128xf32> to vector<1x16x128xf32>
    tpu.vector_store %arg7[%c3_287, %c0_288, %c0_289], %863 {strides = array<i32>} : memref<8x16x128xf32, #tpu.memory_space<vmem>>, vector<1x16x128xf32>,
    %864 = vector.extract_strided_slice %0 {offsets = [0, 4], sizes = [16, 1], strides = [1, 1]} : vector<16x16xf32> to vector<16x1xf32>
    %865 = vector.broadcast %864 : vector<16x1xf32> to vector<16x128xf32>
    %866 = arith.subf %865, %797 : vector<16x128xf32>
    %867 = math.absf %866 : vector<16x128xf32>
    %868 = vector.extract_strided_slice %0 {offsets = [0, 12], sizes = [16, 1], strides = [1, 1]} : vector<16x16xf32> to vector<16x1xf32>
    %869 = vector.broadcast %868 : vector<16x1xf32> to vector<16x128xf32>
    %870 = arith.subf %869, %800 : vector<16x128xf32>
    %871 = math.absf %870 : vector<16x128xf32>
    %872 = arith.addf %867, %871 : vector<16x128xf32>
    %873 = arith.minimumf %857, %872 : vector<16x128xf32>
    %c4_290 = arith.constant 4 : index
    %c0_291 = arith.constant 0 : index
    %c0_292 = arith.constant 0 : index
    %874 = vector.load %arg7[%c4_290, %c0_291, %c0_292] : memref<8x16x128xf32, #tpu.memory_space<vmem>>, vector<1x16x128xf32>
    %875 = vector.shape_cast %874 : vector<1x16x128xf32> to vector<16x128xf32>
    %876 = arith.minimumf %875, %872 : vector<16x128xf32>
    %c4_293 = arith.constant 4 : index
    %c0_294 = arith.constant 0 : index
    %c0_295 = arith.constant 0 : index
    %877 = vector.load %arg7[%c4_293, %c0_294, %c0_295] : memref<8x16x128xf32, #tpu.memory_space<vmem>>, vector<1x16x128xf32>
    %878 = vector.shape_cast %877 : vector<1x16x128xf32> to vector<16x128xf32>
    %879 = vector.shape_cast %876 : vector<16x128xf32> to vector<1x16x128xf32>
    tpu.vector_store %arg7[%c4_293, %c0_294, %c0_295], %879 {strides = array<i32>} : memref<8x16x128xf32, #tpu.memory_space<vmem>>, vector<1x16x128xf32>,
    %880 = vector.extract_strided_slice %0 {offsets = [0, 5], sizes = [16, 1], strides = [1, 1]} : vector<16x16xf32> to vector<16x1xf32>
    %881 = vector.broadcast %880 : vector<16x1xf32> to vector<16x128xf32>
    %882 = arith.subf %881, %797 : vector<16x128xf32>
    %883 = math.absf %882 : vector<16x128xf32>
    %884 = vector.extract_strided_slice %0 {offsets = [0, 13], sizes = [16, 1], strides = [1, 1]} : vector<16x16xf32> to vector<16x1xf32>
    %885 = vector.broadcast %884 : vector<16x1xf32> to vector<16x128xf32>
    %886 = arith.subf %885, %800 : vector<16x128xf32>
    %887 = math.absf %886 : vector<16x128xf32>
    %888 = arith.addf %883, %887 : vector<16x128xf32>
    %889 = arith.minimumf %873, %888 : vector<16x128xf32>
    %c5_296 = arith.constant 5 : index
    %c0_297 = arith.constant 0 : index
    %c0_298 = arith.constant 0 : index
    %890 = vector.load %arg7[%c5_296, %c0_297, %c0_298] : memref<8x16x128xf32, #tpu.memory_space<vmem>>, vector<1x16x128xf32>
    %891 = vector.shape_cast %890 : vector<1x16x128xf32> to vector<16x128xf32>
    %892 = arith.minimumf %891, %888 : vector<16x128xf32>
    %c5_299 = arith.constant 5 : index
    %c0_300 = arith.constant 0 : index
    %c0_301 = arith.constant 0 : index
    %893 = vector.load %arg7[%c5_299, %c0_300, %c0_301] : memref<8x16x128xf32, #tpu.memory_space<vmem>>, vector<1x16x128xf32>
    %894 = vector.shape_cast %893 : vector<1x16x128xf32> to vector<16x128xf32>
    %895 = vector.shape_cast %892 : vector<16x128xf32> to vector<1x16x128xf32>
    tpu.vector_store %arg7[%c5_299, %c0_300, %c0_301], %895 {strides = array<i32>} : memref<8x16x128xf32, #tpu.memory_space<vmem>>, vector<1x16x128xf32>,
    %896 = vector.extract_strided_slice %0 {offsets = [0, 6], sizes = [16, 1], strides = [1, 1]} : vector<16x16xf32> to vector<16x1xf32>
    %897 = vector.broadcast %896 : vector<16x1xf32> to vector<16x128xf32>
    %898 = arith.subf %897, %797 : vector<16x128xf32>
    %899 = math.absf %898 : vector<16x128xf32>
    %900 = vector.extract_strided_slice %0 {offsets = [0, 14], sizes = [16, 1], strides = [1, 1]} : vector<16x16xf32> to vector<16x1xf32>
    %901 = vector.broadcast %900 : vector<16x1xf32> to vector<16x128xf32>
    %902 = arith.subf %901, %800 : vector<16x128xf32>
    %903 = math.absf %902 : vector<16x128xf32>
    %904 = arith.addf %899, %903 : vector<16x128xf32>
    %905 = arith.minimumf %889, %904 : vector<16x128xf32>
    %c6_302 = arith.constant 6 : index
    %c0_303 = arith.constant 0 : index
    %c0_304 = arith.constant 0 : index
    %906 = vector.load %arg7[%c6_302, %c0_303, %c0_304] : memref<8x16x128xf32, #tpu.memory_space<vmem>>, vector<1x16x128xf32>
    %907 = vector.shape_cast %906 : vector<1x16x128xf32> to vector<16x128xf32>
    %908 = arith.minimumf %907, %904 : vector<16x128xf32>
    %c6_305 = arith.constant 6 : index
    %c0_306 = arith.constant 0 : index
    %c0_307 = arith.constant 0 : index
    %909 = vector.load %arg7[%c6_305, %c0_306, %c0_307] : memref<8x16x128xf32, #tpu.memory_space<vmem>>, vector<1x16x128xf32>
    %910 = vector.shape_cast %909 : vector<1x16x128xf32> to vector<16x128xf32>
    %911 = vector.shape_cast %908 : vector<16x128xf32> to vector<1x16x128xf32>
    tpu.vector_store %arg7[%c6_305, %c0_306, %c0_307], %911 {strides = array<i32>} : memref<8x16x128xf32, #tpu.memory_space<vmem>>, vector<1x16x128xf32>,
    %912 = vector.extract_strided_slice %0 {offsets = [0, 7], sizes = [16, 1], strides = [1, 1]} : vector<16x16xf32> to vector<16x1xf32>
    %913 = vector.broadcast %912 : vector<16x1xf32> to vector<16x128xf32>
    %914 = arith.subf %913, %797 : vector<16x128xf32>
    %915 = math.absf %914 : vector<16x128xf32>
    %916 = vector.extract_strided_slice %0 {offsets = [0, 15], sizes = [16, 1], strides = [1, 1]} : vector<16x16xf32> to vector<16x1xf32>
    %917 = vector.broadcast %916 : vector<16x1xf32> to vector<16x128xf32>
    %918 = arith.subf %917, %800 : vector<16x128xf32>
    %919 = math.absf %918 : vector<16x128xf32>
    %920 = arith.addf %915, %919 : vector<16x128xf32>
    %921 = arith.minimumf %905, %920 : vector<16x128xf32>
    %c7_308 = arith.constant 7 : index
    %c0_309 = arith.constant 0 : index
    %c0_310 = arith.constant 0 : index
    %922 = vector.load %arg7[%c7_308, %c0_309, %c0_310] : memref<8x16x128xf32, #tpu.memory_space<vmem>>, vector<1x16x128xf32>
    %923 = vector.shape_cast %922 : vector<1x16x128xf32> to vector<16x128xf32>
    %924 = arith.minimumf %923, %920 : vector<16x128xf32>
    %c7_311 = arith.constant 7 : index
    %c0_312 = arith.constant 0 : index
    %c0_313 = arith.constant 0 : index
    %925 = vector.load %arg7[%c7_311, %c0_312, %c0_313] : memref<8x16x128xf32, #tpu.memory_space<vmem>>, vector<1x16x128xf32>
    %926 = vector.shape_cast %925 : vector<1x16x128xf32> to vector<16x128xf32>
    %927 = vector.shape_cast %924 : vector<16x128xf32> to vector<1x16x128xf32>
    tpu.vector_store %arg7[%c7_311, %c0_312, %c0_313], %927 {strides = array<i32>} : memref<8x16x128xf32, #tpu.memory_space<vmem>>, vector<1x16x128xf32>,
    %cst_314 = arith.constant 6.250000e-02 : f32
    %928 = vector.broadcast %cst_314 : f32 to vector<16x128xf32>
    %929 = arith.mulf %928, %921 : vector<16x128xf32>
    %930 = arith.addf %794, %929 : vector<16x128xf32>
    %931 = vector.extract_strided_slice %1 {offsets = [7, 0], sizes = [1, 128], strides = [1, 1]} : vector<16x128xf32> to vector<1x128xf32>
    %932 = vector.shape_cast %931 : vector<1x128xf32> to vector<1x128xf32>
    %933 = vector.broadcast %932 : vector<1x128xf32> to vector<16x128xf32>
    %934 = vector.extract_strided_slice %1 {offsets = [15, 0], sizes = [1, 128], strides = [1, 1]} : vector<16x128xf32> to vector<1x128xf32>
    %935 = vector.shape_cast %934 : vector<1x128xf32> to vector<1x128xf32>
    %936 = vector.broadcast %935 : vector<1x128xf32> to vector<16x128xf32>
    %937 = vector.extract_strided_slice %0 {offsets = [0, 0], sizes = [16, 1], strides = [1, 1]} : vector<16x16xf32> to vector<16x1xf32>
    %938 = vector.broadcast %937 : vector<16x1xf32> to vector<16x128xf32>
    %939 = arith.subf %938, %933 : vector<16x128xf32>
    %940 = math.absf %939 : vector<16x128xf32>
    %941 = vector.extract_strided_slice %0 {offsets = [0, 8], sizes = [16, 1], strides = [1, 1]} : vector<16x16xf32> to vector<16x1xf32>
    %942 = vector.broadcast %941 : vector<16x1xf32> to vector<16x128xf32>
    %943 = arith.subf %942, %936 : vector<16x128xf32>
    %944 = math.absf %943 : vector<16x128xf32>
    %945 = arith.addf %940, %944 : vector<16x128xf32>
    %c0_315 = arith.constant 0 : index
    %c0_316 = arith.constant 0 : index
    %c0_317 = arith.constant 0 : index
    %946 = vector.load %arg7[%c0_315, %c0_316, %c0_317] : memref<8x16x128xf32, #tpu.memory_space<vmem>>, vector<1x16x128xf32>
    %947 = vector.shape_cast %946 : vector<1x16x128xf32> to vector<16x128xf32>
    %948 = arith.minimumf %947, %945 : vector<16x128xf32>
    %c0_318 = arith.constant 0 : index
    %c0_319 = arith.constant 0 : index
    %c0_320 = arith.constant 0 : index
    %949 = vector.load %arg7[%c0_318, %c0_319, %c0_320] : memref<8x16x128xf32, #tpu.memory_space<vmem>>, vector<1x16x128xf32>
    %950 = vector.shape_cast %949 : vector<1x16x128xf32> to vector<16x128xf32>
    %951 = vector.shape_cast %948 : vector<16x128xf32> to vector<1x16x128xf32>
    tpu.vector_store %arg7[%c0_318, %c0_319, %c0_320], %951 {strides = array<i32>} : memref<8x16x128xf32, #tpu.memory_space<vmem>>, vector<1x16x128xf32>,
    %952 = vector.extract_strided_slice %0 {offsets = [0, 1], sizes = [16, 1], strides = [1, 1]} : vector<16x16xf32> to vector<16x1xf32>
    %953 = vector.broadcast %952 : vector<16x1xf32> to vector<16x128xf32>
    %954 = arith.subf %953, %933 : vector<16x128xf32>
    %955 = math.absf %954 : vector<16x128xf32>
    %956 = vector.extract_strided_slice %0 {offsets = [0, 9], sizes = [16, 1], strides = [1, 1]} : vector<16x16xf32> to vector<16x1xf32>
    %957 = vector.broadcast %956 : vector<16x1xf32> to vector<16x128xf32>
    %958 = arith.subf %957, %936 : vector<16x128xf32>
    %959 = math.absf %958 : vector<16x128xf32>
    %960 = arith.addf %955, %959 : vector<16x128xf32>
    %961 = arith.minimumf %945, %960 : vector<16x128xf32>
    %c1_321 = arith.constant 1 : index
    %c0_322 = arith.constant 0 : index
    %c0_323 = arith.constant 0 : index
    %962 = vector.load %arg7[%c1_321, %c0_322, %c0_323] : memref<8x16x128xf32, #tpu.memory_space<vmem>>, vector<1x16x128xf32>
    %963 = vector.shape_cast %962 : vector<1x16x128xf32> to vector<16x128xf32>
    %964 = arith.minimumf %963, %960 : vector<16x128xf32>
    %c1_324 = arith.constant 1 : index
    %c0_325 = arith.constant 0 : index
    %c0_326 = arith.constant 0 : index
    %965 = vector.load %arg7[%c1_324, %c0_325, %c0_326] : memref<8x16x128xf32, #tpu.memory_space<vmem>>, vector<1x16x128xf32>
    %966 = vector.shape_cast %965 : vector<1x16x128xf32> to vector<16x128xf32>
    %967 = vector.shape_cast %964 : vector<16x128xf32> to vector<1x16x128xf32>
    tpu.vector_store %arg7[%c1_324, %c0_325, %c0_326], %967 {strides = array<i32>} : memref<8x16x128xf32, #tpu.memory_space<vmem>>, vector<1x16x128xf32>,
    %968 = vector.extract_strided_slice %0 {offsets = [0, 2], sizes = [16, 1], strides = [1, 1]} : vector<16x16xf32> to vector<16x1xf32>
    %969 = vector.broadcast %968 : vector<16x1xf32> to vector<16x128xf32>
    %970 = arith.subf %969, %933 : vector<16x128xf32>
    %971 = math.absf %970 : vector<16x128xf32>
    %972 = vector.extract_strided_slice %0 {offsets = [0, 10], sizes = [16, 1], strides = [1, 1]} : vector<16x16xf32> to vector<16x1xf32>
    %973 = vector.broadcast %972 : vector<16x1xf32> to vector<16x128xf32>
    %974 = arith.subf %973, %936 : vector<16x128xf32>
    %975 = math.absf %974 : vector<16x128xf32>
    %976 = arith.addf %971, %975 : vector<16x128xf32>
    %977 = arith.minimumf %961, %976 : vector<16x128xf32>
    %c2_327 = arith.constant 2 : index
    %c0_328 = arith.constant 0 : index
    %c0_329 = arith.constant 0 : index
    %978 = vector.load %arg7[%c2_327, %c0_328, %c0_329] : memref<8x16x128xf32, #tpu.memory_space<vmem>>, vector<1x16x128xf32>
    %979 = vector.shape_cast %978 : vector<1x16x128xf32> to vector<16x128xf32>
    %980 = arith.minimumf %979, %976 : vector<16x128xf32>
    %c2_330 = arith.constant 2 : index
    %c0_331 = arith.constant 0 : index
    %c0_332 = arith.constant 0 : index
    %981 = vector.load %arg7[%c2_330, %c0_331, %c0_332] : memref<8x16x128xf32, #tpu.memory_space<vmem>>, vector<1x16x128xf32>
    %982 = vector.shape_cast %981 : vector<1x16x128xf32> to vector<16x128xf32>
    %983 = vector.shape_cast %980 : vector<16x128xf32> to vector<1x16x128xf32>
    tpu.vector_store %arg7[%c2_330, %c0_331, %c0_332], %983 {strides = array<i32>} : memref<8x16x128xf32, #tpu.memory_space<vmem>>, vector<1x16x128xf32>,
    %984 = vector.extract_strided_slice %0 {offsets = [0, 3], sizes = [16, 1], strides = [1, 1]} : vector<16x16xf32> to vector<16x1xf32>
    %985 = vector.broadcast %984 : vector<16x1xf32> to vector<16x128xf32>
    %986 = arith.subf %985, %933 : vector<16x128xf32>
    %987 = math.absf %986 : vector<16x128xf32>
    %988 = vector.extract_strided_slice %0 {offsets = [0, 11], sizes = [16, 1], strides = [1, 1]} : vector<16x16xf32> to vector<16x1xf32>
    %989 = vector.broadcast %988 : vector<16x1xf32> to vector<16x128xf32>
    %990 = arith.subf %989, %936 : vector<16x128xf32>
    %991 = math.absf %990 : vector<16x128xf32>
    %992 = arith.addf %987, %991 : vector<16x128xf32>
    %993 = arith.minimumf %977, %992 : vector<16x128xf32>
    %c3_333 = arith.constant 3 : index
    %c0_334 = arith.constant 0 : index
    %c0_335 = arith.constant 0 : index
    %994 = vector.load %arg7[%c3_333, %c0_334, %c0_335] : memref<8x16x128xf32, #tpu.memory_space<vmem>>, vector<1x16x128xf32>
    %995 = vector.shape_cast %994 : vector<1x16x128xf32> to vector<16x128xf32>
    %996 = arith.minimumf %995, %992 : vector<16x128xf32>
    %c3_336 = arith.constant 3 : index
    %c0_337 = arith.constant 0 : index
    %c0_338 = arith.constant 0 : index
    %997 = vector.load %arg7[%c3_336, %c0_337, %c0_338] : memref<8x16x128xf32, #tpu.memory_space<vmem>>, vector<1x16x128xf32>
    %998 = vector.shape_cast %997 : vector<1x16x128xf32> to vector<16x128xf32>
    %999 = vector.shape_cast %996 : vector<16x128xf32> to vector<1x16x128xf32>
    tpu.vector_store %arg7[%c3_336, %c0_337, %c0_338], %999 {strides = array<i32>} : memref<8x16x128xf32, #tpu.memory_space<vmem>>, vector<1x16x128xf32>,
    %1000 = vector.extract_strided_slice %0 {offsets = [0, 4], sizes = [16, 1], strides = [1, 1]} : vector<16x16xf32> to vector<16x1xf32>
    %1001 = vector.broadcast %1000 : vector<16x1xf32> to vector<16x128xf32>
    %1002 = arith.subf %1001, %933 : vector<16x128xf32>
    %1003 = math.absf %1002 : vector<16x128xf32>
    %1004 = vector.extract_strided_slice %0 {offsets = [0, 12], sizes = [16, 1], strides = [1, 1]} : vector<16x16xf32> to vector<16x1xf32>
    %1005 = vector.broadcast %1004 : vector<16x1xf32> to vector<16x128xf32>
    %1006 = arith.subf %1005, %936 : vector<16x128xf32>
    %1007 = math.absf %1006 : vector<16x128xf32>
    %1008 = arith.addf %1003, %1007 : vector<16x128xf32>
    %1009 = arith.minimumf %993, %1008 : vector<16x128xf32>
    %c4_339 = arith.constant 4 : index
    %c0_340 = arith.constant 0 : index
    %c0_341 = arith.constant 0 : index
    %1010 = vector.load %arg7[%c4_339, %c0_340, %c0_341] : memref<8x16x128xf32, #tpu.memory_space<vmem>>, vector<1x16x128xf32>
    %1011 = vector.shape_cast %1010 : vector<1x16x128xf32> to vector<16x128xf32>
    %1012 = arith.minimumf %1011, %1008 : vector<16x128xf32>
    %c4_342 = arith.constant 4 : index
    %c0_343 = arith.constant 0 : index
    %c0_344 = arith.constant 0 : index
    %1013 = vector.load %arg7[%c4_342, %c0_343, %c0_344] : memref<8x16x128xf32, #tpu.memory_space<vmem>>, vector<1x16x128xf32>
    %1014 = vector.shape_cast %1013 : vector<1x16x128xf32> to vector<16x128xf32>
    %1015 = vector.shape_cast %1012 : vector<16x128xf32> to vector<1x16x128xf32>
    tpu.vector_store %arg7[%c4_342, %c0_343, %c0_344], %1015 {strides = array<i32>} : memref<8x16x128xf32, #tpu.memory_space<vmem>>, vector<1x16x128xf32>,
    %1016 = vector.extract_strided_slice %0 {offsets = [0, 5], sizes = [16, 1], strides = [1, 1]} : vector<16x16xf32> to vector<16x1xf32>
    %1017 = vector.broadcast %1016 : vector<16x1xf32> to vector<16x128xf32>
    %1018 = arith.subf %1017, %933 : vector<16x128xf32>
    %1019 = math.absf %1018 : vector<16x128xf32>
    %1020 = vector.extract_strided_slice %0 {offsets = [0, 13], sizes = [16, 1], strides = [1, 1]} : vector<16x16xf32> to vector<16x1xf32>
    %1021 = vector.broadcast %1020 : vector<16x1xf32> to vector<16x128xf32>
    %1022 = arith.subf %1021, %936 : vector<16x128xf32>
    %1023 = math.absf %1022 : vector<16x128xf32>
    %1024 = arith.addf %1019, %1023 : vector<16x128xf32>
    %1025 = arith.minimumf %1009, %1024 : vector<16x128xf32>
    %c5_345 = arith.constant 5 : index
    %c0_346 = arith.constant 0 : index
    %c0_347 = arith.constant 0 : index
    %1026 = vector.load %arg7[%c5_345, %c0_346, %c0_347] : memref<8x16x128xf32, #tpu.memory_space<vmem>>, vector<1x16x128xf32>
    %1027 = vector.shape_cast %1026 : vector<1x16x128xf32> to vector<16x128xf32>
    %1028 = arith.minimumf %1027, %1024 : vector<16x128xf32>
    %c5_348 = arith.constant 5 : index
    %c0_349 = arith.constant 0 : index
    %c0_350 = arith.constant 0 : index
    %1029 = vector.load %arg7[%c5_348, %c0_349, %c0_350] : memref<8x16x128xf32, #tpu.memory_space<vmem>>, vector<1x16x128xf32>
    %1030 = vector.shape_cast %1029 : vector<1x16x128xf32> to vector<16x128xf32>
    %1031 = vector.shape_cast %1028 : vector<16x128xf32> to vector<1x16x128xf32>
    tpu.vector_store %arg7[%c5_348, %c0_349, %c0_350], %1031 {strides = array<i32>} : memref<8x16x128xf32, #tpu.memory_space<vmem>>, vector<1x16x128xf32>,
    %1032 = vector.extract_strided_slice %0 {offsets = [0, 6], sizes = [16, 1], strides = [1, 1]} : vector<16x16xf32> to vector<16x1xf32>
    %1033 = vector.broadcast %1032 : vector<16x1xf32> to vector<16x128xf32>
    %1034 = arith.subf %1033, %933 : vector<16x128xf32>
    %1035 = math.absf %1034 : vector<16x128xf32>
    %1036 = vector.extract_strided_slice %0 {offsets = [0, 14], sizes = [16, 1], strides = [1, 1]} : vector<16x16xf32> to vector<16x1xf32>
    %1037 = vector.broadcast %1036 : vector<16x1xf32> to vector<16x128xf32>
    %1038 = arith.subf %1037, %936 : vector<16x128xf32>
    %1039 = math.absf %1038 : vector<16x128xf32>
    %1040 = arith.addf %1035, %1039 : vector<16x128xf32>
    %1041 = arith.minimumf %1025, %1040 : vector<16x128xf32>
    %c6_351 = arith.constant 6 : index
    %c0_352 = arith.constant 0 : index
    %c0_353 = arith.constant 0 : index
    %1042 = vector.load %arg7[%c6_351, %c0_352, %c0_353] : memref<8x16x128xf32, #tpu.memory_space<vmem>>, vector<1x16x128xf32>
    %1043 = vector.shape_cast %1042 : vector<1x16x128xf32> to vector<16x128xf32>
    %1044 = arith.minimumf %1043, %1040 : vector<16x128xf32>
    %c6_354 = arith.constant 6 : index
    %c0_355 = arith.constant 0 : index
    %c0_356 = arith.constant 0 : index
    %1045 = vector.load %arg7[%c6_354, %c0_355, %c0_356] : memref<8x16x128xf32, #tpu.memory_space<vmem>>, vector<1x16x128xf32>
    %1046 = vector.shape_cast %1045 : vector<1x16x128xf32> to vector<16x128xf32>
    %1047 = vector.shape_cast %1044 : vector<16x128xf32> to vector<1x16x128xf32>
    tpu.vector_store %arg7[%c6_354, %c0_355, %c0_356], %1047 {strides = array<i32>} : memref<8x16x128xf32, #tpu.memory_space<vmem>>, vector<1x16x128xf32>,
    %1048 = vector.extract_strided_slice %0 {offsets = [0, 7], sizes = [16, 1], strides = [1, 1]} : vector<16x16xf32> to vector<16x1xf32>
    %1049 = vector.broadcast %1048 : vector<16x1xf32> to vector<16x128xf32>
    %1050 = arith.subf %1049, %933 : vector<16x128xf32>
    %1051 = math.absf %1050 : vector<16x128xf32>
    %1052 = vector.extract_strided_slice %0 {offsets = [0, 15], sizes = [16, 1], strides = [1, 1]} : vector<16x16xf32> to vector<16x1xf32>
    %1053 = vector.broadcast %1052 : vector<16x1xf32> to vector<16x128xf32>
    %1054 = arith.subf %1053, %936 : vector<16x128xf32>
    %1055 = math.absf %1054 : vector<16x128xf32>
    %1056 = arith.addf %1051, %1055 : vector<16x128xf32>
    %1057 = arith.minimumf %1041, %1056 : vector<16x128xf32>
    %c7_357 = arith.constant 7 : index
    %c0_358 = arith.constant 0 : index
    %c0_359 = arith.constant 0 : index
    %1058 = vector.load %arg7[%c7_357, %c0_358, %c0_359] : memref<8x16x128xf32, #tpu.memory_space<vmem>>, vector<1x16x128xf32>
    %1059 = vector.shape_cast %1058 : vector<1x16x128xf32> to vector<16x128xf32>
    %1060 = arith.minimumf %1059, %1056 : vector<16x128xf32>
    %c7_360 = arith.constant 7 : index
    %c0_361 = arith.constant 0 : index
    %c0_362 = arith.constant 0 : index
    %1061 = vector.load %arg7[%c7_360, %c0_361, %c0_362] : memref<8x16x128xf32, #tpu.memory_space<vmem>>, vector<1x16x128xf32>
    %1062 = vector.shape_cast %1061 : vector<1x16x128xf32> to vector<16x128xf32>
    %1063 = vector.shape_cast %1060 : vector<16x128xf32> to vector<1x16x128xf32>
    tpu.vector_store %arg7[%c7_360, %c0_361, %c0_362], %1063 {strides = array<i32>} : memref<8x16x128xf32, #tpu.memory_space<vmem>>, vector<1x16x128xf32>,
    %cst_363 = arith.constant 6.250000e-02 : f32
    %1064 = vector.broadcast %cst_363 : f32 to vector<16x128xf32>
    %1065 = arith.mulf %1064, %1057 : vector<16x128xf32>
    %1066 = arith.addf %930, %1065 : vector<16x128xf32>
    %c0_364 = arith.constant 0 : index
    %c0_365 = arith.constant 0 : index
    %c0_366 = arith.constant 0 : index
    %1067 = vector.load %arg7[%c0_364, %c0_365, %c0_366] : memref<8x16x128xf32, #tpu.memory_space<vmem>>, vector<1x16x128xf32>
    %1068 = vector.shape_cast %1067 : vector<1x16x128xf32> to vector<16x128xf32>
    %c1_367 = arith.constant 1 : index
    %c0_368 = arith.constant 0 : index
    %c0_369 = arith.constant 0 : index
    %1069 = vector.load %arg7[%c1_367, %c0_368, %c0_369] : memref<8x16x128xf32, #tpu.memory_space<vmem>>, vector<1x16x128xf32>
    %1070 = vector.shape_cast %1069 : vector<1x16x128xf32> to vector<16x128xf32>
    %1071 = arith.addf %1068, %1070 : vector<16x128xf32>
    %c2_370 = arith.constant 2 : index
    %c0_371 = arith.constant 0 : index
    %c0_372 = arith.constant 0 : index
    %1072 = vector.load %arg7[%c2_370, %c0_371, %c0_372] : memref<8x16x128xf32, #tpu.memory_space<vmem>>, vector<1x16x128xf32>
    %1073 = vector.shape_cast %1072 : vector<1x16x128xf32> to vector<16x128xf32>
    %1074 = arith.addf %1071, %1073 : vector<16x128xf32>
    %c3_373 = arith.constant 3 : index
    %c0_374 = arith.constant 0 : index
    %c0_375 = arith.constant 0 : index
    %1075 = vector.load %arg7[%c3_373, %c0_374, %c0_375] : memref<8x16x128xf32, #tpu.memory_space<vmem>>, vector<1x16x128xf32>
    %1076 = vector.shape_cast %1075 : vector<1x16x128xf32> to vector<16x128xf32>
    %1077 = arith.addf %1074, %1076 : vector<16x128xf32>
    %c4_376 = arith.constant 4 : index
    %c0_377 = arith.constant 0 : index
    %c0_378 = arith.constant 0 : index
    %1078 = vector.load %arg7[%c4_376, %c0_377, %c0_378] : memref<8x16x128xf32, #tpu.memory_space<vmem>>, vector<1x16x128xf32>
    %1079 = vector.shape_cast %1078 : vector<1x16x128xf32> to vector<16x128xf32>
    %1080 = arith.addf %1077, %1079 : vector<16x128xf32>
    %c5_379 = arith.constant 5 : index
    %c0_380 = arith.constant 0 : index
    %c0_381 = arith.constant 0 : index
    %1081 = vector.load %arg7[%c5_379, %c0_380, %c0_381] : memref<8x16x128xf32, #tpu.memory_space<vmem>>, vector<1x16x128xf32>
    %1082 = vector.shape_cast %1081 : vector<1x16x128xf32> to vector<16x128xf32>
    %1083 = arith.addf %1080, %1082 : vector<16x128xf32>
    %c6_382 = arith.constant 6 : index
    %c0_383 = arith.constant 0 : index
    %c0_384 = arith.constant 0 : index
    %1084 = vector.load %arg7[%c6_382, %c0_383, %c0_384] : memref<8x16x128xf32, #tpu.memory_space<vmem>>, vector<1x16x128xf32>
    %1085 = vector.shape_cast %1084 : vector<1x16x128xf32> to vector<16x128xf32>
    %1086 = arith.addf %1083, %1085 : vector<16x128xf32>
    %c7_385 = arith.constant 7 : index
    %c0_386 = arith.constant 0 : index
    %c0_387 = arith.constant 0 : index
    %1087 = vector.load %arg7[%c7_385, %c0_386, %c0_387] : memref<8x16x128xf32, #tpu.memory_space<vmem>>, vector<1x16x128xf32>
    %1088 = vector.shape_cast %1087 : vector<1x16x128xf32> to vector<16x128xf32>
    %1089 = arith.addf %1086, %1088 : vector<16x128xf32>
    %cst_388 = arith.constant 6.250000e-02 : f32
    %1090 = vector.broadcast %cst_388 : f32 to vector<16x128xf32>
    %1091 = arith.mulf %1090, %1089 : vector<16x128xf32>
    %1092 = arith.addf %1066, %1091 : vector<16x128xf32>
    %1093 = vector.extract_strided_slice %0 {offsets = [0, 7], sizes = [16, 1], strides = [1, 1]} : vector<16x16xf32> to vector<16x1xf32>
    %1094 = vector.extract_strided_slice %0 {offsets = [0, 0], sizes = [16, 1], strides = [1, 1]} : vector<16x16xf32> to vector<16x1xf32>
    %1095 = arith.subf %1093, %1094 : vector<16x1xf32>
    %1096 = vector.extract_strided_slice %0 {offsets = [0, 15], sizes = [16, 1], strides = [1, 1]} : vector<16x16xf32> to vector<16x1xf32>
    %1097 = vector.extract_strided_slice %0 {offsets = [0, 8], sizes = [16, 1], strides = [1, 1]} : vector<16x16xf32> to vector<16x1xf32>
    %1098 = arith.subf %1096, %1097 : vector<16x1xf32>
    %1099 = vector.extract_strided_slice %1 {offsets = [7, 0], sizes = [1, 128], strides = [1, 1]} : vector<16x128xf32> to vector<1x128xf32>
    %1100 = vector.extract_strided_slice %1 {offsets = [0, 0], sizes = [1, 128], strides = [1, 1]} : vector<16x128xf32> to vector<1x128xf32>
    %1101 = arith.subf %1099, %1100 : vector<1x128xf32>
    %1102 = vector.extract_strided_slice %1 {offsets = [15, 0], sizes = [1, 128], strides = [1, 1]} : vector<16x128xf32> to vector<1x128xf32>
    %1103 = vector.extract_strided_slice %1 {offsets = [8, 0], sizes = [1, 128], strides = [1, 1]} : vector<16x128xf32> to vector<1x128xf32>
    %1104 = arith.subf %1102, %1103 : vector<1x128xf32>
    %1105 = arith.mulf %1095, %1095 : vector<16x1xf32>
    %1106 = arith.mulf %1098, %1098 : vector<16x1xf32>
    %1107 = arith.addf %1105, %1106 : vector<16x1xf32>
    %1108 = math.sqrt %1107 : vector<16x1xf32>
    %cst_389 = arith.constant 9.99999997E-7 : f32
    %1109 = vector.broadcast %cst_389 : f32 to vector<16x1xf32>
    %1110 = arith.addf %1108, %1109 : vector<16x1xf32>
    %1111 = tpu.reciprocal %1110 {approx = true} : vector<16x1xf32> -> vector<16x1xf32>
    %1112 = arith.mulf %1110, %1111 : vector<16x1xf32>
    %cst_390 = arith.constant 2.000000e+00 : f32
    %1113 = vector.broadcast %cst_390 : f32 to vector<16x1xf32>
    %1114 = arith.subf %1113, %1112 : vector<16x1xf32>
    %1115 = arith.mulf %1111, %1114 : vector<16x1xf32>
    %1116 = arith.mulf %1101, %1101 : vector<1x128xf32>
    %1117 = arith.mulf %1104, %1104 : vector<1x128xf32>
    %1118 = arith.addf %1116, %1117 : vector<1x128xf32>
    %1119 = math.sqrt %1118 : vector<1x128xf32>
    %cst_391 = arith.constant 9.99999997E-7 : f32
    %1120 = vector.broadcast %cst_391 : f32 to vector<1x128xf32>
    %1121 = arith.addf %1119, %1120 : vector<1x128xf32>
    %1122 = tpu.reciprocal %1121 {approx = true} : vector<1x128xf32> -> vector<1x128xf32>
    %1123 = arith.mulf %1121, %1122 : vector<1x128xf32>
    %cst_392 = arith.constant 2.000000e+00 : f32
    %1124 = vector.broadcast %cst_392 : f32 to vector<1x128xf32>
    %1125 = arith.subf %1124, %1123 : vector<1x128xf32>
    %1126 = arith.mulf %1122, %1125 : vector<1x128xf32>
    %1127 = vector.broadcast %1095 : vector<16x1xf32> to vector<16x128xf32>
    %1128 = vector.broadcast %1101 : vector<1x128xf32> to vector<16x128xf32>
    %1129 = arith.mulf %1127, %1128 : vector<16x128xf32>
    %1130 = vector.broadcast %1098 : vector<16x1xf32> to vector<16x128xf32>
    %1131 = vector.broadcast %1104 : vector<1x128xf32> to vector<16x128xf32>
    %1132 = arith.mulf %1130, %1131 : vector<16x128xf32>
    %1133 = arith.addf %1129, %1132 : vector<16x128xf32>
    %1134 = vector.broadcast %1115 : vector<16x1xf32> to vector<16x128xf32>
    %1135 = vector.broadcast %1126 : vector<1x128xf32> to vector<16x128xf32>
    %1136 = arith.mulf %1134, %1135 : vector<16x128xf32>
    %1137 = arith.mulf %1133, %1136 : vector<16x128xf32>
    %cst_393 = arith.constant 1.000000e+00 : f32
    %1138 = vector.broadcast %cst_393 : f32 to vector<16x128xf32>
    %1139 = arith.subf %1138, %1137 : vector<16x128xf32>
    %cst_394 = arith.constant 1.000000e+00 : f32
    %1140 = vector.broadcast %cst_394 : f32 to vector<16x128xf32>
    %1141 = arith.mulf %1140, %1139 : vector<16x128xf32>
    %1142 = arith.addf %1092, %1141 : vector<16x128xf32>
    %c0_395 = arith.constant 0 : index
    %c0_396 = arith.constant 0 : index
    %1143 = vector.load %arg2[%c0_395, %c0_396] : memref<16x4xf32, #tpu.memory_space<vmem>>, vector<16x4xf32>
    %cst_397 = arith.constant dense<0xFF800000> : vector<16xf32>
    %1144 = vector.multi_reduction <maximumf>, %1143, %cst_397 [1] : vector<16x4xf32> to vector<16xf32>
    %1145 = vector.shape_cast %1144 : vector<16xf32> to vector<16x1xf32>
    %1146 = vector.broadcast %1145 : vector<16x1xf32> to vector<16x4xf32>
    %1147 = arith.subf %1143, %1146 : vector<16x4xf32>
    %1148 = math.exp %1147 : vector<16x4xf32>
    %cst_398 = arith.constant dense<0.000000e+00> : vector<16xf32>
    %1149 = vector.multi_reduction <add>, %1148, %cst_398 [1] : vector<16x4xf32> to vector<16xf32>
    %1150 = vector.shape_cast %1149 : vector<16xf32> to vector<16x1xf32>
    %1151 = tpu.reciprocal %1150 {approx = true} : vector<16x1xf32> -> vector<16x1xf32>
    %1152 = arith.mulf %1150, %1151 : vector<16x1xf32>
    %cst_399 = arith.constant 2.000000e+00 : f32
    %1153 = vector.broadcast %cst_399 : f32 to vector<16x1xf32>
    %1154 = arith.subf %1153, %1152 : vector<16x1xf32>
    %1155 = arith.mulf %1151, %1154 : vector<16x1xf32>
    %1156 = vector.broadcast %1155 : vector<16x1xf32> to vector<16x4xf32>
    %1157 = arith.mulf %1148, %1156 : vector<16x4xf32>
    %c0_400 = arith.constant 0 : index
    %c0_401 = arith.constant 0 : index
    %1158 = vector.load %arg4[%c0_400, %c0_401] : memref<4x128xf32, #tpu.memory_space<vmem>>, vector<4x128xf32>
    %cst_402 = arith.constant dense<0.000000e+00> : vector<16x128xf32>
    %1159 = tpu.matmul %1157, %1158, %cst_402 {dimension_numbers = #tpu.dot_dimension_numbers<[1], [0], [0], [1], [0, 0, 1, 1], [], []>} : vector<16x4xf32>, vector<4x128xf32>, vector<16x128xf32> -> vector<16x128xf32>
    %cst_403 = arith.constant 1.000000e+00 : f32
    %1160 = vector.broadcast %cst_403 : f32 to vector<16x128xf32>
    %1161 = arith.mulf %1160, %1159 : vector<16x128xf32>
    %1162 = arith.subf %1142, %1161 : vector<16x128xf32>
    %c0_404 = arith.constant 0 : index
    %c0_405 = arith.constant 0 : index
    %1163 = vector.load %arg6[%c0_404, %c0_405] : memref<16x128xf32, #tpu.memory_space<vmem>>, vector<16x128xf32>
    tpu.vector_store %arg6[%c0_404, %c0_405], %1162 {strides = array<i32>} : memref<16x128xf32, #tpu.memory_space<vmem>>, vector<16x128xf32>,
    return
  }
  func.func @transform_0(%arg0: i32, %arg1: i32) -> (i32, i32) {
    %c0_i32 = arith.constant 0 : i32
    %c0_i32_0 = arith.constant 0 : i32
    return %arg0, %c0_i32 : i32, i32
  }
  func.func @transform_1(%arg0: i32, %arg1: i32) -> (i32, i32) {
    %c0_i32 = arith.constant 0 : i32
    %c0_i32_0 = arith.constant 0 : i32
    return %arg0, %c0_i32 : i32, i32
  }
  func.func @transform_2(%arg0: i32, %arg1: i32) -> (i32, i32) {
    %c0_i32 = arith.constant 0 : i32
    %c0_i32_0 = arith.constant 0 : i32
    return %c0_i32, %arg1 : i32, i32
  }
  func.func @transform_3(%arg0: i32, %arg1: i32) -> (i32, i32) {
    %c0_i32 = arith.constant 0 : i32
    %c0_i32_0 = arith.constant 0 : i32
    return %c0_i32, %arg1 : i32, i32
  }
  func.func @transform_4(%arg0: i32, %arg1: i32) -> (i32, i32) {
    %c0_i32 = arith.constant 0 : i32
    return %arg0, %arg1 : i32, i32
  }
}

</mosaic_0001>

<bundles_post_ra>
// kernel: tpu_custom_call.1
= control target key start
LH: loop header
LB: loop body
LE: loop exit
PB: predicated region body
PF: predicated region fallthrough
CT: control target
= control target key end

     0   :  { %9 = vsyncpa [#allocation4], 0  ;;  %s3411_s0 = inlined_call_operand.vmem [shape: f32[16,4], index: 0, kind: input, shape index: {}]   ;;  %s3412_s1 = inlined_call_operand.vmem [shape: f32[16,16], index: 1, kind: input, shape index: {}]   ;;  %s3413_s2 = inlined_call_operand.vmem [shape: f32[4,128], index: 2, kind: input, shape index: {}]   ;;  %s3414_s3 = inlined_call_operand.hbm [shape: f32[16,128], index: 3, kind: input, shape index: {}]   ;;  %s3415_s4 = inlined_call_operand.hbm [shape: f32[16,128], index: 4, kind: output, shape index: {}]  }
   0x1   :  { %10 = vsyncpa [#allocation5], 0  ;;  %s1794_s15 = smov [#allocation3]  }
   0x2   :  { %s22_s16 = sshll.u32 %s1794_s15, 4  ;;  %s23_s16 = int_to_ptr.vmem [resolvable:$true] %s22_s16 }
   0x3   :  { %s1758_s17 = scalar_lea.vmem %s23_s16, 256  ;;  %p1763_p1 = scmp.lt.s32.totalorder %s23_s16, %s23_s16 }
   0x4   :  { %p1759_p0 = scmp.ne.s32.totalorder %s23_s16, %s1758_s17  ;;  %p1764_p2 = scmp.lt.s32.totalorder %s1758_s17, %s1758_s17 }
   0x6   :  { %p1765_p3 = por %p1764_p2, %p1763_p1 }
   0x8   :  { %p1766_p4 = pnand %p1765_p3, %p1759_p0 }
   0xa   :  { %1769 = shalt.err (!%p1766_p4)
}
   0xb   :  { %s1795_s18 = smov 128   ;;  %s1796_s19 = smov 8  }
   0xc   :  { %28 = dma.hbm_to_vmem [thread:$0]  %s3414_s3, 256, %s23_s16, [#allocation4], %s1795_s18, %s1795_s18, %s1796_s19  }
   0xd   :  { %1790 = dma.done.wait [#allocation4], 256  }
   0xe   :  { %1791 = vsyncadd [#allocation4], 4294967040  ;;  %vm1530_vm0 = vcmask 31744   ;;  %v1528_v0 = vld [vmem:[%s3411_s0] sm:$0xff]  ;;  %v1529_v1 = vld [vmem:[%s3411_s0 + $0x8] sm:$0xff]  ;;  %s1797_s3 = smov 7  }
   0xf   :  { %v1531_v2 = vsel %vm1530_vm0, %v1528_v0, -inf  ;;  %v1534_v3 = vsel %vm1530_vm0, %v1529_v1, -inf  ;;  %v1858_v4 = vld [vmem:[%s3412_s1] sm:$0xff]  ;;  %v1798_v5 = vmov 0   ;;  %v1866_v6 = vld [vmem:[%s3412_s1 + $0x8] sm:$0xff]  ;;  %v1799_v7 = vmov 8  }
  0x10   :  { %1532 = vmax.xlane.f32.xlu0 %v1531_v2  ;;  %1700 = vset.pattern.permute.xlu1 %v1798_v5  ;;  %v1800_v8 = vmov 9   ;;  %v1801_v9 = vmov 2   ;;  %v1802_v10 = vmov 3   ;;  %v1803_v11 = vmov 11   ;;  %s1810_s1 = smov 120   ;;  %v34_v62 = vld [vmem:[#allocation3] sm:$0xff] }
  0x11   :  { %1699 = vset.pattern.permute.xlu0 %v1798_v5  ;;  %v1804_v12 = vmov 12   ;;  %v1805_v13 = vmov 5   ;;  %v1806_v14 = vmov 6   ;;  %v1807_v25 = vmov 14   ;;  %v1559_v31 = vld [vmem:[%s3413_s2] sm:$0xf] }
  0x12   :  { %v3418_v27 = vmov 15   ;;  %v3416_v29 = vmov 7   ;;  %vm1566_vm1 = vcmask 1043456   ;;  %v1811_v49 = vmov 1   ;;  %v35_v63 = vld [vmem:[#allocation3 + $0x8] sm:$0xff]  ;;  %s1815_s2 = smov [#allocation6]  }
  0x13   :  { %1672 = vmatprep.subr.msk.mxu0 %vm1566_vm1, %v1559_v31  ;;  %v1812_v56 = vmov 10   ;;  %v1813_v61 = vmov 4   ;;  %v1420_v2 = vrot.slane %v35_v63, 1  ;;  %s1654_s5 = sshll.u32 %s1815_s2, 4  ;;  %s1655_s5 = int_to_ptr.vmem [resolvable:$true] %s1654_s5 }
  0x14   :  { %1535 = vmax.xlane.f32.xlu0 %v1534_v3  ;;  %1673 = vmatpush3.msk.msra.mxu0 %vm1566_vm1, %v1559_v31  ;;  %s1770_s6 = scalar_lea.vmem %s1655_s5, 256  ;;  %p1775_p6 = scmp.lt.s32.totalorder %s1655_s5, %s1655_s5 }
  0x15   :  { %v1936_v5 = vsub.f32 %v35_v63, %v1420_v2  ;;  %p1771_p5 = scmp.ne.s32.totalorder %s1655_s5, %s1770_s6  ;;  %p1776_p7 = scmp.lt.s32.totalorder %s1770_s6, %s1770_s6 }
  0x17   :  { %3483 = vst [vmem:[#allocation9_spill] sm:$0xff] %v1936_v5  ;;  %p1777_p8 = por %p1776_p7, %p1775_p6 }
  0x19   :  { %p1778_p9 = pnand %p1777_p8, %p1771_p5 }
  0x2a   :  { %1407 = vrot.lane.b32.xlu0 %v1858_v4, %s1797_s3 }
  0x2e   :  { %46 = vperm.xlu0 %1699, %v1858_v4  }
  0x32   :  { %1702 = vset.pattern.permute.xlu0 %v1799_v7 }
  0x33   :  { %63 = vperm.xlu0 %1702, %v1866_v6  }
  0x37   :  { %1704 = vset.pattern.permute.xlu0 %v1800_v8 }
  0x38   :  { %87 = vperm.xlu0 %1704, %v1858_v4  }
  0x3c   :  { %1707 = vset.pattern.permute.xlu0 %v1801_v9 }
  0x3d   :  { %110 = vperm.xlu0 %1707, %v1866_v6  }
  0x41   :  { %1709 = vset.pattern.permute.xlu0 %v1802_v10 }
  0x42   :  { %137 = vperm.xlu0 %1709, %v1858_v4  }
  0x46   :  { %1712 = vset.pattern.permute.xlu0 %v1803_v11 }
  0x47   :  { %153 = vperm.xlu0 %1712, %v1866_v6  }
  0x4b   :  { %1714 = vset.pattern.permute.xlu0 %v1804_v12 }
  0x4c   :  { %180 = vperm.xlu0 %1714, %v1858_v4  }
  0x50   :  { %1717 = vset.pattern.permute.xlu0 %v1805_v13 }
  0x51   :  { %203 = vperm.xlu0 %1717, %v1866_v6  }
  0x55   :  { %1719 = vset.pattern.permute.xlu0 %v1806_v14 }
  0x56   :  { %230 = vperm.xlu0 %1719, %v1858_v4  }
  0x5a   :  { %1722 = vset.pattern.permute.xlu0 %v1807_v25 }
  0x5b   :  { %246 = vperm.xlu0 %1722, %v1866_v6  }
  0x5f   :  { %1724 = vset.pattern.permute.xlu0 %v3418_v27 }
  0x60   :  { %273 = vperm.xlu0 %1724, %v1858_v4  }
  0x64   :  { %1727 = vset.pattern.permute.xlu0 %v3416_v29 }
  0x99   :  { %v1533_v15 = vpop.xlane.xlu0 %1532 }
  0x9a   :  { %v1537_v16 = vsub.f32 %v1528_v0, %v1533_v15 }
  0x9c   :  { %v1539_v17 = vmul.f32 1.442695, %v1537_v16 }
  0x9d   :  { %v1536_v18 = vpop.xlane.xlu0 %1535 }
  0x9e   :  { %1730 = vpow2.f32 %v1539_v17  ;;  %v1538_v19 = vsub.f32 %v1529_v1, %v1536_v18  ;;  %v1416_v1 = vrot.slane %v34_v62, 1 }
  0xa0   :  { %v1541_v20 = vmul.f32 1.442695, %v1538_v19  ;;  %v1934_v3 = vsub.f32 %v34_v62, %v1416_v1 }
  0xa1   :  { %v1408_v26 = vpop.permute.xlu0 %1407 }
  0xa2   :  { %1732 = vpow2.f32 %v1541_v20  ;;  %v1891_v28 = vsub.f32 %v1858_v4, %v1408_v26 }
  0xa4   :  { %v1423_v30 = vmul.f32 %v1891_v28, %v1891_v28 }
  0xa9   :  { %v1931_v0 = vpop.permute.xlu0 %46 }
  0xab   :  { %v1731_v21 = vpop.eup %1730 }
  0xac   :  { %v1543_v22 = vsel %vm1530_vm0, %v1731_v21, 0.0 }
  0xad   :  { %1544 = vadd.xlane.f32.xlu1 %v1543_v22 }
  0xaf   :  { %v1733_v23 = vpop.eup %1732 }
  0xb0   :  { %v1546_v24 = vsel %vm1530_vm0, %v1733_v23, 0.0 }
  0xb1   :  { %1547 = vadd.xlane.f32.xlu1 %v1546_v24 }
  0xc2   :  { %1409 = vrot.lane.b32.xlu1 %v1866_v6, %s1797_s3 }
  0xc6   :  { %1427 = vrot.lane.b32.xlu1 %v1423_v30, %s1810_s1 }
 0x136   :  { %v1545_v32 = vpop.xlane.xlu1 %1544 }
 0x137   :  { %1734 = vrcp.f32 %v1545_v32 }
 0x13a   :  { %v1548_v33 = vpop.xlane.xlu1 %1547 }
 0x13b   :  { %1736 = vrcp.f32 %v1548_v33 }
 0x13e   :  { %v1410_v34 = vpop.permute.xlu1 %1409 }
 0x13f   :  { %v1902_v35 = vsub.f32 %v1866_v6, %v1410_v34 }
 0x141   :  { %1481 = vperm.xlu0 %1727, %v1902_v35   ;;  %v1907_v36 = vmul.f32 %v1902_v35, %v1902_v35 }
 0x142   :  { %v1428_v37 = vpop.permute.xlu1 %1427 }
 0x143   :  { %v1433_v38 = vadd.f32 %v1428_v37, %v1423_v30  ;;  %1429 = vrot.lane.b32.xlu1 %v1907_v36, %s1810_s1 }
 0x144   :  { %v1735_v39 = vpop.eup %1734 }
 0x145   :  { %v1551_v40 = vmul.f32 %v1735_v39, %v1545_v32  ;;  %1738 = vrsqrt.f32 %v1433_v38  ;;  %vm1437_vm2 = vcmp.eq.f32.partialorder %v1433_v38, inf  ;;  %v1440_v52 = vand.u32 2147483648, %v1433_v38 }
 0x146   :  { %vm1439_vm3 = vcmp.eq.f32.partialorder %v1433_v38, 0.0 }
 0x147   :  { %v1553_v41 = vsub.f32 2.0, %v1551_v40  ;;  %51 = vperm.xlu1 %1700, %v1866_v6  }
 0x148   :  { %v1737_v42 = vpop.eup %1736 }
 0x149   :  { %v1552_v43 = vmul.f32 %v1737_v42, %v1548_v33  ;;  %v1555_v44 = vmul.f32 %v1735_v39, %v1553_v41 }
 0x14b   :  { %v1554_v45 = vsub.f32 2.0, %v1552_v43  ;;  %1701 = vset.pattern.permute.xlu1 %v1799_v7  ;;  %v1557_v46 = vmul.f32 %v1731_v21, %v1555_v44  ;;  %v1939_v7 = vpop.permute.xlu0 %63 }
 0x14c   :  { %59 = vperm.xlu1 %1701, %v1858_v4  }
 0x14d   :  { %v1556_v47 = vmul.f32 %v1737_v42, %v1554_v45  ;;  %1674 = vmatprep.mubr.msk.f32.mxu0 %vm1530_vm0, %v1557_v46 }
 0x14f   :  { %v1558_v48 = vmul.f32 %v1733_v23, %v1556_v47 }
 0x150   :  { %1703 = vset.pattern.permute.xlu1 %v1811_v49 }
 0x151   :  { %1675 = vmatmul.mubr.msk.f32.vlgmr.msra.gmra.mxu0 %vm1530_vm0, %v1558_v48  ;;  %75 = vperm.xlu1 %1703, %v1858_v4  }
 0x152   :  { %v1739_v50 = vpop.eup %1738 }
 0x153   :  { %v1436_v51 = vmul.f32 %v1739_v50, %v1433_v38 }
 0x155   :  { %79 = vperm.xlu1 %1703, %v1866_v6   ;;  %v1438_v53 = vsel %vm1437_vm2, %v1433_v38, %v1436_v51 }
 0x156   :  { %v1441_v54 = vsel %vm1439_vm3, %v1440_v52, %v1438_v53 }
 0x157   :  { %v1449_v55 = vadd.f32 1e-06, %v1441_v54 }
 0x159   :  { %1705 = vset.pattern.permute.xlu1 %v1800_v8  ;;  %1740 = vrcp.f32 %v1449_v55  ;;  %v36_v8 = vlaneseq }
 0x15a   :  { %91 = vperm.xlu1 %1705, %v1866_v6  }
 0x15e   :  { %1706 = vset.pattern.permute.xlu1 %v1801_v9  ;;  %v1459_v9 = vmul.f32 %v1934_v3, %v1934_v3 }
 0x15f   :  { %106 = vperm.xlu1 %1706, %v1858_v4  }
 0x163   :  { %1708 = vset.pattern.permute.xlu1 %v1812_v56 }
 0x164   :  { %118 = vperm.xlu1 %1708, %v1858_v4  }
 0x166   :  { %v1741_v57 = vpop.eup %1740 }
 0x167   :  { %v1453_v58 = vmul.f32 %v1741_v57, %v1449_v55 }
 0x168   :  { %122 = vperm.xlu1 %1708, %v1866_v6  }
 0x169   :  { %v1455_v59 = vsub.f32 2.0, %v1453_v58 }
 0x16b   :  { %v1457_v60 = vmul.f32 %v1741_v57, %v1455_v59 }
 0x16c   :  { %1710 = vset.pattern.permute.xlu1 %v1802_v10  ;;  %v1460_v10 = vmul.f32 %v1936_v5, %v1936_v5 }
 0x16d   :  { %141 = vperm.xlu1 %1710, %v1866_v6   ;;  %1508 = vperm.xlu0 %1727, %v1457_v60  }
 0x16e   :  { %v1948_v15 = vadd.f32 %v1460_v10, %v1459_v9 }
 0x170   :  { %1742 = vrsqrt.f32 %v1948_v15  ;;  %vm1464_vm4 = vcmp.eq.f32.partialorder %v1948_v15, inf  ;;  %vm1466_vm5 = vcmp.eq.f32.partialorder %v1948_v15, 0.0 }
 0x171   :  { %1711 = vset.pattern.permute.xlu1 %v1803_v11  ;;  %v1814_v11 = vmov 13  }
 0x172   :  { %149 = vperm.xlu1 %1711, %v1858_v4  }
 0x176   :  { %1713 = vset.pattern.permute.xlu1 %v1813_v61 }
 0x177   :  { %168 = vperm.xlu1 %1713, %v1858_v4  }
 0x17b   :  { %172 = vperm.xlu1 %1713, %v1866_v6  }
 0x17f   :  { %1715 = vset.pattern.permute.xlu1 %v1804_v12  ;;  %v37_v12 = vshrl.u32 %v36_v8, 7 }
 0x180   :  { %184 = vperm.xlu1 %1715, %v1866_v6  }
 0x181   :  { %v38_v16 = vsub.s32 0, %v37_v12  ;;  %v297_v17 = vsub.s32 1, %v37_v12  ;;  %v451_v18 = vsub.s32 2, %v37_v12  ;;  %v605_v19 = vsub.s32 3, %v37_v12 }
 0x182   :  { %v759_v20 = vsub.s32 4, %v37_v12  ;;  %v913_v21 = vsub.s32 5, %v37_v12  ;;  %v1067_v22 = vsub.s32 6, %v37_v12  ;;  %v1956_v26 = vsub.s32 7, %v37_v12 }
 0x183   :  { %v1952_v23 = vrot.slane %v34_v62, %v38_v16  ;;  %v1954_v24 = vrot.slane %v34_v62, %v297_v17  ;;  %v1961_v31 = vrot.slane %v34_v62, %v451_v18  ;;  %v1963_v32 = vrot.slane %v34_v62, %v605_v19 }
 0x184   :  { %1716 = vset.pattern.permute.xlu1 %v1805_v13  ;;  %v1946_v13 = vpop.permute.xlu0 %87  ;;  %3484 = vst [vmem:[#allocation10_spill] sm:$0xff] %v1956_v26  ;;  %v1965_v33 = vrot.slane %v34_v62, %v759_v20  ;;  %v1967_v34 = vrot.slane %v34_v62, %v913_v21  ;;  %v1970_v37 = vrot.slane %v34_v62, %v1067_v22 }
 0x185   :  { %199 = vperm.xlu1 %1716, %v1858_v4   ;;  %v1973_v38 = vrot.slane %v34_v62, %v1956_v26  ;;  %v303_v39 = vsub.f32 %v1931_v0, %v1954_v24  ;;  %v457_v40 = vsub.f32 %v1931_v0, %v1961_v31  ;;  %v1981_v41 = vrot.slane %v35_v63, %v38_v16  ;;  %v1743_v16 = vpop.eup %1742 }
 0x186   :  { %3485 = vst [vmem:[#allocation11_spill] sm:$0xff] %v1970_v37  ;;  %v1983_v42 = vrot.slane %v35_v63, %v297_v17  ;;  %v1985_v43 = vrot.slane %v35_v63, %v451_v18  ;;  %v611_v44 = vsub.f32 %v1931_v0, %v1963_v32  ;;  %v765_v45 = vsub.f32 %v1931_v0, %v1965_v33 }
 0x187   :  { %3486 = vst [vmem:[#allocation12_spill] sm:$0xff] %v1973_v38  ;;  %v919_v46 = vsub.f32 %v1931_v0, %v1967_v34  ;;  %v1993_v47 = vrot.slane %v35_v63, %v605_v19  ;;  %v1073_v48 = vsub.f32 %v1931_v0, %v1970_v37  ;;  %v1997_v49 = vrot.slane %v35_v63, %v759_v20 }
 0x188   :  { %v1959_v30 = vpop.permute.xlu0 %110  ;;  %v1999_v50 = vrot.slane %v35_v63, %v913_v21  ;;  %v2001_v51 = vrot.slane %v35_v63, %v1067_v22  ;;  %v2006_v53 = vand.u32 2147483647, %v303_v39  ;;  %v1227_v54 = vsub.f32 %v1931_v0, %v1973_v38 }
 0x189   :  { %1718 = vset.pattern.permute.xlu1 %v1814_v11  ;;  %v2011_v55 = vrot.slane %v35_v63, %v1956_v26  ;;  %v2016_v57 = vand.u32 2147483647, %v457_v40  ;;  %v67_v58 = vsub.f32 %v1939_v7, %v1981_v41  ;;  %v462_v59 = vsub.f32 %v1939_v7, %v1985_v43 }
 0x18a   :  { %211 = vperm.xlu1 %1718, %v1858_v4   ;;  %v2024_v60 = vand.u32 2147483647, %v611_v44  ;;  %v2026_v61 = vand.u32 2147483647, %v765_v45  ;;  %v2028_v62 = vand.u32 2147483647, %v919_v46  ;;  %v616_v63 = vsub.f32 %v1939_v7, %v1993_v47 }
 0x18b   :  { %v770_v1 = vsub.f32 %v1939_v7, %v1997_v49  ;;  %v924_v2 = vsub.f32 %v1939_v7, %v1999_v50  ;;  %v1078_v8 = vsub.f32 %v1939_v7, %v2001_v51  ;;  %v2040_v9 = vand.u32 2147483647, %v1227_v54 }
 0x18c   :  { %v2014_v56 = vpop.permute.xlu0 %137  ;;  %v1232_v10 = vsub.f32 %v1939_v7, %v2011_v55  ;;  %v94_v11 = vsub.f32 %v1946_v13, %v1981_v41  ;;  %v323_v12 = vsub.f32 %v1946_v13, %v1983_v42  ;;  %v2049_v17 = vand.u32 2147483647, %v67_v58 }
 0x18d   :  { %3488 = vst [vmem:[#allocation14_spill] sm:$0xff] %v2040_v9  ;;  %v2053_v19 = vand.u32 2147483647, %v462_v59  ;;  %v477_v20 = vsub.f32 %v1946_v13, %v1985_v43  ;;  %v631_v21 = vsub.f32 %v1946_v13, %v1993_v47  ;;  %v785_v22 = vsub.f32 %v1946_v13, %v1997_v49 }
 0x18e   :  { %215 = vperm.xlu1 %1718, %v1866_v6   ;;  %v2068_v40 = vand.u32 2147483647, %v770_v1  ;;  %v2070_v44 = vand.u32 2147483647, %v924_v2  ;;  %v2072_v45 = vand.u32 2147483647, %v1078_v8  ;;  %v1463_v58 = vmul.f32 %v1743_v16, %v1948_v15 }
 0x18f   :  { %v2076_v46 = vand.u32 2147483647, %v1232_v10  ;;  %v2080_v54 = vand.u32 2147483647, %v323_v12  ;;  %v1247_v59 = vsub.f32 %v1946_v13, %v2011_v55  ;;  %v2091_v1 = vand.u32 2147483647, %v631_v21 }
 0x190   :  { %v2066_v39 = vpop.permute.xlu0 %153  ;;  %v2093_v2 = vand.u32 2147483647, %v785_v22  ;;  %v338_v10 = vsub.f32 %v1959_v30, %v1954_v24  ;;  %v646_v12 = vsub.f32 %v1959_v30, %v1963_v32  ;;  %v1467_v16 = vand.u32 2147483648, %v1948_v15 }
 0x191   :  { %v954_v21 = vsub.f32 %v1959_v30, %v1967_v34  ;;  %v1262_v27 = vsub.f32 %v1959_v30, %v1973_v38  ;;  %v144_v5 = vsub.f32 %v2014_v56, %v1952_v23 }
 0x192   :  { %1720 = vset.pattern.permute.xlu1 %v1806_v14  ;;  %v54_v14 = vsub.f32 %v1931_v0, %v1952_v23  ;;  %v2032_v0 = vand.u32 2147483647, %v1073_v48  ;;  %v2078_v48 = vand.u32 2147483647, %v94_v11  ;;  %3489 = vst [vmem:[#allocation15_spill] sm:$0xff] %v2093_v2 }
 0x193   :  { %234 = vperm.xlu1 %1720, %v1866_v6   ;;  %v2125_v9 = vand.u32 2147483647, %v338_v10  ;;  %v2140_v10 = vand.u32 2147483647, %v954_v21  ;;  %v3505_v21 = vmov 7  }
 0x194   :  { %v2004_v52 = vand.u32 2147483647, %v54_v14  ;;  %3487 = vst [vmem:[#allocation13_spill] sm:$0xff] %v2032_v0  ;;  %v939_v14 = vsub.f32 %v1946_v13, %v1999_v50  ;;  %v2110_v22 = vpop.permute.xlu0 %180 }
 0x195   :  { %3495 = vst [vmem:[#allocation20_spill] sm:$0xff] %v2125_v9  ;;  %3499 = vst [vmem:[#allocation24_spill] sm:$0xff] %v2140_v10  ;;  %v817_v9 = vsub.f32 %v2014_v56, %v1965_v33 }
 0x196   :  { %v2095_v8 = vand.u32 2147483647, %v939_v14  ;;  %v1465_v14 = vsel %vm1464_vm4, %v1948_v15, %v1463_v58  ;;  %v355_v15 = vsub.f32 %v2014_v56, %v1954_v24  ;;  %v509_v58 = vsub.f32 %v2014_v56, %v1961_v31 }
 0x197   :  { %1721 = vset.pattern.permute.xlu1 %v1807_v25  ;;  %v308_v25 = vsub.f32 %v1939_v7, %v1983_v42  ;;  %v2058_v7 = vand.u32 2147483647, %v616_v63  ;;  %v114_v63 = vsub.f32 %v1959_v30, %v1952_v23  ;;  %v1468_v2 = vsel %vm1466_vm5, %v1467_v16, %v1465_v14 }
 0x198   :  { %242 = vperm.xlu1 %1721, %v1858_v4   ;;  %3490 = vst [vmem:[#allocation16_spill] sm:$0xff] %v2095_v8  ;;  %v2154_v16 = vand.u32 2147483647, %v355_v15  ;;  %v2159_v14 = vpop.permute.xlu0 %203  ;;  %v2161_v10 = vadd.f32 1e-06, %v1468_v2  ;;  %v514_v2 = vsub.f32 %v2066_v39, %v1985_v43 }
 0x199   :  { %v2051_v18 = vand.u32 2147483647, %v308_v25  ;;  %v2083_v25 = vand.u32 2147483647, %v477_v20  ;;  %v800_v20 = vsub.f32 %v1959_v30, %v1965_v33  ;;  %v2123_v8 = vand.u32 2147483647, %v114_v63 }
 0x19a   :  { %3503 = vst [vmem:[#allocation28_spill] sm:$0xff] %v2154_v16  ;;  %3506 = vst [vmem:[#allocation30_spill] sm:$0xff] %v2159_v14  ;;  %v2172_v15 = vand.u32 2147483647, %v817_v9  ;;  %v1130_v9 = vsub.f32 %v2066_v39, %v2001_v51  ;;  %1744 = vrcp.f32 %v2161_v10 }
 0x19b   :  { %3494 = vst [vmem:[#allocation19_spill] sm:$0xff] %v2123_v8  ;;  %v2138_v63 = vand.u32 2147483647, %v800_v20  ;;  %v971_v8 = vsub.f32 %v2014_v56, %v1967_v34  ;;  %v2156_v20 = vand.u32 2147483647, %v509_v58 }
 0x19c   :  { %1723 = vset.pattern.permute.xlu1 %v3416_v29  ;;  %v1108_v29 = vsub.f32 %v1959_v30, %v1970_v37  ;;  %3508 = vst [vmem:[#allocation32_spill] sm:$0xff] %v2172_v15  ;;  %v377_v15 = vsub.f32 %v2110_v22, %v1983_v42 }
 0x19d   :  { %261 = vperm.xlu1 %1723, %v1858_v4   ;;  %v1093_v4 = vsub.f32 %v1946_v13, %v2001_v51  ;;  %v492_v13 = vsub.f32 %v1959_v30, %v1961_v31  ;;  %v2134_v30 = vand.u32 2147483647, %v646_v12  ;;  %3498 = vst [vmem:[#allocation23_spill] sm:$0xff] %v2138_v63  ;;  %v1125_v12 = vsub.f32 %v2014_v56, %v1970_v37 }
 0x19e   :  { %v2146_v0 = vand.u32 2147483647, %v1108_v29  ;;  %3504 = vst [vmem:[#allocation29_spill] sm:$0xff] %v2156_v20  ;;  %v157_v29 = vsub.f32 %v2066_v39, %v1981_v41  ;;  %v2174_v58 = vand.u32 2147483647, %v971_v8  ;;  %v976_v20 = vsub.f32 %v2066_v39, %v1999_v50 }
 0x19f   :  { %v2099_v11 = vand.u32 2147483647, %v1093_v4  ;;  %v2114_v4 = vand.u32 2147483647, %v1247_v59  ;;  %v2132_v59 = vand.u32 2147483647, %v492_v13  ;;  %v1284_v8 = vsub.f32 %v2066_v39, %v2011_v55 }
 0x1a0   :  { %3497 = vst [vmem:[#allocation22_spill] sm:$0xff] %v2134_v30  ;;  %3500 = vst [vmem:[#allocation25_spill] sm:$0xff] %v2146_v0  ;;  %v2150_v13 = vand.u32 2147483647, %v144_v5  ;;  %v360_v5 = vsub.f32 %v2066_v39, %v1983_v42  ;;  %v685_v0 = vsub.f32 %v2110_v22, %v1993_v47 }
 0x1a1   :  { %265 = vperm.xlu1 %1723, %v1866_v6   ;;  %3491 = vst [vmem:[#allocation17_spill] sm:$0xff] %v2099_v11  ;;  %3492 = vst [vmem:[#allocation18_spill] sm:$0xff] %v2114_v4  ;;  %v3493_v11 = vmov 15   ;;  %v663_v4 = vsub.f32 %v2014_v56, %v1963_v32 }
 0x1a2   :  { %3496 = vst [vmem:[#allocation21_spill] sm:$0xff] %v2132_v59  ;;  %3502 = vst [vmem:[#allocation27_spill] sm:$0xff] %v2150_v13  ;;  %v2199_v16 = vand.u32 2147483647, %v360_v5  ;;  %v531_v13 = vsub.f32 %v2110_v22, %v1985_v43 }
 0x1a3   :  { %v2163_v63 = vand.u32 2147483647, %v663_v4  ;;  %3509 = vst [vmem:[#allocation33_spill] sm:$0xff] %v2174_v58  ;;  %v668_v4 = vsub.f32 %v2066_v39, %v1993_v47  ;;  %v187_v58 = vsub.f32 %v2110_v22, %v1981_v41 }
 0x1a4   :  { %3513 = vst [vmem:[#allocation37_spill] sm:$0xff] %v2199_v16  ;;  %v2219_v16 = vand.u32 2147483647, %v1130_v9  ;;  %v392_v9 = vsub.f32 %v2159_v14, %v1954_v24 }
 0x1a5   :  { %1725 = vset.pattern.permute.xlu1 %v3493_v11  ;;  %3507 = vst [vmem:[#allocation31_spill] sm:$0xff] %v2163_v63  ;;  %v2180_v63 = vand.u32 2147483647, %v1125_v12 }
 0x1a6   :  { %277 = vperm.xlu1 %1725, %v1866_v6   ;;  %v2148_v6 = vand.u32 2147483647, %v1262_v27  ;;  %v1279_v27 = vsub.f32 %v2014_v56, %v1973_v38  ;;  %v822_v56 = vsub.f32 %v2066_v39, %v1997_v49  ;;  %v2204_v39 = vand.u32 2147483647, %v514_v2  ;;  %3519 = vst [vmem:[#allocation43_spill] sm:$0xff] %v2219_v16 }
 0x1a7   :  { %3510 = vst [vmem:[#allocation34_spill] sm:$0xff] %v2180_v63  ;;  %v2197_v63 = vand.u32 2147483647, %v157_v29  ;;  %v2213_v29 = vpop.permute.xlu0 %230  ;;  %v2223_v2 = vand.u32 2147483647, %v1284_v8 }
 0x1a8   :  { %3501 = vst [vmem:[#allocation26_spill] sm:$0xff] %v2148_v6  ;;  %v2195_v12 = vand.u32 2147483647, %v1279_v27  ;;  %3514 = vst [vmem:[#allocation38_spill] sm:$0xff] %v2204_v39  ;;  %v2206_v6 = vand.u32 2147483647, %v668_v4  ;;  %v839_v27 = vsub.f32 %v2110_v22, %v1997_v49 }
 0x1a9   :  { %3512 = vst [vmem:[#allocation36_spill] sm:$0xff] %v2197_v63  ;;  %3516 = vst [vmem:[#allocation40_spill] sm:$0xff] %v2213_v29  ;;  %v2215_v5 = vand.u32 2147483647, %v822_v56  ;;  %v2225_v4 = vand.u32 2147483647, %v187_v58  ;;  %v207_v56 = vsub.f32 %v2159_v14, %v1952_v23 }
 0x1aa   :  { %1726 = vset.pattern.permute.xlu1 %v3505_v21  ;;  %3511 = vst [vmem:[#allocation35_spill] sm:$0xff] %v2195_v12  ;;  %3515 = vst [vmem:[#allocation39_spill] sm:$0xff] %v2206_v6  ;;  %v2217_v12 = vand.u32 2147483647, %v976_v20  ;;  %v2227_v6 = vand.u32 2147483647, %v377_v15  ;;  %v1301_v20 = vsub.f32 %v2110_v22, %v2011_v55  ;;  %v546_v15 = vsub.f32 %v2159_v14, %v1961_v31 }
 0x1ab   :  { %1476 = vperm.xlu1 %1726, %v1891_v28   ;;  %3517 = vst [vmem:[#allocation41_spill] sm:$0xff] %v2215_v5  ;;  %3520 = vst [vmem:[#allocation44_spill] sm:$0xff] %v2223_v2  ;;  %v2231_v39 = vand.u32 2147483647, %v531_v13  ;;  %v2239_v8 = vand.u32 2147483647, %v685_v0  ;;  %v700_v13 = vsub.f32 %v2159_v14, %v1963_v32  ;;  %v1162_v0 = vsub.f32 %v2159_v14, %v1970_v37 }
 0x1ac   :  { %3518 = vst [vmem:[#allocation42_spill] sm:$0xff] %v2217_v12  ;;  %3521 = vst [vmem:[#allocation45_spill] sm:$0xff] %v2225_v4  ;;  %v2241_v58 = vand.u32 2147483647, %v839_v27  ;;  %v2270_v4 = vand.u32 2147483647, %v392_v9  ;;  %v871_v5 = vsub.f32 %v2213_v29, %v1965_v33  ;;  %v1179_v12 = vsub.f32 %v2213_v29, %v1970_v37 }
 0x1ad   :  { %3522 = vst [vmem:[#allocation46_spill] sm:$0xff] %v2227_v6  ;;  %3523 = vst [vmem:[#allocation47_spill] sm:$0xff] %v2231_v39  ;;  %v1008_v39 = vsub.f32 %v2159_v14, %v1967_v34  ;;  %v2268_v6 = vand.u32 2147483647, %v207_v56  ;;  %v2276_v16 = vand.u32 2147483647, %v700_v13 }
 0x1ae   :  { %3524 = vst [vmem:[#allocation48_spill] sm:$0xff] %v2239_v8  ;;  %3525 = vst [vmem:[#allocation49_spill] sm:$0xff] %v2241_v58  ;;  %v237_v58 = vsub.f32 %v2213_v29, %v1952_v23  ;;  %v409_v8 = vsub.f32 %v2213_v29, %v1954_v24  ;;  %v2287_v9 = vand.u32 2147483647, %v1162_v0  ;;  %v2307_v0 = vand.u32 2147483647, %v871_v5 }
 0x1af   :  { %1728 = vset.pattern.permute.xlu1 %v3493_v11  ;;  %v993_v11 = vsub.f32 %v2110_v22, %v1999_v50  ;;  %3530 = vst [vmem:[#allocation54_spill] sm:$0xff] %v2268_v6  ;;  %3531 = vst [vmem:[#allocation55_spill] sm:$0xff] %v2270_v4  ;;  %v2285_v56 = vand.u32 2147483647, %v1008_v39 }
 0x1b0   :  { %1491 = vperm.xlu1 %1728, %v1891_v28   ;;  %v1147_v28 = vsub.f32 %v2110_v22, %v2001_v51  ;;  %v854_v22 = vsub.f32 %v2159_v14, %v1965_v33  ;;  %3533 = vst [vmem:[#allocation57_spill] sm:$0xff] %v2276_v16  ;;  %3536 = vst [vmem:[#allocation60_spill] sm:$0xff] %v2287_v9  ;;  %v2293_v13 = vand.u32 2147483647, %v409_v8  ;;  %v1745_v14 = vpop.eup %1744 }
 0x1b1   :  { %v2248_v2 = vand.u32 2147483647, %v993_v11  ;;  %v2264_v11 = vpop.permute.xlu0 %246  ;;  %3535 = vst [vmem:[#allocation59_spill] sm:$0xff] %v2285_v56  ;;  %3541 = vst [vmem:[#allocation65_spill] sm:$0xff] %v2307_v0 }
 0x1b2   :  { %v2256_v27 = vand.u32 2147483647, %v1147_v28  ;;  %3528 = vst [vmem:[#allocation52_spill] sm:$0xff] %v2264_v11  ;;  %v717_v28 = vsub.f32 %v2213_v29, %v1963_v32  ;;  %3538 = vst [vmem:[#allocation62_spill] sm:$0xff] %v2293_v13  ;;  %v250_v39 = vsub.f32 %v2264_v11, %v1981_v41  ;;  %v722_v8 = vsub.f32 %v2264_v11, %v1993_v47 }
 0x1b3   :  { %3526 = vst [vmem:[#allocation50_spill] sm:$0xff] %v2248_v2  ;;  %v2266_v2 = vand.u32 2147483647, %v1301_v20  ;;  %v2283_v20 = vand.u32 2147483647, %v854_v22  ;;  %v414_v22 = vsub.f32 %v2264_v11, %v1983_v42 }
 0x1b4   :  { %1495 = vperm.xlu1 %1728, %v1902_v35   ;;  %3527 = vst [vmem:[#allocation51_spill] sm:$0xff] %v2256_v27  ;;  %v563_v35 = vsub.f32 %v2213_v29, %v1961_v31  ;;  %v2274_v27 = vand.u32 2147483647, %v546_v15  ;;  %v1025_v15 = vsub.f32 %v2213_v29, %v1967_v34  ;;  %v2377_v29 = vrot.slane %v1934_v3, %v1956_v26 }
 0x1b5   :  { %3529 = vst [vmem:[#allocation53_spill] sm:$0xff] %v2266_v2  ;;  %3534 = vst [vmem:[#allocation58_spill] sm:$0xff] %v2283_v20  ;;  %v2291_v2 = vand.u32 2147483647, %v237_v58  ;;  %v568_v58 = vsub.f32 %v2264_v11, %v1985_v43  ;;  %v2315_v9 = vpop.permute.xlu0 %273  ;;  %v1430_v13 = vpop.permute.xlu1 %1429  ;;  %v2336_v4 = vand.u32 2147483647, %v414_v22 }
 0x1b6   :  { %3532 = vst [vmem:[#allocation56_spill] sm:$0xff] %v2274_v27  ;;  %v2295_v16 = vand.u32 2147483647, %v563_v35  ;;  %v876_v35 = vsub.f32 %v2264_v11, %v1997_v49  ;;  %3542 = vst [vmem:[#allocation66_spill] sm:$0xff] %v2315_v9  ;;  %v2317_v56 = vand.u32 2147483647, %v1025_v15  ;;  %v431_v5 = vsub.f32 %v2315_v9, %v1983_v42 }
 0x1b7   :  { %3537 = vst [vmem:[#allocation61_spill] sm:$0xff] %v2291_v2  ;;  %v585_v0 = vsub.f32 %v2315_v9, %v1985_v43  ;;  %v739_v2 = vsub.f32 %v2315_v9, %v1993_v47  ;;  %v893_v20 = vsub.f32 %v2315_v9, %v1997_v49  ;;  %v1471_v15 = vmul.f32 %v1745_v14, %v2161_v10 }
 0x1b8   :  { %1729 = vset.pattern.permute.xlu1 %v3505_v21  ;;  %3539 = vst [vmem:[#allocation63_spill] sm:$0xff] %v2295_v16  ;;  %v2299_v21 = vand.u32 2147483647, %v717_v28  ;;  %v1030_v28 = vsub.f32 %v2264_v11, %v1999_v50  ;;  %3543 = vst [vmem:[#allocation67_spill] sm:$0xff] %v2317_v56  ;;  %v2325_v16 = vand.u32 2147483647, %v1179_v12  ;;  %v1047_v30 = vsub.f32 %v2315_v9, %v1999_v50 }
 0x1b9   :  { %v2334_v27 = vand.u32 2147483647, %v250_v39  ;;  %3546 = vst [vmem:[#allocation70_spill] sm:$0xff] %v2336_v4  ;;  %v2338_v6 = vand.u32 2147483647, %v568_v58  ;;  %v2357_v58 = vadd.f32 %v1430_v13, %v1907_v36  ;;  %v1472_v56 = vsub.f32 2.0, %v1471_v15 }
 0x1ba   :  { %3540 = vst [vmem:[#allocation64_spill] sm:$0xff] %v2299_v21  ;;  %v280_v21 = vsub.f32 %v2315_v9, %v1981_v41  ;;  %3544 = vst [vmem:[#allocation68_spill] sm:$0xff] %v2325_v16  ;;  %v2340_v12 = vand.u32 2147483647, %v722_v8  ;;  %v2342_v16 = vand.u32 2147483647, %v876_v35 }
 0x1bb   :  { %3545 = vst [vmem:[#allocation69_spill] sm:$0xff] %v2334_v27  ;;  %3547 = vst [vmem:[#allocation71_spill] sm:$0xff] %v2338_v6  ;;  %v2344_v63 = vand.u32 2147483647, %v1030_v28  ;;  %v2352_v39 = vand.u32 2147483647, %v431_v5  ;;  %1746 = vrsqrt.f32 %v2357_v58 }
 0x1bc   :  { %3548 = vst [vmem:[#allocation72_spill] sm:$0xff] %v2340_v12  ;;  %3549 = vst [vmem:[#allocation73_spill] sm:$0xff] %v2342_v16  ;;  %v2350_v59 = vand.u32 2147483647, %v280_v21  ;;  %v2354_v22 = vand.u32 2147483647, %v585_v0 }
 0x1bd   :  { %3550 = vst [vmem:[#allocation74_spill] sm:$0xff] %v2344_v63  ;;  %3552 = vst [vmem:[#allocation76_spill] sm:$0xff] %v2352_v39  ;;  %v2359_v8 = vand.u32 2147483647, %v739_v2  ;;  %v2361_v35 = vand.u32 2147483647, %v893_v20 }
 0x1be   :  { %3551 = vst [vmem:[#allocation75_spill] sm:$0xff] %v2350_v59  ;;  %3553 = vst [vmem:[#allocation77_spill] sm:$0xff] %v2354_v22  ;;  %v2367_v10 = vand.u32 2147483647, %v1047_v30  ;;  %vm1444_vm6 = vcmp.eq.f32.partialorder %v2357_v58, inf  ;;  %vm1446_vm7 = vcmp.eq.f32.partialorder %v2357_v58, 0.0 }
 0x1bf   :  { %3554 = vst [vmem:[#allocation78_spill] sm:$0xff] %v2359_v8  ;;  %3555 = vst [vmem:[#allocation79_spill] sm:$0xff] %v2361_v35 }
 0x1c0   :  { %3556 = vst [vmem:[#allocation80_spill] sm:$0xff] %v2367_v10  ;;  %3557 = vst [vmem:[#allocation81_spill] sm:$0xff] %v2377_v29 }
 0x1c2   :  { %v52_v28 = vpop.permute.xlu1 %51 }
 0x1c3   :  { %v55_v63 = vsub.f32 %v52_v28, %v1952_v23  ;;  %v304_v16 = vsub.f32 %v52_v28, %v1954_v24  ;;  %v458_v21 = vsub.f32 %v52_v28, %v1961_v31  ;;  %v612_v5 = vsub.f32 %v52_v28, %v1963_v32 }
 0x1c4   :  { %v766_v0 = vsub.f32 %v52_v28, %v1965_v33  ;;  %v920_v36 = vsub.f32 %v52_v28, %v1967_v34  ;;  %v1074_v2 = vsub.f32 %v52_v28, %v1970_v37  ;;  %v1228_v20 = vsub.f32 %v52_v28, %v1973_v38 }
 0x1c5   :  { %v57_v13 = vand.u32 2147483647, %v55_v63  ;;  %v306_v15 = vand.u32 2147483647, %v304_v16  ;;  %v460_v11 = vand.u32 2147483647, %v458_v21  ;;  %v1473_v63 = vmul.f32 %v1745_v14, %v1472_v56 }
 0x1c6   :  { %v614_v30 = vand.u32 2147483647, %v612_v5  ;;  %v768_v10 = vand.u32 2147483647, %v766_v0  ;;  %v922_v16 = vand.u32 2147483647, %v920_v36 }
 0x1c7   :  { %v2380_v35 = vadd.f32 %v2049_v17, %v57_v13  ;;  %v2383_v8 = vadd.f32 %v2051_v18, %v306_v15  ;;  %v2386_v22 = vadd.f32 %v2053_v19, %v460_v11  ;;  %v1076_v21 = vand.u32 2147483647, %v1074_v2  ;;  %v60_v9 = vpop.permute.xlu1 %59 }
 0x1c8   :  { %v2393_v17 = vadd.f32 %v2058_v7, %v614_v30  ;;  %v66_v18 = vsub.f32 %v60_v9, %v1981_v41  ;;  %v307_v0 = vsub.f32 %v60_v9, %v1983_v42  ;;  %v2398_v19 = vadd.f32 %v2068_v40, %v768_v10 }
 0x1c9   :  { %v316_v5 = vmin.f32 %v2380_v35, %v2383_v8  ;;  %v461_v14 = vsub.f32 %v60_v9, %v1985_v43  ;;  %v615_v11 = vsub.f32 %v60_v9, %v1993_v47  ;;  %v769_v56 = vsub.f32 %v60_v9, %v1997_v49 }
 0x1ca   :  { %v68_v36 = vand.u32 2147483647, %v66_v18  ;;  %v309_v2 = vand.u32 2147483647, %v307_v0  ;;  %v923_v7 = vsub.f32 %v60_v9, %v1999_v50  ;;  %v2406_v3 = vrot.slane %v1473_v63, %v1956_v26 }
 0x1cb   :  { %v470_v28 = vmin.f32 %v316_v5, %v2386_v22  ;;  %v463_v13 = vand.u32 2147483647, %v461_v14  ;;  %v617_v15 = vand.u32 2147483647, %v615_v11  ;;  %v771_v30 = vand.u32 2147483647, %v769_v56 }
 0x1cc   :  { %3558 = vst [vmem:[#allocation82_spill] sm:$0xff] %v2406_v3  ;;  %v2410_v10 = vadd.f32 %v68_v36, %v2004_v52  ;;  %v2413_v29 = vadd.f32 %v309_v2, %v2006_v53  ;;  %v1077_v5 = vsub.f32 %v60_v9, %v2001_v51  ;;  %v2417_v18 = vadd.f32 %v2070_v44, %v922_v16 }
 0x1cd   :  { %v624_v40 = vmin.f32 %v470_v28, %v2393_v17  ;;  %v2420_v0 = vadd.f32 %v2072_v45, %v1076_v21  ;;  %v1230_v14 = vand.u32 2147483647, %v1228_v20  ;;  %v2423_v63 = vadd.f32 %v463_v13, %v2016_v57  ;;  %v76_v28 = vpop.permute.xlu1 %75 }
 0x1ce   :  { %3559 = vst [vmem:[#allocation83_spill] sm:$0xff] %v2413_v29  ;;  %3560 = vst [vmem:[#allocation84_spill] sm:$0xff] %v2417_v18  ;;  %v315_v52 = vmin.f32 %v2410_v10, %v2413_v29  ;;  %v2429_v53 = vadd.f32 %v617_v15, %v2024_v60  ;;  %v925_v56 = vand.u32 2147483647, %v923_v7  ;;  %v2432_v44 = vadd.f32 %v771_v30, %v2026_v61  ;;  %v1747_v61 = vpop.eup %1746 }
 0x1cf   :  { %3561 = vst [vmem:[#allocation85_spill] sm:$0xff] %v2420_v0  ;;  %3562 = vst [vmem:[#allocation86_spill] sm:$0xff] %v2423_v63  ;;  %v778_v11 = vmin.f32 %v624_v40, %v2398_v19  ;;  %v82_v45 = vsub.f32 %v76_v28, %v1952_v23  ;;  %v319_v20 = vsub.f32 %v76_v28, %v1954_v24  ;;  %v1079_v21 = vand.u32 2147483647, %v1077_v5 }
 0x1d0   :  { %3563 = vst [vmem:[#allocation87_spill] sm:$0xff] %v2429_v53  ;;  %v473_v57 = vsub.f32 %v76_v28, %v1961_v31  ;;  %v469_v16 = vmin.f32 %v315_v52, %v2423_v63  ;;  %v1231_v36 = vsub.f32 %v60_v9, %v2011_v55  ;;  %v627_v2 = vsub.f32 %v76_v28, %v1963_v32 }
 0x1d1   :  { %v84_v60 = vand.u32 2147483647, %v82_v45  ;;  %v321_v13 = vand.u32 2147483647, %v319_v20  ;;  %v781_v15 = vsub.f32 %v76_v28, %v1965_v33  ;;  %v932_v30 = vmin.f32 %v778_v11, %v2417_v18 }
 0x1d2   :  { %v475_v7 = vand.u32 2147483647, %v473_v57  ;;  %v623_v40 = vmin.f32 %v469_v16, %v2429_v53  ;;  %v2444_v26 = vadd.f32 %v925_v56, %v2028_v62  ;;  %v629_v39 = vand.u32 2147483647, %v627_v2  ;;  %v3570_v2 = vld [vmem:[#allocation13_spill] sm:$0xff] }
 0x1d3   :  { %v2447_v5 = vadd.f32 %v2078_v48, %v84_v60  ;;  %v2450_v9 = vadd.f32 %v2080_v54, %v321_v13  ;;  %v783_v45 = vand.u32 2147483647, %v781_v15  ;;  %v1233_v57 = vand.u32 2147483647, %v1231_v36 }
 0x1d4   :  { %v2453_v52 = vadd.f32 %v2083_v25, %v475_v7  ;;  %v777_v20 = vmin.f32 %v623_v40, %v2432_v44  ;;  %v935_v11 = vsub.f32 %v76_v28, %v1967_v34  ;;  %v1089_v16 = vsub.f32 %v76_v28, %v1970_v37 }
 0x1d5   :  { %3564 = vst [vmem:[#allocation88_spill] sm:$0xff] %v2450_v9  ;;  %v2459_v62 = vadd.f32 %v2076_v46, %v1230_v14  ;;  %v333_v48 = vmin.f32 %v2447_v5, %v2450_v9  ;;  %v2464_v54 = vadd.f32 %v2091_v1, %v629_v39  ;;  %v2467_v25 = vmul.f32 %v1747_v61, %v2357_v58  ;;  %v3571_v14 = vld [vmem:[#allocation15_spill] sm:$0xff]  ;;  %v80_v39 = vpop.permute.xlu1 %79  ;;  %v3572_v61 = vld [vmem:[#allocation14_spill] sm:$0xff] }
 0x1d6   :  { %3565 = vst [vmem:[#allocation89_spill] sm:$0xff] %v2453_v52  ;;  %v2470_v56 = vmin.f32 %v932_v30, %v2420_v0  ;;  %v931_v36 = vmin.f32 %v777_v20, %v2444_v26  ;;  %v2474_v60 = vadd.f32 %v1079_v21, %v3570_v2  ;;  %v937_v13 = vand.u32 2147483647, %v935_v11  ;;  %v3575_v2 = vld [vmem:[#allocation16_spill] sm:$0xff]  ;;  %v3576_v30 = vld [vmem:[#allocation17_spill] sm:$0xff] }
 0x1d7   :  { %3566 = vst [vmem:[#allocation90_spill] sm:$0xff] %v2459_v62  ;;  %3567 = vst [vmem:[#allocation91_spill] sm:$0xff] %v2464_v54  ;;  %v487_v46 = vmin.f32 %v333_v48, %v2453_v52  ;;  %v2478_v7 = vadd.f32 %v3571_v14, %v783_v45  ;;  %v1091_v15 = vand.u32 2147483647, %v1089_v16  ;;  %v1243_v1 = vsub.f32 %v76_v28, %v1973_v38 }
 0x1d8   :  { %3568 = vst [vmem:[#allocation92_spill] sm:$0xff] %v2467_v25  ;;  %3569 = vst [vmem:[#allocation93_spill] sm:$0xff] %v2470_v56  ;;  %v2482_v40 = vadd.f32 %v1233_v57, %v3572_v61  ;;  %v83_v20 = vsub.f32 %v80_v39, %v1952_v23  ;;  %v320_v28 = vsub.f32 %v80_v39, %v1954_v24 }
 0x1d9   :  { %v641_v45 = vmin.f32 %v487_v46, %v2464_v54  ;;  %v1245_v16 = vand.u32 2147483647, %v1243_v1  ;;  %v2494_v48 = vmin.f32 %v931_v36, %v2474_v60  ;;  %v2499_v14 = vadd.f32 %v3575_v2, %v937_v13  ;;  %v3577_v46 = vld [vmem:[#allocation18_spill] sm:$0xff] }
 0x1da   :  { %3573 = vst [vmem:[#allocation13_spill] sm:$0xff] %v2482_v40  ;;  %v474_v61 = vsub.f32 %v80_v39, %v1961_v31  ;;  %v2504_v11 = vadd.f32 %v3576_v30, %v1091_v15  ;;  %v628_v56 = vsub.f32 %v80_v39, %v1963_v32  ;;  %v85_v36 = vand.u32 2147483647, %v83_v20  ;;  %v92_v30 = vpop.permute.xlu1 %91 }
 0x1db   :  { %3574 = vst [vmem:[#allocation15_spill] sm:$0xff] %v2494_v48  ;;  %v795_v21 = vmin.f32 %v641_v45, %v2478_v7  ;;  %v2507_v1 = vadd.f32 %v3577_v46, %v1245_v16  ;;  %v782_v62 = vsub.f32 %v80_v39, %v1965_v33  ;;  %v936_v57 = vsub.f32 %v80_v39, %v1967_v34 }
 0x1dc   :  { %v1090_v13 = vsub.f32 %v80_v39, %v1970_v37  ;;  %v322_v59 = vand.u32 2147483647, %v320_v28  ;;  %v476_v45 = vand.u32 2147483647, %v474_v61  ;;  %v1244_v15 = vsub.f32 %v80_v39, %v1973_v38 }
 0x1dd   :  { %3578 = vst [vmem:[#allocation14_spill] sm:$0xff] %v2507_v1  ;;  %v949_v16 = vmin.f32 %v795_v21, %v2499_v14  ;;  %v630_v46 = vand.u32 2147483647, %v628_v56  ;;  %v784_v12 = vand.u32 2147483647, %v782_v62  ;;  %v95_v20 = vsub.f32 %v92_v30, %v1981_v41 }
 0x1de   :  { %v938_v6 = vand.u32 2147483647, %v936_v57  ;;  %v1092_v4 = vand.u32 2147483647, %v1090_v13  ;;  %v324_v27 = vsub.f32 %v92_v30, %v1983_v42  ;;  %v478_v3 = vsub.f32 %v92_v30, %v1985_v43 }
 0x1df   :  { %v97_v54 = vand.u32 2147483647, %v95_v20  ;;  %v632_v2 = vsub.f32 %v92_v30, %v1993_v47  ;;  %v786_v28 = vsub.f32 %v92_v30, %v1997_v49  ;;  %v940_v39 = vsub.f32 %v92_v30, %v1999_v50 }
 0x1e0   :  { %v1246_v61 = vand.u32 2147483647, %v1244_v15  ;;  %v326_v53 = vand.u32 2147483647, %v324_v27  ;;  %v480_v21 = vand.u32 2147483647, %v478_v3  ;;  %v1094_v62 = vsub.f32 %v92_v30, %v2001_v51 }
 0x1e1   :  { %v2524_v56 = vadd.f32 %v97_v54, %v85_v36  ;;  %v634_v57 = vand.u32 2147483647, %v632_v2  ;;  %v788_v13 = vand.u32 2147483647, %v786_v28  ;;  %v942_v52 = vand.u32 2147483647, %v940_v39  ;;  %v107_v54 = vpop.permute.xlu1 %106 }
 0x1e2   :  { %v2526_v63 = vadd.f32 %v326_v53, %v322_v59  ;;  %v2528_v25 = vadd.f32 %v480_v21, %v476_v45  ;;  %v1096_v20 = vand.u32 2147483647, %v1094_v62  ;;  %v1248_v9 = vsub.f32 %v92_v30, %v2011_v55 }
 0x1e3   :  { %v2533_v15 = vadd.f32 %v634_v57, %v630_v46  ;;  %v2535_v27 = vadd.f32 %v788_v13, %v784_v12  ;;  %v2537_v3 = vadd.f32 %v942_v52, %v938_v6  ;;  %v113_v28 = vsub.f32 %v107_v54, %v1952_v23 }
 0x1e4   :  { %v334_v59 = vmin.f32 %v2524_v56, %v2526_v63  ;;  %v2545_v2 = vadd.f32 %v1096_v20, %v1092_v4  ;;  %v1250_v52 = vand.u32 2147483647, %v1248_v9  ;;  %v337_v4 = vsub.f32 %v107_v54, %v1954_v24 }
 0x1e5   :  { %3579 = vst [vmem:[#allocation16_spill] sm:$0xff] %v2535_v27  ;;  %v491_v21 = vsub.f32 %v107_v54, %v1961_v31  ;;  %v645_v62 = vsub.f32 %v107_v54, %v1963_v32  ;;  %v799_v57 = vsub.f32 %v107_v54, %v1965_v33  ;;  %v2568_v20 = vmin.f32 %v949_v16, %v2504_v11  ;;  %v119_v12 = vpop.permute.xlu1 %118 }
 0x1e6   :  { %3580 = vst [vmem:[#allocation17_spill] sm:$0xff] %v2545_v2  ;;  %v488_v30 = vmin.f32 %v334_v59, %v2528_v25  ;;  %v2558_v39 = vadd.f32 %v1250_v52, %v1246_v61  ;;  %v115_v46 = vand.u32 2147483647, %v113_v28  ;;  %v339_v61 = vand.u32 2147483647, %v337_v4 }
 0x1e7   :  { %3582 = vst [vmem:[#allocation94_spill] sm:$0xff] %v2568_v20  ;;  %v493_v52 = vand.u32 2147483647, %v491_v21  ;;  %v953_v6 = vsub.f32 %v107_v54, %v1967_v34  ;;  %v647_v53 = vand.u32 2147483647, %v645_v62  ;;  %v125_v9 = vsub.f32 %v119_v12, %v1981_v41 }
 0x1e8   :  { %3581 = vst [vmem:[#allocation18_spill] sm:$0xff] %v2558_v39  ;;  %v642_v59 = vmin.f32 %v488_v30, %v2533_v15  ;;  %v801_v36 = vand.u32 2147483647, %v799_v57  ;;  %v1107_v29 = vsub.f32 %v107_v54, %v1970_v37  ;;  %v341_v16 = vsub.f32 %v119_v12, %v1983_v42 }
 0x1e9   :  { %v495_v30 = vsub.f32 %v119_v12, %v1985_v43  ;;  %v649_v28 = vsub.f32 %v119_v12, %v1993_v47  ;;  %v1261_v21 = vsub.f32 %v107_v54, %v1973_v38  ;;  %v127_v62 = vand.u32 2147483647, %v125_v9 }
 0x1ea   :  { %v796_v45 = vmin.f32 %v642_v59, %v2535_v27  ;;  %v803_v57 = vsub.f32 %v119_v12, %v1997_v49  ;;  %v343_v59 = vand.u32 2147483647, %v341_v16  ;;  %v957_v39 = vsub.f32 %v119_v12, %v1999_v50 }
 0x1eb   :  { %v497_v13 = vand.u32 2147483647, %v495_v30  ;;  %v651_v0 = vand.u32 2147483647, %v649_v28  ;;  %v129_v40 = vadd.f32 %v127_v62, %v115_v46  ;;  %v1111_v27 = vsub.f32 %v119_v12, %v2001_v51 }
 0x1ec   :  { %v950_v4 = vmin.f32 %v796_v45, %v2537_v3  ;;  %v805_v18 = vand.u32 2147483647, %v803_v57  ;;  %v945_v45 = vmin.f32 %v2444_v26, %v2499_v14  ;;  %v1099_v54 = vmin.f32 %v2474_v60, %v2504_v11  ;;  %v3585_v60 = vld [vmem:[#allocation83_spill] sm:$0xff]  ;;  %v3586_v11 = vld [vmem:[#allocation88_spill] sm:$0xff] }
 0x1ed   :  { %v345_v9 = vadd.f32 %v343_v59, %v339_v61  ;;  %v499_v38 = vadd.f32 %v497_v13, %v493_v52  ;;  %v955_v30 = vand.u32 2147483647, %v953_v6  ;;  %v959_v28 = vand.u32 2147483647, %v957_v39  ;;  %v3588_v59 = vld [vmem:[#allocation92_spill] sm:$0xff] }
 0x1ee   :  { %v2585_v48 = vmin.f32 %v950_v4, %v2545_v2  ;;  %v1265_v4 = vsub.f32 %v119_v12, %v2011_v55  ;;  %v123_v2 = vpop.permute.xlu1 %122  ;;  %v1109_v46 = vand.u32 2147483647, %v1107_v29  ;;  %v1263_v62 = vand.u32 2147483647, %v1261_v21 }
 0x1ef   :  { %v351_v57 = vmin.f32 %v129_v40, %v345_v9  ;;  %v3584_v26 = vmin.f32 %v2410_v10, %v2447_v5  ;;  %v3587_v13 = vmin.f32 %v3585_v60, %v3586_v11  ;;  %v807_v52 = vadd.f32 %v805_v18, %v801_v36  ;;  %v3589_v10 = vld [vmem:[#allocation86_spill] sm:$0xff]  ;;  %v3590_v5 = vld [vmem:[#allocation89_spill] sm:$0xff] }
 0x1f0   :  { %3583 = vst [vmem:[#allocation95_spill] sm:$0xff] %v2585_v48  ;;  %v653_v48 = vadd.f32 %v651_v0, %v647_v53  ;;  %v1113_v6 = vand.u32 2147483647, %v1111_v27  ;;  %v1445_v29 = vsel %vm1444_vm6, %v2357_v58, %v3588_v59  ;;  %v126_v0 = vsub.f32 %v123_v2, %v1981_v41 }
 0x1f1   :  { %v2598_v14 = vmin.f32 %v3584_v26, %v129_v40  ;;  %v2603_v61 = vmin.f32 %v3587_v13, %v345_v9  ;;  %v505_v39 = vmin.f32 %v351_v57, %v499_v38  ;;  %v342_v53 = vsub.f32 %v123_v2, %v1983_v42 }
 0x1f2   :  { %v3591_v40 = vmin.f32 %v3589_v10, %v3590_v5  ;;  %v961_v21 = vadd.f32 %v959_v28, %v955_v30  ;;  %v1267_v9 = vand.u32 2147483647, %v1265_v4  ;;  %v3592_v18 = vand.u32 2147483648, %v2357_v58  ;;  %v3593_v28 = vld [vmem:[#allocation19_spill] sm:$0xff]  ;;  %v3594_v58 = vld [vmem:[#allocation20_spill] sm:$0xff] }
 0x1f3   :  { %v659_v36 = vmin.f32 %v505_v39, %v653_v48  ;;  %v128_v26 = vand.u32 2147483647, %v126_v0  ;;  %v344_v60 = vand.u32 2147483647, %v342_v53  ;;  %v496_v11 = vsub.f32 %v123_v2, %v1985_v43  ;;  %v3595_v39 = vld [vmem:[#allocation87_spill] sm:$0xff] }
 0x1f4   :  { %v2614_v12 = vmin.f32 %v3591_v40, %v499_v38  ;;  %v1448_v27 = vsel %vm1446_vm7, %v3592_v18, %v1445_v29  ;;  %v650_v13 = vsub.f32 %v123_v2, %v1993_v47  ;;  %v804_v59 = vsub.f32 %v123_v2, %v1997_v49  ;;  %v3596_v10 = vld [vmem:[#allocation91_spill] sm:$0xff] }
 0x1f5   :  { %v2620_v57 = vadd.f32 1e-06, %v1448_v27  ;;  %v958_v38 = vsub.f32 %v123_v2, %v1999_v50  ;;  %v813_v30 = vmin.f32 %v659_v36, %v807_v52  ;;  %v130_v4 = vadd.f32 %v128_v26, %v3593_v28  ;;  %v2634_v27 = vpop.permute.xlu1 %141 }
 0x1f6   :  { %v346_v29 = vadd.f32 %v344_v60, %v3594_v58  ;;  %v3597_v5 = vmin.f32 %v3595_v39, %v3596_v10  ;;  %v498_v53 = vand.u32 2147483647, %v496_v11  ;;  %v652_v40 = vand.u32 2147483647, %v650_v13  ;;  %v3600_v58 = vld [vmem:[#allocation21_spill] sm:$0xff]  ;;  %v3601_v39 = vld [vmem:[#allocation22_spill] sm:$0xff] }
 0x1f7   :  { %1748 = vrcp.f32 %v2620_v57  ;;  %v806_v18 = vand.u32 2147483647, %v804_v59  ;;  %v967_v16 = vmin.f32 %v813_v30, %v961_v21  ;;  %v1115_v20 = vadd.f32 %v1113_v6, %v1109_v46 }
 0x1f8   :  { %v2632_v0 = vmin.f32 %v3597_v5, %v653_v48  ;;  %v352_v1 = vmin.f32 %v130_v4, %v346_v29  ;;  %v1112_v36 = vsub.f32 %v123_v2, %v2001_v51  ;;  %v3598_v26 = vmin.f32 %v2432_v44, %v2478_v7 }
 0x1f9   :  { %v2642_v60 = vmin.f32 %v945_v45, %v961_v21  ;;  %v500_v48 = vadd.f32 %v498_v53, %v3600_v58  ;;  %v654_v11 = vadd.f32 %v652_v40, %v3601_v39  ;;  %v2646_v13 = vmin.f32 %v1099_v54, %v1115_v20 }
 0x1fa   :  { %v2640_v28 = vmin.f32 %v3598_v26, %v807_v52  ;;  %v960_v59 = vand.u32 2147483647, %v958_v38  ;;  %v1266_v30 = vsub.f32 %v123_v2, %v2011_v55  ;;  %v145_v46 = vsub.f32 %v2634_v27, %v1952_v23  ;;  %v3604_v52 = vld [vmem:[#allocation23_spill] sm:$0xff] }
 0x1fb   :  { %3599 = vst [vmem:[#allocation83_spill] sm:$0xff] %v2642_v60  ;;  %3602 = vst [vmem:[#allocation88_spill] sm:$0xff] %v2646_v13  ;;  %v2651_v6 = vadd.f32 %v1267_v9, %v1263_v62  ;;  %v3603_v44 = vmin.f32 %v2380_v35, %v2524_v56  ;;  %v506_v45 = vmin.f32 %v352_v1, %v500_v48  ;;  %v1114_v2 = vand.u32 2147483647, %v1112_v36  ;;  %v3607_v56 = vld [vmem:[#allocation24_spill] sm:$0xff] }
 0x1fc   :  { %v808_v21 = vadd.f32 %v806_v18, %v3604_v52  ;;  %v2659_v10 = vmin.f32 %v967_v16, %v1115_v20  ;;  %v3606_v54 = vmin.f32 %v2383_v8, %v2526_v63  ;;  %v147_v5 = vand.u32 2147483647, %v145_v46  ;;  %v3609_v9 = vld [vmem:[#allocation36_spill] sm:$0xff] }
 0x1fd   :  { %v2656_v7 = vmin.f32 %v3603_v44, %v130_v4  ;;  %v660_v53 = vmin.f32 %v506_v45, %v654_v11  ;;  %v356_v62 = vsub.f32 %v2634_v27, %v1954_v24  ;;  %v510_v35 = vsub.f32 %v2634_v27, %v1961_v31  ;;  %v3613_v44 = vld [vmem:[#allocation16_spill] sm:$0xff] }
 0x1fe   :  { %3605 = vst [vmem:[#allocation92_spill] sm:$0xff] %v2659_v10  ;;  %v2664_v38 = vmin.f32 %v3606_v54, %v346_v29  ;;  %v664_v1 = vsub.f32 %v2634_v27, %v1963_v32  ;;  %v2673_v20 = vadd.f32 %v960_v59, %v3607_v56  ;;  %v1268_v16 = vand.u32 2147483647, %v1266_v30 }
 0x1ff   :  { %v2676_v8 = vadd.f32 %v3609_v9, %v147_v5  ;;  %v818_v63 = vsub.f32 %v2634_v27, %v1965_v33  ;;  %v2680_v4 = vmin.f32 %v660_v53, %v808_v21  ;;  %v358_v29 = vand.u32 2147483647, %v356_v62  ;;  %v3618_v5 = vld [vmem:[#allocation84_spill] sm:$0xff] }
 0x200   :  { %3608 = vst [vmem:[#allocation86_spill] sm:$0xff] %v2673_v20  ;;  %v512_v40 = vand.u32 2147483647, %v510_v35  ;;  %v666_v18 = vand.u32 2147483647, %v664_v1  ;;  %v3611_v36 = vmin.f32 %v2386_v22, %v2528_v25  ;;  %v972_v39 = vsub.f32 %v2634_v27, %v1967_v34  ;;  %v3616_v22 = vld [vmem:[#allocation37_spill] sm:$0xff] }
 0x201   :  { %3610 = vst [vmem:[#allocation89_spill] sm:$0xff] %v2680_v4  ;;  %v820_v58 = vand.u32 2147483647, %v818_v63  ;;  %v1126_v59 = vsub.f32 %v2634_v27, %v1970_v37  ;;  %v3612_v30 = vmin.f32 %v2393_v17, %v2533_v15  ;;  %v3614_v45 = vmin.f32 %v2398_v19, %v3613_v44  ;;  %v3621_v17 = vld [vmem:[#allocation25_spill] sm:$0xff]  ;;  %v3630_v19 = vld [vmem:[#allocation27_spill] sm:$0xff] }
 0x202   :  { %v2685_v26 = vmin.f32 %v3611_v36, %v500_v48  ;;  %v2702_v25 = vadd.f32 %v3616_v22, %v358_v29  ;;  %v3617_v48 = vld [vmem:[#allocation38_spill] sm:$0xff]  ;;  %v3619_v53 = vmin.f32 %v3618_v5, %v2537_v3  ;;  %v2714_v15 = vadd.f32 %v1114_v2, %v3621_v17  ;;  %v3625_v3 = vld [vmem:[#allocation39_spill] sm:$0xff]  ;;  %v3626_v29 = vld [vmem:[#allocation41_spill] sm:$0xff] }
 0x203   :  { %v2694_v46 = vmin.f32 %v3612_v30, %v654_v11  ;;  %v2699_v52 = vmin.f32 %v3614_v45, %v808_v21  ;;  %v2705_v54 = vadd.f32 %v3617_v48, %v512_v40  ;;  %v3623_v11 = vld [vmem:[#allocation26_spill] sm:$0xff]  ;;  %v150_v21 = vpop.permute.xlu1 %149  ;;  %v2726_v63 = vadd.f32 %v3625_v3, %v666_v18  ;;  %v3628_v30 = vld [vmem:[#allocation12_spill] sm:$0xff]  ;;  %v2734_v45 = vpop.permute.xlu0 %1481 }
 0x204   :  { %v2711_v62 = vmin.f32 %v3619_v53, %v2673_v20  ;;  %3622 = vst [vmem:[#allocation87_spill] sm:$0xff] %v2714_v15  ;;  %v2717_v35 = vadd.f32 %v1268_v16, %v3623_v11  ;;  %v1749_v1 = vpop.eup %1748  ;;  %v370_v9 = vmin.f32 %v2676_v8, %v2702_v25  ;;  %v2729_v2 = vadd.f32 %v3626_v29, %v820_v58 }
 0x205   :  { %3615 = vst [vmem:[#allocation19_spill] sm:$0xff] %v2699_v52  ;;  %v1454_v16 = vmul.f32 %v1749_v1, %v2620_v57  ;;  %v974_v40 = vand.u32 2147483647, %v972_v39  ;;  %v1128_v36 = vand.u32 2147483647, %v1126_v59  ;;  %v1280_v44 = vsub.f32 %v2634_v27, %v3628_v30  ;;  %3629 = vst [vmem:[#allocation22_spill] sm:$0xff] %v2734_v45 }
 0x206   :  { %3620 = vst [vmem:[#allocation20_spill] sm:$0xff] %v2711_v62  ;;  %3624 = vst [vmem:[#allocation91_spill] sm:$0xff] %v2717_v35  ;;  %v524_v18 = vmin.f32 %v370_v9, %v2705_v54  ;;  %v156_v58 = vsub.f32 %v150_v21, %v1981_v41  ;;  %v359_v57 = vsub.f32 %v150_v21, %v1983_v42 }
 0x207   :  { %3627 = vst [vmem:[#allocation21_spill] sm:$0xff] %v2729_v2  ;;  %v1456_v5 = vsub.f32 2.0, %v1454_v16  ;;  %v513_v39 = vsub.f32 %v150_v21, %v1985_v43  ;;  %v667_v59 = vsub.f32 %v150_v21, %v1993_v47  ;;  %v821_v17 = vsub.f32 %v150_v21, %v1997_v49  ;;  %v2748_v48 = vpop.permute.xlu1 %168  ;;  %v1509_v22 = vpop.permute.xlu0 %1508 }
 0x208   :  { %v678_v27 = vmin.f32 %v524_v18, %v2726_v63  ;;  %v158_v53 = vand.u32 2147483647, %v156_v58  ;;  %v975_v11 = vsub.f32 %v150_v21, %v1999_v50  ;;  %v361_v29 = vand.u32 2147483647, %v359_v57  ;;  %v3631_v58 = vld [vmem:[#allocation42_spill] sm:$0xff]  ;;  %v3634_v57 = vld [vmem:[#allocation29_spill] sm:$0xff] }
 0x209   :  { %v1458_v3 = vmul.f32 %v1749_v1, %v1456_v5  ;;  %v515_v56 = vand.u32 2147483647, %v513_v39  ;;  %v669_v9 = vand.u32 2147483647, %v667_v59  ;;  %v823_v35 = vand.u32 2147483647, %v821_v17 }
 0x20a   :  { %v160_v45 = vadd.f32 %v158_v53, %v3630_v19  ;;  %v977_v20 = vand.u32 2147483647, %v975_v11  ;;  %v2756_v4 = vadd.f32 %v3631_v58, %v974_v40  ;;  %v3633_v1 = vld [vmem:[#allocation28_spill] sm:$0xff]  ;;  %v3635_v59 = vld [vmem:[#allocation43_spill] sm:$0xff]  ;;  %v2763_v16 = vand.u32 2147483647, %v1280_v44 }
 0x20b   :  { %1513 = vperm.xlu1 %1729, %v1458_v3   ;;  %v363_v5 = vadd.f32 %v361_v29, %v3633_v1  ;;  %v517_v39 = vadd.f32 %v515_v56, %v3634_v57  ;;  %v2761_v15 = vadd.f32 %v3635_v59, %v1128_v36  ;;  %v1129_v19 = vsub.f32 %v150_v21, %v2001_v51  ;;  %v3639_v11 = vld [vmem:[#allocation82_spill] sm:$0xff]  ;;  %v3641_v58 = vld [vmem:[#allocation31_spill] sm:$0xff]  ;;  %v3642_v1 = vld [vmem:[#allocation32_spill] sm:$0xff] }
 0x20c   :  { %3632 = vst [vmem:[#allocation23_spill] sm:$0xff] %v2756_v4  ;;  %3637 = vst [vmem:[#allocation36_spill] sm:$0xff] %v2763_v16  ;;  %v1283_v53 = vsub.f32 %v150_v21, %v2011_v55  ;;  %v2768_v17 = vmin.f32 %v678_v27, %v2729_v2  ;;  %v2771_v3 = vmul.f32 %v3639_v11, %v1509_v22  ;;  %v3643_v57 = vld [vmem:[#allocation33_spill] sm:$0xff]  ;;  %v3648_v4 = vld [vmem:[#allocation47_spill] sm:$0xff] }
 0x20d   :  { %3636 = vst [vmem:[#allocation24_spill] sm:$0xff] %v2761_v15  ;;  %v369_v40 = vmin.f32 %v160_v45, %v363_v5  ;;  %v671_v29 = vadd.f32 %v669_v9, %v3641_v58  ;;  %v162_v56 = vmin.f32 %v2598_v14, %v160_v45  ;;  %v365_v36 = vmin.f32 %v2603_v61, %v363_v5  ;;  %v2786_v9 = vpop.permute.xlu1 %172 }
 0x20e   :  { %3638 = vst [vmem:[#allocation16_spill] sm:$0xff] %v2768_v17  ;;  %3640 = vst [vmem:[#allocation37_spill] sm:$0xff] %v2771_v3  ;;  %v825_v44 = vadd.f32 %v823_v35, %v3642_v1  ;;  %v2778_v59 = vadd.f32 %v977_v20, %v3643_v57  ;;  %v175_v21 = vsub.f32 %v2748_v48, %v1952_v23  ;;  %v1131_v14 = vand.u32 2147483647, %v1129_v19  ;;  %v3647_v17 = vld [vmem:[#allocation46_spill] sm:$0xff] }
 0x20f   :  { %v523_v18 = vmin.f32 %v369_v40, %v517_v39  ;;  %v373_v22 = vsub.f32 %v2748_v48, %v1954_v24  ;;  %v527_v27 = vsub.f32 %v2748_v48, %v1961_v31  ;;  %v1285_v45 = vand.u32 2147483647, %v1283_v53  ;;  %v3646_v53 = vld [vmem:[#allocation45_spill] sm:$0xff] }
 0x210   :  { %3644 = vst [vmem:[#allocation38_spill] sm:$0xff] %v2778_v59  ;;  %v681_v61 = vsub.f32 %v2748_v48, %v1963_v32  ;;  %v835_v20 = vsub.f32 %v2748_v48, %v1965_v33  ;;  %v177_v5 = vand.u32 2147483647, %v175_v21  ;;  %v989_v11 = vsub.f32 %v2748_v48, %v1967_v34 }
 0x211   :  { %v677_v35 = vmin.f32 %v523_v18, %v671_v29  ;;  %v375_v40 = vand.u32 2147483647, %v373_v22  ;;  %v529_v58 = vand.u32 2147483647, %v527_v27  ;;  %v1143_v16 = vsub.f32 %v2748_v48, %v1970_v37 }
 0x212   :  { %v683_v1 = vand.u32 2147483647, %v681_v61  ;;  %v837_v57 = vand.u32 2147483647, %v835_v20  ;;  %v191_v15 = vadd.f32 %v3646_v53, %v177_v5  ;;  %v519_v18 = vmin.f32 %v2614_v12, %v517_v39  ;;  %v3649_v20 = vld [vmem:[#allocation48_spill] sm:$0xff]  ;;  %v185_v5 = vpop.permute.xlu1 %184  ;;  %v3653_v12 = vld [vmem:[#allocation35_spill] sm:$0xff] }
 0x213   :  { %v2796_v19 = vmin.f32 %v677_v35, %v825_v44  ;;  %v381_v62 = vadd.f32 %v3647_v17, %v375_v40  ;;  %v535_v2 = vadd.f32 %v3648_v4, %v529_v58  ;;  %v673_v21 = vmin.f32 %v2632_v0, %v671_v29  ;;  %v3650_v35 = vld [vmem:[#allocation49_spill] sm:$0xff]  ;;  %v3651_v4 = vld [vmem:[#allocation34_spill] sm:$0xff]  ;;  %v3658_v17 = vld [vmem:[#allocation51_spill] sm:$0xff] }
 0x214   :  { %v827_v22 = vmin.f32 %v2640_v28, %v825_v44  ;;  %v689_v52 = vadd.f32 %v3649_v20, %v683_v1  ;;  %v843_v3 = vadd.f32 %v3650_v35, %v837_v57  ;;  %v991_v13 = vand.u32 2147483647, %v989_v11 }
 0x215   :  { %3645 = vst [vmem:[#allocation84_spill] sm:$0xff] %v2796_v19  ;;  %v387_v61 = vmin.f32 %v191_v15, %v381_v62  ;;  %v2811_v40 = vadd.f32 %v1131_v14, %v3651_v4  ;;  %v2814_v0 = vadd.f32 %v1285_v45, %v3653_v12  ;;  %v1145_v28 = vand.u32 2147483647, %v1143_v16 }
 0x216   :  { %v2816_v39 = vmin.f32 %v162_v56, %v191_v15  ;;  %v2818_v29 = vmin.f32 %v365_v36, %v381_v62  ;;  %v176_v58 = vsub.f32 %v2786_v9, %v1952_v23  ;;  %v374_v11 = vsub.f32 %v2786_v9, %v1954_v24  ;;  %v3656_v36 = vld [vmem:[#allocation50_spill] sm:$0xff]  ;;  %v2839_v57 = vpop.permute.xlu1 %199 }
 0x217   :  { %3652 = vst [vmem:[#allocation25_spill] sm:$0xff] %v2811_v40  ;;  %3654 = vst [vmem:[#allocation26_spill] sm:$0xff] %v2814_v0  ;;  %v541_v44 = vmin.f32 %v387_v61, %v535_v2  ;;  %v528_v1 = vsub.f32 %v2786_v9, %v1961_v31  ;;  %v682_v14 = vsub.f32 %v2786_v9, %v1963_v32 }
 0x218   :  { %v836_v16 = vsub.f32 %v2786_v9, %v1965_v33  ;;  %v2830_v15 = vmin.f32 %v519_v18, %v535_v2  ;;  %v2832_v62 = vmin.f32 %v673_v21, %v689_v52  ;;  %v2834_v56 = vmin.f32 %v827_v22, %v843_v3 }
 0x219   :  { %v2837_v45 = vadd.f32 %v3656_v36, %v991_v13  ;;  %v695_v53 = vmin.f32 %v541_v44, %v689_v52  ;;  %v1297_v61 = vsub.f32 %v2748_v48, %v3628_v30  ;;  %v178_v20 = vand.u32 2147483647, %v176_v58 }
 0x21a   :  { %3655 = vst [vmem:[#allocation39_spill] sm:$0xff] %v2834_v56  ;;  %v990_v35 = vsub.f32 %v2786_v9, %v1967_v34  ;;  %v376_v4 = vand.u32 2147483647, %v374_v11  ;;  %v530_v2 = vand.u32 2147483647, %v528_v1  ;;  %v1144_v21 = vsub.f32 %v2786_v9, %v1970_v37  ;;  %v2859_v59 = vpop.permute.xlu1 %211 }
 0x21b   :  { %3657 = vst [vmem:[#allocation41_spill] sm:$0xff] %v2837_v45  ;;  %v684_v18 = vand.u32 2147483647, %v682_v14  ;;  %v838_v22 = vand.u32 2147483647, %v836_v16  ;;  %v188_v13 = vsub.f32 %v185_v5, %v1981_v41  ;;  %v378_v12 = vsub.f32 %v185_v5, %v1983_v42 }
 0x21c   :  { %v532_v52 = vsub.f32 %v185_v5, %v1985_v43  ;;  %v1298_v48 = vsub.f32 %v2786_v9, %v3628_v30  ;;  %v686_v44 = vsub.f32 %v185_v5, %v1993_v47  ;;  %v840_v58 = vsub.f32 %v185_v5, %v1997_v49 }
 0x21d   :  { %v994_v11 = vsub.f32 %v185_v5, %v1999_v50  ;;  %v190_v1 = vand.u32 2147483647, %v188_v13  ;;  %v380_v14 = vand.u32 2147483647, %v378_v12  ;;  %v1148_v16 = vsub.f32 %v185_v5, %v2001_v51 }
 0x21e   :  { %v534_v36 = vand.u32 2147483647, %v532_v52  ;;  %v2857_v27 = vadd.f32 %v3658_v17, %v1145_v28  ;;  %v992_v0 = vand.u32 2147483647, %v990_v35  ;;  %v688_v19 = vand.u32 2147483647, %v686_v44 }
 0x21f   :  { %v842_v40 = vand.u32 2147483647, %v840_v58  ;;  %v192_v9 = vadd.f32 %v190_v1, %v178_v20  ;;  %v382_v60 = vadd.f32 %v380_v14, %v376_v4  ;;  %v996_v45 = vand.u32 2147483647, %v994_v11 }
 0x220   :  { %v1302_v56 = vsub.f32 %v185_v5, %v2011_v55  ;;  %v2862_v10 = vmin.f32 %v695_v53, %v843_v3  ;;  %v2864_v13 = vand.u32 2147483647, %v1297_v61  ;;  %v2866_v12 = vand.u32 2147483647, %v1144_v21 }
 0x221   :  { %v2868_v52 = vand.u32 2147483647, %v1298_v48  ;;  %v388_v17 = vmin.f32 %v192_v9, %v382_v60  ;;  %v536_v28 = vadd.f32 %v534_v36, %v530_v2  ;;  %v2870_v35 = vadd.f32 %v688_v19, %v684_v18 }
 0x222   :  { %3659 = vst [vmem:[#allocation12_spill] sm:$0xff] %v2866_v12  ;;  %v2872_v44 = vand.u32 2147483647, %v1148_v16  ;;  %v2874_v58 = vadd.f32 %v842_v40, %v838_v22  ;;  %v206_v20 = vsub.f32 %v2839_v57, %v1952_v23  ;;  %v391_v3 = vsub.f32 %v2839_v57, %v1954_v24  ;;  %v3676_v12 = vld [vmem:[#allocation56_spill] sm:$0xff] }
 0x223   :  { %3660 = vst [vmem:[#allocation27_spill] sm:$0xff] %v2868_v52  ;;  %v545_v5 = vsub.f32 %v2839_v57, %v1961_v31  ;;  %v2882_v53 = vadd.f32 %v996_v45, %v992_v0  ;;  %v2884_v61 = vand.u32 2147483647, %v1302_v56  ;;  %v699_v19 = vsub.f32 %v2839_v57, %v1963_v32  ;;  %v2904_v45 = vpop.permute.xlu1 %215 }
 0x224   :  { %3661 = vst [vmem:[#allocation42_spill] sm:$0xff] %v2872_v44  ;;  %v853_v40 = vsub.f32 %v2839_v57, %v1965_v33  ;;  %v3664_v4 = vmin.f32 %v2656_v7, %v2676_v8  ;;  %v3665_v18 = vmin.f32 %v2664_v38, %v2702_v25  ;;  %v2900_v0 = vmin.f32 %v388_v17, %v536_v28 }
 0x225   :  { %3662 = vst [vmem:[#allocation28_spill] sm:$0xff] %v2882_v53  ;;  %3663 = vst [vmem:[#allocation29_spill] sm:$0xff] %v2884_v61  ;;  %v1007_v56 = vsub.f32 %v2839_v57, %v1967_v34  ;;  %v208_v22 = vand.u32 2147483647, %v206_v20  ;;  %v393_v48 = vand.u32 2147483647, %v391_v3  ;;  %v1161_v7 = vsub.f32 %v2839_v57, %v1970_v37 }
 0x226   :  { %v2893_v2 = vmin.f32 %v3664_v4, %v192_v9  ;;  %v2898_v21 = vmin.f32 %v3665_v18, %v382_v60  ;;  %3667 = vst [vmem:[#allocation31_spill] sm:$0xff] %v2904_v45  ;;  %v547_v11 = vand.u32 2147483647, %v545_v5  ;;  %v701_v8 = vand.u32 2147483647, %v699_v19 }
 0x227   :  { %v855_v1 = vand.u32 2147483647, %v853_v40  ;;  %v218_v38 = vsub.f32 %v2859_v59, %v1981_v41  ;;  %v395_v60 = vsub.f32 %v2859_v59, %v1983_v42  ;;  %v1315_v25 = vsub.f32 %v2839_v57, %v3628_v30  ;;  %v2941_v44 = vpop.permute.xlu1 %234 }
 0x228   :  { %3666 = vst [vmem:[#allocation43_spill] sm:$0xff] %v2898_v21  ;;  %v549_v14 = vsub.f32 %v2859_v59, %v1985_v43  ;;  %v703_v36 = vsub.f32 %v2859_v59, %v1993_v47  ;;  %v857_v16 = vsub.f32 %v2859_v59, %v1997_v49  ;;  %v1011_v20 = vsub.f32 %v2859_v59, %v1999_v50 }
 0x229   :  { %v220_v9 = vand.u32 2147483647, %v218_v38  ;;  %v397_v17 = vand.u32 2147483647, %v395_v60  ;;  %v1165_v3 = vsub.f32 %v2859_v59, %v2001_v51  ;;  %v3668_v57 = vmin.f32 %v2685_v26, %v2705_v54  ;;  %3672 = vst [vmem:[#allocation45_spill] sm:$0xff] %v2941_v44 }
 0x22a   :  { %v551_v19 = vand.u32 2147483647, %v549_v14  ;;  %v705_v40 = vand.u32 2147483647, %v703_v36  ;;  %v859_v4 = vand.u32 2147483647, %v857_v16  ;;  %v3670_v18 = vmin.f32 %v2694_v46, %v2726_v63 }
 0x22b   :  { %v2927_v5 = vmin.f32 %v3668_v57, %v536_v28  ;;  %v2937_v61 = vadd.f32 %v220_v9, %v208_v22  ;;  %v2939_v52 = vadd.f32 %v397_v17, %v393_v48  ;;  %v1009_v26 = vand.u32 2147483647, %v1007_v56 }
 0x22c   :  { %v2933_v38 = vmin.f32 %v3670_v18, %v2870_v35  ;;  %v2943_v54 = vand.u32 2147483647, %v1161_v7  ;;  %v2945_v28 = vand.u32 2147483647, %v1315_v25  ;;  %v1319_v14 = vsub.f32 %v2859_v59, %v2011_v55  ;;  %v3673_v18 = vld [vmem:[#allocation54_spill] sm:$0xff] }
 0x22d   :  { %3669 = vst [vmem:[#allocation32_spill] sm:$0xff] %v2927_v5  ;;  %v405_v46 = vmin.f32 %v2937_v61, %v2939_v52  ;;  %v2951_v63 = vadd.f32 %v551_v19, %v547_v11  ;;  %v1013_v36 = vand.u32 2147483647, %v1011_v20  ;;  %v2953_v22 = vand.u32 2147483647, %v1165_v3 }
 0x22e   :  { %3671 = vst [vmem:[#allocation33_spill] sm:$0xff] %v2933_v38  ;;  %v2955_v48 = vadd.f32 %v705_v40, %v701_v8  ;;  %v2957_v16 = vadd.f32 %v859_v4, %v855_v1  ;;  %v219_v56 = vsub.f32 %v2904_v45, %v1981_v41  ;;  %v396_v7 = vsub.f32 %v2904_v45, %v1983_v42  ;;  %v2982_v4 = vpop.permute.xlu1 %242 }
 0x22f   :  { %v2964_v59 = vmin.f32 %v405_v46, %v2951_v63  ;;  %v550_v11 = vsub.f32 %v2904_v45, %v1985_v43  ;;  %v704_v25 = vsub.f32 %v2904_v45, %v1993_v47  ;;  %v858_v8 = vsub.f32 %v2904_v45, %v1997_v49  ;;  %v3674_v46 = vld [vmem:[#allocation55_spill] sm:$0xff] }
 0x230   :  { %v2972_v1 = vand.u32 2147483647, %v1319_v14  ;;  %v221_v9 = vand.u32 2147483647, %v219_v56  ;;  %v398_v17 = vand.u32 2147483647, %v396_v7  ;;  %v1012_v20 = vsub.f32 %v2904_v45, %v1999_v50 }
 0x231   :  { %v224_v3 = vmin.f32 %v2816_v39, %v2937_v61  ;;  %v552_v19 = vand.u32 2147483647, %v550_v11  ;;  %v1166_v40 = vsub.f32 %v2904_v45, %v2001_v51  ;;  %v706_v7 = vand.u32 2147483647, %v704_v25 }
 0x232   :  { %v223_v14 = vadd.f32 %v221_v9, %v3673_v18  ;;  %v2986_v56 = vadd.f32 %v398_v17, %v3674_v46  ;;  %v860_v60 = vand.u32 2147483647, %v858_v8  ;;  %v2994_v11 = vadd.f32 %v1013_v36, %v1009_v26  ;;  %v3680_v36 = vld [vmem:[#allocation57_spill] sm:$0xff] }
 0x233   :  { %v2998_v9 = vadd.f32 %v552_v19, %v3676_v12  ;;  %v3000_v17 = vand.u32 2147483647, %v1012_v20  ;;  %v238_v25 = vsub.f32 %v2941_v44, %v1952_v23  ;;  %v3004_v8 = vand.u32 2147483647, %v1166_v40  ;;  %v3682_v12 = vld [vmem:[#allocation58_spill] sm:$0xff] }
 0x234   :  { %3675 = vst [vmem:[#allocation46_spill] sm:$0xff] %v2986_v56  ;;  %v406_v57 = vmin.f32 %v223_v14, %v2986_v56  ;;  %v410_v18 = vsub.f32 %v2941_v44, %v1954_v24  ;;  %v564_v46 = vsub.f32 %v2941_v44, %v1961_v31  ;;  %v718_v26 = vsub.f32 %v2941_v44, %v1963_v32  ;;  %v3692_v56 = vld [vmem:[#allocation71_spill] sm:$0xff] }
 0x235   :  { %3677 = vst [vmem:[#allocation47_spill] sm:$0xff] %v2998_v9  ;;  %3678 = vst [vmem:[#allocation48_spill] sm:$0xff] %v3000_v17  ;;  %v3013_v39 = vadd.f32 %v706_v7, %v3680_v36  ;;  %v3016_v20 = vadd.f32 %v860_v60, %v3682_v12  ;;  %v240_v40 = vand.u32 2147483647, %v238_v25  ;;  %v225_v61 = vmin.f32 %v2893_v2, %v223_v14  ;;  %v3027_v7 = vpop.permute.xlu1 %261 }
 0x236   :  { %3679 = vst [vmem:[#allocation49_spill] sm:$0xff] %v3004_v8  ;;  %v872_v8 = vsub.f32 %v2941_v44, %v1965_v33  ;;  %v1026_v17 = vsub.f32 %v2941_v44, %v1967_v34  ;;  %v3032_v36 = vmin.f32 %v406_v57, %v2998_v9  ;;  %v412_v25 = vand.u32 2147483647, %v410_v18 }
 0x237   :  { %3681 = vst [vmem:[#allocation34_spill] sm:$0xff] %v3013_v39  ;;  %3683 = vst [vmem:[#allocation35_spill] sm:$0xff] %v3016_v20  ;;  %v249_v2 = vsub.f32 %v2982_v4, %v1981_v41  ;;  %v566_v14 = vand.u32 2147483647, %v564_v46  ;;  %v720_v12 = vand.u32 2147483647, %v718_v26  ;;  %v413_v38 = vsub.f32 %v2982_v4, %v1983_v42 }
 0x238   :  { %3684 = vst [vmem:[#allocation50_spill] sm:$0xff] %v3032_v36  ;;  %v3685_v20 = vld [vmem:[#allocation69_spill] sm:$0xff]  ;;  %v567_v57 = vsub.f32 %v2982_v4, %v1985_v43  ;;  %v721_v18 = vsub.f32 %v2982_v4, %v1993_v47  ;;  %v3047_v60 = vand.u32 2147483647, %v872_v8  ;;  %v3049_v46 = vand.u32 2147483647, %v1026_v17 }
 0x239   :  { %v3041_v39 = vadd.f32 %v3685_v20, %v240_v40  ;;  %v251_v45 = vand.u32 2147483647, %v249_v2  ;;  %v415_v26 = vand.u32 2147483647, %v413_v38  ;;  %v875_v19 = vsub.f32 %v2982_v4, %v1997_v49  ;;  %v3689_v36 = vld [vmem:[#allocation61_spill] sm:$0xff]  ;;  %v3690_v2 = vld [vmem:[#allocation70_spill] sm:$0xff]  ;;  %v3063_v38 = vpop.permute.xlu1 %265 }
 0x23a   :  { %3687 = vst [vmem:[#allocation54_spill] sm:$0xff] %v3047_v60  ;;  %3688 = vst [vmem:[#allocation55_spill] sm:$0xff] %v3049_v46  ;;  %v569_v5 = vand.u32 2147483647, %v567_v57  ;;  %v723_v20 = vand.u32 2147483647, %v721_v18  ;;  %v1029_v40 = vsub.f32 %v2982_v4, %v1999_v50  ;;  %v3057_v44 = vadd.f32 %v3690_v2, %v412_v25 }
 0x23b   :  { %3686 = vst [vmem:[#allocation51_spill] sm:$0xff] %v3041_v39  ;;  %v253_v9 = vadd.f32 %v251_v45, %v3689_v36  ;;  %v3060_v21 = vadd.f32 %v3692_v56, %v566_v14  ;;  %v3694_v8 = vld [vmem:[#allocation62_spill] sm:$0xff]  ;;  %v877_v46 = vand.u32 2147483647, %v875_v19  ;;  %v3066_v60 = vmin.f32 %v225_v61, %v3041_v39  ;;  %v3696_v45 = vld [vmem:[#allocation72_spill] sm:$0xff]  ;;  %v3698_v56 = vld [vmem:[#allocation63_spill] sm:$0xff] }
 0x23c   :  { %3691 = vst [vmem:[#allocation56_spill] sm:$0xff] %v3057_v44  ;;  %v417_v17 = vadd.f32 %v415_v26, %v3694_v8  ;;  %v3069_v36 = vadd.f32 %v3696_v45, %v720_v12  ;;  %v1183_v57 = vsub.f32 %v2982_v4, %v2001_v51  ;;  %v571_v14 = vadd.f32 %v569_v5, %v3698_v56  ;;  %v3699_v2 = vld [vmem:[#allocation64_spill] sm:$0xff]  ;;  %v3701_v5 = vld [vmem:[#allocation65_spill] sm:$0xff]  ;;  %v3703_v39 = vld [vmem:[#allocation75_spill] sm:$0xff] }
 0x23d   :  { %3693 = vst [vmem:[#allocation57_spill] sm:$0xff] %v3060_v21  ;;  %3695 = vst [vmem:[#allocation58_spill] sm:$0xff] %v3066_v60  ;;  %v255_v18 = vmin.f32 %v224_v3, %v253_v9  ;;  %v3077_v26 = vadd.f32 %v723_v20, %v3699_v2  ;;  %v3079_v19 = vand.u32 2147483647, %v1029_v40  ;;  %v268_v61 = vsub.f32 %v3027_v7, %v1952_v23 }
 0x23e   :  { %3697 = vst [vmem:[#allocation69_spill] sm:$0xff] %v3069_v36  ;;  %v423_v8 = vmin.f32 %v253_v9, %v417_v17  ;;  %v427_v12 = vsub.f32 %v3027_v7, %v1954_v24  ;;  %v581_v45 = vsub.f32 %v3027_v7, %v1961_v31  ;;  %v3700_v3 = vmin.f32 %v2818_v29, %v2939_v52 }
 0x23f   :  { %v3091_v56 = vadd.f32 %v877_v46, %v3701_v5  ;;  %v735_v20 = vsub.f32 %v3027_v7, %v1963_v32  ;;  %v889_v9 = vsub.f32 %v3027_v7, %v1965_v33  ;;  %v270_v40 = vand.u32 2147483647, %v268_v61 }
 0x240   :  { %v419_v25 = vmin.f32 %v3700_v3, %v417_v17  ;;  %v429_v2 = vand.u32 2147483647, %v427_v12  ;;  %v583_v36 = vand.u32 2147483647, %v581_v45  ;;  %v1043_v21 = vsub.f32 %v3027_v7, %v1967_v34  ;;  %v3106_v3 = vpop.permute.xlu1 %277  ;;  %v3704_v12 = vld [vmem:[#allocation76_spill] sm:$0xff] }
 0x241   :  { %v3702_v60 = vmin.f32 %v2830_v15, %v2951_v63  ;;  %v3102_v52 = vand.u32 2147483647, %v1183_v57  ;;  %v737_v46 = vand.u32 2147483647, %v735_v20  ;;  %v269_v17 = vsub.f32 %v3063_v38, %v1952_v23  ;;  %v3705_v57 = vld [vmem:[#allocation77_spill] sm:$0xff] }
 0x242   :  { %v577_v5 = vmin.f32 %v423_v8, %v571_v14  ;;  %v284_v61 = vadd.f32 %v3703_v39, %v270_v40  ;;  %v435_v45 = vadd.f32 %v3704_v12, %v429_v2  ;;  %v428_v44 = vsub.f32 %v3063_v38, %v1954_v24  ;;  %v3706_v8 = vld [vmem:[#allocation78_spill] sm:$0xff] }
 0x243   :  { %v573_v29 = vmin.f32 %v3702_v60, %v571_v14  ;;  %v891_v53 = vand.u32 2147483647, %v889_v9  ;;  %v1197_v15 = vsub.f32 %v3027_v7, %v1970_v37  ;;  %v582_v63 = vsub.f32 %v3063_v38, %v1961_v31 }
 0x244   :  { %v736_v23 = vsub.f32 %v3063_v38, %v1963_v32  ;;  %v286_v60 = vmin.f32 %v255_v18, %v284_v61  ;;  %v589_v14 = vadd.f32 %v3705_v57, %v583_v36  ;;  %v743_v39 = vadd.f32 %v3706_v8, %v737_v46 }
 0x245   :  { %v1045_v20 = vand.u32 2147483647, %v1043_v21  ;;  %v437_v40 = vmin.f32 %v419_v25, %v435_v45  ;;  %v441_v2 = vmin.f32 %v284_v61, %v435_v45  ;;  %v271_v12 = vand.u32 2147483647, %v269_v17 }
 0x246   :  { %v890_v24 = vsub.f32 %v3063_v38, %v1965_v33  ;;  %v430_v9 = vand.u32 2147483647, %v428_v44  ;;  %v3122_v37 = vand.u32 2147483647, %v582_v63  ;;  %v281_v31 = vsub.f32 %v3106_v3, %v1981_v41  ;;  %v1477_v44 = vpop.permute.xlu1 %1476 }
 0x247   :  { %v432_v32 = vsub.f32 %v3106_v3, %v1983_v42  ;;  %v3128_v18 = vand.u32 2147483647, %v736_v23  ;;  %v586_v21 = vsub.f32 %v3106_v3, %v1985_v43  ;;  %v740_v36 = vsub.f32 %v3106_v3, %v1993_v47 }
 0x248   :  { %v894_v33 = vsub.f32 %v3106_v3, %v1997_v49  ;;  %v291_v25 = vmul.f32 0.0625, %v286_v60  ;;  %v1044_v46 = vsub.f32 %v3063_v38, %v1967_v34  ;;  %v283_v41 = vand.u32 2147483647, %v281_v31  ;;  %v3708_v60 = vld [vmem:[#allocation81_spill] sm:$0xff]  ;;  %v3749_v34 = vld [vmem:[#allocation42_spill] sm:$0xff] }
 0x249   :  { %v434_v17 = vand.u32 2147483647, %v432_v32  ;;  %v445_v61 = vmul.f32 0.0625, %v437_v40  ;;  %v3138_v42 = vand.u32 2147483647, %v890_v24  ;;  %v3707_v43 = vmin.f32 %v2964_v59, %v2955_v48  ;;  %v3709_v32 = vld [vmem:[#allocation92_spill] sm:$0xff] }
 0x24a   :  { %v3146_v63 = vand.u32 2147483647, %v586_v21  ;;  %v3148_v49 = vand.u32 2147483647, %v740_v36  ;;  %v3150_v23 = vand.u32 2147483647, %v894_v33  ;;  %v3153_v57 = vmul.f32 %v3708_v60, %v1477_v44 }
 0x24b   :  { %v867_v47 = vmin.f32 %v3707_v43, %v2957_v16  ;;  %v3155_v8 = vadd.f32 %v283_v41, %v271_v12  ;;  %v3157_v40 = vadd.f32 %v434_v17, %v430_v9  ;;  %v1169_v24 = vadd.f32 %v2953_v22, %v2943_v54  ;;  %v3713_v43 = vld [vmem:[#allocation79_spill] sm:$0xff] }
 0x24c   :  { %v1199_v31 = vand.u32 2147483647, %v1197_v15  ;;  %v1275_v21 = vmin.f32 %v3709_v32, %v2651_v6  ;;  %v3166_v36 = vadd.f32 %v2972_v1, %v2945_v28  ;;  %v3710_v33 = vsub.f32 %v2982_v4, %v2011_v55  ;;  %v3712_v28 = vld [vmem:[#allocation39_spill] sm:$0xff]  ;;  %v3714_v4 = vld [vmem:[#allocation10_spill] sm:$0xff] }
 0x24d   :  { %v1021_v59 = vmin.f32 %v867_v47, %v2994_v11  ;;  %v447_v44 = vadd.f32 %v445_v61, %v291_v25  ;;  %v591_v9 = vmin.f32 %v573_v29, %v589_v14  ;;  %v595_v41 = vmin.f32 %v441_v2, %v589_v14 }
 0x24e   :  { %v1339_v12 = vand.u32 2147483647, %v3710_v33  ;;  %v3711_v54 = vmin.f32 %v2832_v62, %v2955_v48  ;;  %v1351_v15 = vsub.f32 %v3027_v7, %v3628_v30  ;;  %v731_v17 = vmin.f32 %v577_v5, %v3077_v26  ;;  %v3715_v33 = vld [vmem:[#allocation9_spill] sm:$0xff]  ;;  %v3718_v5 = vld [vmem:[#allocation38_spill] sm:$0xff] }
 0x24f   :  { %v863_v1 = vmin.f32 %v3712_v28, %v2957_v16  ;;  %v897_v47 = vadd.f32 %v3713_v43, %v891_v53  ;;  %v3183_v25 = vrot.slane %v3715_v33, %v3714_v4  ;;  %v599_v29 = vmul.f32 0.0625, %v591_v9  ;;  %v3716_v7 = vld [vmem:[#allocation41_spill] sm:$0xff]  ;;  %v3720_v4 = vld [vmem:[#allocation67_spill] sm:$0xff] }
 0x250   :  { %v727_v22 = vmin.f32 %v3711_v54, %v3077_v26  ;;  %v749_v2 = vmin.f32 %v595_v41, %v743_v39  ;;  %v3185_v61 = vmin.f32 %v1021_v59, %v1169_v24  ;;  %v885_v48 = vmin.f32 %v731_v17, %v3091_v56  ;;  %v3717_v26 = vld [vmem:[#allocation83_spill] sm:$0xff]  ;;  %v3721_v41 = vld [vmem:[#allocation80_spill] sm:$0xff] }
 0x251   :  { %v881_v62 = vmin.f32 %v863_v1, %v3091_v56  ;;  %v3719_v54 = vmin.f32 %v3717_v26, %v3718_v5  ;;  %v601_v28 = vadd.f32 %v599_v29, %v447_v44  ;;  %v1003_v43 = vmin.f32 %v2862_v10, %v3716_v7  ;;  %v3722_v1 = vld [vmem:[#allocation25_spill] sm:$0xff]  ;;  %v3723_v56 = vld [vmem:[#allocation88_spill] sm:$0xff] }
 0x252   :  { %v745_v14 = vmin.f32 %v727_v22, %v743_v39  ;;  %v1033_v9 = vadd.f32 %v3079_v19, %v3720_v4  ;;  %v1051_v22 = vadd.f32 %v3721_v41, %v1045_v20  ;;  %v1135_v17 = vmin.f32 %v3723_v56, %v3722_v1  ;;  %v1492_v41 = vpop.permute.xlu1 %1491  ;;  %v3734_v56 = vld [vmem:[#allocation40_spill] sm:$0xff] }
 0x253   :  { %v999_v16 = vmin.f32 %v3719_v54, %v3716_v7  ;;  %v899_v39 = vmin.f32 %v881_v62, %v897_v47  ;;  %v1353_v33 = vand.u32 2147483647, %v1351_v15  ;;  %v903_v26 = vmin.f32 %v749_v2, %v897_v47  ;;  %v3726_v62 = vld [vmem:[#allocation68_spill] sm:$0xff]  ;;  %v3729_v47 = vld [vmem:[#allocation13_spill] sm:$0xff]  ;;  %v3730_v2 = vld [vmem:[#allocation14_spill] sm:$0xff] }
 0x254   :  { %v753_v53 = vmul.f32 0.0625, %v745_v14  ;;  %v1039_v54 = vmin.f32 %v885_v48, %v1033_v9  ;;  %v3724_v14 = vld [vmem:[#allocation84_spill] sm:$0xff]  ;;  %v1153_v19 = vmin.f32 %v1135_v17, %v2857_v27  ;;  %v1187_v20 = vadd.f32 %v3102_v52, %v3726_v62 }
 0x255   :  { %v1017_v59 = vmin.f32 %v999_v16, %v2994_v11  ;;  %v907_v44 = vmul.f32 0.0625, %v899_v39  ;;  %v3725_v10 = vmin.f32 %v3724_v14, %v3718_v5  ;;  %v1157_v11 = vmin.f32 %v1003_v43, %v2857_v27  ;;  %v3727_v16 = vld [vmem:[#allocation66_spill] sm:$0xff]  ;;  %v3732_v39 = vld [vmem:[#allocation53_spill] sm:$0xff] }
 0x256   :  { %v755_v45 = vadd.f32 %v753_v53, %v601_v28  ;;  %v3728_v15 = vsub.f32 %v3727_v16, %v2001_v51  ;;  %v3731_v48 = vmin.f32 %v3729_v47, %v3730_v2  ;;  %v1171_v5 = vmin.f32 %v1153_v19, %v1169_v24 }
 0x257   :  { %v1035_v29 = vmin.f32 %v1017_v59, %v1033_v9  ;;  %v1139_v7 = vmin.f32 %v3725_v10, %v3722_v1  ;;  %v1305_v59 = vadd.f32 %v3732_v39, %v2864_v13  ;;  %v1057_v27 = vmin.f32 %v903_v26, %v1051_v22  ;;  %v3733_v1 = vld [vmem:[#allocation26_spill] sm:$0xff]  ;;  %v3736_v13 = vld [vmem:[#allocation15_spill] sm:$0xff] }
 0x258   :  { %v1203_v28 = vand.u32 2147483647, %v3728_v15  ;;  %v1271_v53 = vmin.f32 %v3731_v48, %v2651_v6  ;;  %v909_v4 = vadd.f32 %v907_v44, %v755_v45  ;;  %v3735_v17 = vsub.f32 %v3734_v56, %v3628_v30 }
 0x259   :  { %v1053_v9 = vmin.f32 %v1035_v29, %v1051_v22  ;;  %v1189_v62 = vmin.f32 %v1171_v5, %v1187_v20  ;;  %v1293_v15 = vmin.f32 %v1139_v7, %v3733_v1  ;;  %v1355_v45 = vsub.f32 %v3727_v16, %v2011_v55 }
 0x25a   :  { %v1205_v43 = vadd.f32 %v1203_v28, %v1199_v31  ;;  %v1289_v52 = vmin.f32 %v1271_v53, %v3733_v1  ;;  %v1335_v14 = vand.u32 2147483647, %v3735_v17  ;;  %v1193_v24 = vmin.f32 %v1039_v54, %v1187_v20  ;;  %v3738_v31 = vld [vmem:[#allocation94_spill] sm:$0xff] }
 0x25b   :  { %v1061_v10 = vmul.f32 0.0625, %v1053_v9  ;;  %v3737_v22 = vmin.f32 %v3736_v13, %v3729_v47  ;;  %v3739_v26 = vmin.f32 %v3738_v31, %v3730_v2  ;;  %v1357_v53 = vand.u32 2147483647, %v1355_v45 }
 0x25c   :  { %v1307_v44 = vmin.f32 %v1289_v52, %v1305_v59  ;;  %v1341_v29 = vadd.f32 %v1339_v12, %v1335_v14  ;;  %v1207_v48 = vmin.f32 %v1189_v62, %v1205_v43  ;;  %v1502_v9 = vmul.f32 %v3183_v25, %v1492_v41  ;;  %v3743_v14 = vld [vmem:[#allocation28_spill] sm:$0xff]  ;;  %v3746_v62 = vld [vmem:[#allocation46_spill] sm:$0xff] }
 0x25d   :  { %v1377_v19 = vadd.f32 %v3739_v26, %v3737_v22  ;;  %v1063_v28 = vadd.f32 %v1061_v10, %v909_v4  ;;  %v3234_v7 = vadd.f32 %v3146_v63, %v3122_v37  ;;  %v1311_v16 = vmin.f32 %v1157_v11, %v1305_v59  ;;  %v3745_v10 = vld [vmem:[#allocation43_spill] sm:$0xff] }
 0x25e   :  { %v1325_v54 = vmin.f32 %v1307_v44, %v3166_v36  ;;  %v1215_v20 = vmul.f32 0.0625, %v1207_v48  ;;  %v1359_v47 = vadd.f32 %v1357_v53, %v1353_v33  ;;  %v1504_v2 = vadd.f32 %v1502_v9, %v3153_v57  ;;  %v3740_v57 = vld [vmem:[#allocation37_spill] sm:$0xff]  ;;  %v3751_v44 = vld [vmem:[#allocation51_spill] sm:$0xff]  ;;  %v3752_v48 = vld [vmem:[#allocation18_spill] sm:$0xff] }
 0x25f   :  { %v1381_v12 = vadd.f32 %v1377_v19, %v1275_v21  ;;  %v442_v4 = vmin.f32 %v3155_v8, %v3157_v40  ;;  %v1329_v5 = vmin.f32 %v3185_v61, %v3166_v36  ;;  %v1211_v39 = vmin.f32 %v1057_v27, %v1205_v43  ;;  %v3753_v53 = vld [vmem:[#allocation95_spill] sm:$0xff] }
 0x260   :  { %v1343_v37 = vmin.f32 %v1325_v54, %v1341_v29  ;;  %v1217_v11 = vadd.f32 %v1215_v20, %v1063_v28  ;;  %v1347_v59 = vmin.f32 %v1193_v24, %v1341_v29  ;;  %v3248_v6 = vadd.f32 %v3148_v49, %v3128_v18  ;;  %v3750_v24 = vld [vmem:[#allocation11_spill] sm:$0xff]  ;;  %v3754_v54 = vld [vmem:[#allocation45_spill] sm:$0xff] }
 0x261   :  { %v1385_v63 = vadd.f32 %v1381_v12, %v1293_v15  ;;  %v596_v41 = vmin.f32 %v442_v4, %v3234_v7  ;;  %v1522_v33 = vmul.f32 %v3740_v57, %v1504_v2  ;;  %v3741_v1 = vmin.f32 %v2900_v0, %v2870_v35  ;;  %v3744_v0 = vld [vmem:[#allocation56_spill] sm:$0xff] }
 0x262   :  { %v1361_v32 = vmin.f32 %v1343_v37, %v1359_v47  ;;  %v3258_v27 = vadd.f32 %v3150_v23, %v3138_v42  ;;  %v1046_v18 = vand.u32 2147483647, %v1044_v46  ;;  %v3742_v49 = vsub.f32 %v3106_v3, %v1999_v50  ;;  %v3748_v23 = vld [vmem:[#allocation12_spill] sm:$0xff] }
 0x263   :  { %v1389_v21 = vadd.f32 %v1385_v63, %v1311_v16  ;;  %v850_v36 = vmin.f32 %v3741_v1, %v2874_v58  ;;  %v750_v61 = vmin.f32 %v596_v41, %v3248_v6  ;;  %v1365_v52 = vmin.f32 %v1211_v39, %v1359_v47  ;;  %v3757_v39 = vld [vmem:[#allocation29_spill] sm:$0xff]  ;;  %v3759_v1 = vld [vmem:[#allocation31_spill] sm:$0xff] }
 0x264   :  { %v1050_v43 = vand.u32 2147483647, %v3742_v49  ;;  %v1369_v56 = vmul.f32 0.0625, %v1361_v32  ;;  %v3747_v15 = vmin.f32 %v3745_v10, %v3746_v62  ;;  %v3276_v46 = vadd.f32 %v3749_v34, %v3748_v23  ;;  %v3761_v49 = vld [vmem:[#allocation57_spill] sm:$0xff]  ;;  %v3765_v10 = vld [vmem:[#allocation34_spill] sm:$0xff] }
 0x265   :  { %v1393_v17 = vadd.f32 %v1389_v21, %v1329_v5  ;;  %v1004_v35 = vmin.f32 %v850_v36, %v3743_v14  ;;  %v3272_v42 = vmin.f32 %v750_v61, %v3258_v27  ;;  %v1198_v50 = vsub.f32 %v3063_v38, %v3750_v24  ;;  %v3756_v5 = vld [vmem:[#allocation27_spill] sm:$0xff]  ;;  %v3766_v62 = vld [vmem:[#allocation33_spill] sm:$0xff] }
 0x266   :  { %v420_v45 = vmin.f32 %v3747_v15, %v3744_v0  ;;  %v424_v29 = vmin.f32 %v3751_v44, %v3744_v0  ;;  %v1371_v13 = vadd.f32 %v1369_v56, %v1217_v11  ;;  %v1202_v31 = vsub.f32 %v3106_v3, %v2001_v51  ;;  %v3758_v11 = vld [vmem:[#allocation58_spill] sm:$0xff]  ;;  %v3768_v44 = vld [vmem:[#allocation19_spill] sm:$0xff] }
 0x267   :  { %v1397_v22 = vadd.f32 %v1393_v17, %v1347_v59  ;;  %v1524_v26 = vsub.f32 1.0, %v1522_v33  ;;  %v3284_v19 = vadd.f32 %v1050_v43, %v1046_v18  ;;  %v3287_v28 = vmin.f32 %v1004_v35, %v3276_v46  ;;  %v3763_v43 = vld [vmem:[#allocation47_spill] sm:$0xff] }
 0x268   :  { %v1258_v9 = vmin.f32 %v3753_v53, %v3752_v48  ;;  %v3755_v12 = vsub.f32 %v3754_v54, %v3750_v24  ;;  %v1200_v47 = vand.u32 2147483647, %v1198_v50  ;;  %v1204_v2 = vand.u32 2147483647, %v1202_v31 }
 0x269   :  { %v1401_v16 = vadd.f32 %v1397_v22, %v1365_v52  ;;  %v1058_v4 = vmin.f32 %v3272_v42, %v3284_v19  ;;  %v3298_v37 = vadd.f32 %v3757_v39, %v3756_v5  ;;  %v1334_v63 = vsub.f32 %v3754_v54, %v3628_v30  ;;  %v3773_v5 = vld [vmem:[#allocation54_spill] sm:$0xff]  ;;  %v3774_v39 = vld [vmem:[#allocation73_spill] sm:$0xff] }
 0x26a   :  { %v1182_v20 = vand.u32 2147483647, %v3755_v12  ;;  %v287_v59 = vmin.f32 %v3758_v11, %v3155_v8  ;;  %v1352_v32 = vsub.f32 %v3063_v38, %v3628_v30  ;;  %v1356_v21 = vsub.f32 %v3106_v3, %v2011_v55  ;;  %v3762_v8 = vld [vmem:[#allocation32_spill] sm:$0xff]  ;;  %v3772_v12 = vld [vmem:[#allocation35_spill] sm:$0xff] }
 0x26b   :  { %v1403_v41 = vmul.f32 0.0625, %v1401_v16  ;;  %v438_v57 = vmin.f32 %v420_v45, %v3157_v40  ;;  %v1312_v33 = vmin.f32 %v3287_v28, %v3298_v37  ;;  %v3760_v36 = vsub.f32 %v3759_v1, %v2011_v55  ;;  %v3767_v45 = vld [vmem:[#allocation50_spill] sm:$0xff]  ;;  %v3771_v16 = vld [vmem:[#allocation69_spill] sm:$0xff]  ;;  %v3775_v11 = vld [vmem:[#allocation23_spill] sm:$0xff] }
 0x26c   :  { %v292_v18 = vmul.f32 0.0625, %v287_v59  ;;  %v3764_v52 = vmin.f32 %v3762_v8, %v3763_v43  ;;  %v3320_v17 = vadd.f32 %v1204_v2, %v1200_v47  ;;  %v578_v40 = vmin.f32 %v424_v29, %v3761_v49  ;;  %v3776_v59 = vld [vmem:[#allocation20_spill] sm:$0xff] }
 0x26d   :  { %v3314_v61 = vand.u32 2147483647, %v3760_v36  ;;  %v1405_v38 = vadd.f32 %v1403_v41, %v1371_v13  ;;  %v446_v3 = vmul.f32 0.0625, %v438_v57  ;;  %v3323_v35 = vand.u32 2147483647, %v1334_v63  ;;  %v3769_v13 = vld [vmem:[#allocation21_spill] sm:$0xff] }
 0x26e   :  { %v574_v56 = vmin.f32 %v3764_v52, %v3761_v49  ;;  %v710_v15 = vmin.f32 %v3766_v62, %v3765_v10  ;;  %v714_v23 = vmin.f32 %v3767_v45, %v3765_v10  ;;  %v3330_v34 = vand.u32 2147483647, %v1352_v32  ;;  %v3777_v32 = vld [vmem:[#allocation16_spill] sm:$0xff]  ;;  %v3778_v36 = vld [vmem:[#allocation59_spill] sm:$0xff]  ;;  %v3784_v10 = vld [vmem:[#allocation17_spill] sm:$0xff] }
 0x26f   :  { %v1358_v24 = vand.u32 2147483647, %v1356_v21  ;;  %v448_v50 = vadd.f32 %v446_v3, %v292_v18  ;;  %v3770_v22 = vmin.f32 %v3768_v44, %v3769_v13  ;;  %v880_v63 = vadd.f32 %v3774_v39, %v3773_v5  ;;  %v3779_v18 = vld [vmem:[#allocation48_spill] sm:$0xff]  ;;  %v3780_v52 = vld [vmem:[#allocation55_spill] sm:$0xff]  ;;  %v3794_v39 = vld [vmem:[#allocation90_spill] sm:$0xff] }
 0x270   :  { %v592_v0 = vmin.f32 %v574_v56, %v3234_v7  ;;  %v728_v54 = vmin.f32 %v710_v15, %v3771_v16  ;;  %v732_v7 = vmin.f32 %v578_v40, %v3771_v16  ;;  %v868_v47 = vmin.f32 %v714_v23, %v3772_v12  ;;  %v3781_v56 = vld [vmem:[#allocation74_spill] sm:$0xff]  ;;  %v3782_v40 = vld [vmem:[#allocation87_spill] sm:$0xff]  ;;  %v3792_v5 = vld [vmem:[#allocation52_spill] sm:$0xff] }
 0x271   :  { %v846_v31 = vmin.f32 %v3770_v22, %v2874_v58  ;;  %v982_v41 = vmin.f32 %v3776_v59, %v3775_v11  ;;  %v986_v21 = vmin.f32 %v3777_v32, %v3775_v11  ;;  %v1526_v57 = vadd.f32 %v1524_v26, %v1405_v38  ;;  %v3786_v38 = vld [vmem:[#allocation89_spill] sm:$0xff]  ;;  %v3370_v59 = vpop.f32.mrf.mxu0 }
 0x272   :  { %v600_v29 = vmul.f32 0.0625, %v592_v0  ;;  %v746_v1 = vmin.f32 %v728_v54, %v3248_v6  ;;  %v1016_v49 = vadd.f32 %v3779_v18, %v3778_v36  ;;  %v1034_v3 = vadd.f32 %v3781_v56, %v3780_v52  ;;  %v3783_v0 = vld [vmem:[#allocation85_spill] sm:$0xff]  ;;  %v3787_v6 = vld [vmem:[#allocation86_spill] sm:$0xff]  ;;  %v3790_v54 = vld [vmem:[#allocation60_spill] sm:$0xff] }
 0x273   :  { %v864_v2 = vmin.f32 %v846_v31, %v3772_v12  ;;  %v1000_v43 = vmin.f32 %v982_v41, %v3743_v14  ;;  %v3785_v62 = vmin.f32 %v3783_v0, %v3784_v10  ;;  %v886_v23 = vmin.f32 %v732_v7, %v880_v63  ;;  %v3789_v14 = vld [vmem:[#allocation24_spill] sm:$0xff]  ;;  %v3791_v12 = vld [vmem:[#allocation49_spill] sm:$0xff]  ;;  %v3796_v36 = vld [vmem:[#allocation91_spill] sm:$0xff] }
 0x274   :  { %v602_v58 = vadd.f32 %v600_v29, %v448_v50  ;;  %v754_v45 = vmul.f32 0.0625, %v746_v1  ;;  %v1022_v26 = vmin.f32 %v868_v47, %v1016_v49  ;;  %v3788_v50 = vmin.f32 %v3786_v38, %v3787_v6 }
 0x275   :  { %v882_v8 = vmin.f32 %v864_v2, %v880_v63  ;;  %v1118_v15 = vmin.f32 %v3785_v62, %v3782_v40  ;;  %v1018_v22 = vmin.f32 %v1000_v43, %v1016_v49  ;;  %v1140_v29 = vmin.f32 %v986_v21, %v3789_v14  ;;  %v3795_v63 = vld [vmem:[#allocation93_spill] sm:$0xff]  ;;  %v3797_v49 = vld [vmem:[#allocation36_spill] sm:$0xff]  ;;  %v3799_v62 = vld [vmem:[#allocation30_spill] sm:$0xff] }
 0x276   :  { %v1122_v44 = vmin.f32 %v3788_v50, %v3782_v40  ;;  %v756_v16 = vadd.f32 %v754_v45, %v602_v58  ;;  %v1170_v2 = vadd.f32 %v3791_v12, %v3790_v54  ;;  %v3793_v7 = vsub.f32 %v3792_v5, %v2001_v51 }
 0x277   :  { %v900_v13 = vmin.f32 %v882_v8, %v3258_v27  ;;  %v1136_v31 = vmin.f32 %v1118_v15, %v3789_v14  ;;  %v1240_v11 = vmin.f32 %v3795_v63, %v3794_v39  ;;  %v1036_v27 = vmin.f32 %v1018_v22, %v1034_v3  ;;  %v3798_v8 = vld [vmem:[#allocation44_spill] sm:$0xff] }
 0x278   :  { %v1186_v47 = vand.u32 2147483647, %v3793_v7  ;;  %v1254_v21 = vmin.f32 %v3794_v39, %v3752_v48  ;;  %v1040_v58 = vmin.f32 %v886_v23, %v1034_v3  ;;  %v1276_v18 = vmin.f32 %v1122_v44, %v3796_v36  ;;  %v1636_v3 = vpop.f32.mrf.mxu0 }
 0x279   :  { %v908_v41 = vmul.f32 0.0625, %v900_v13  ;;  %v1154_v32 = vmin.f32 %v1136_v31, %v3276_v46  ;;  %v1288_v51 = vadd.f32 %v3798_v8, %v3797_v49  ;;  %v1054_v52 = vmin.f32 %v1036_v27, %v3284_v19  ;;  %v3802_v27 = vld [vmem:[#allocation82_spill] sm:$0xff] }
 0x27a   :  { %v1188_v1 = vadd.f32 %v1186_v47, %v1182_v20  ;;  %v1272_v40 = vmin.f32 %v1254_v21, %v3796_v36  ;;  %v1176_v0 = vmin.f32 %v1022_v26, %v1170_v2  ;;  %v3800_v46 = vsub.f32 %v3799_v62, %v3628_v30 }
 0x27b   :  { %v910_v43 = vadd.f32 %v908_v41, %v756_v16  ;;  %v1172_v56 = vmin.f32 %v1154_v32, %v1170_v2  ;;  %v1294_v10 = vmin.f32 %v1140_v29, %v1288_v51  ;;  %v1338_v20 = vsub.f32 %v3792_v5, %v2011_v55  ;;  %v1496_v5 = vpop.permute.xlu1 %1495 }
 0x27c   :  { %v1318_v15 = vand.u32 2147483647, %v3800_v46  ;;  %v1062_v45 = vmul.f32 0.0625, %v1054_v52  ;;  %v1290_v38 = vmin.f32 %v1272_v40, %v1288_v51  ;;  %v1378_v6 = vadd.f32 %v1258_v9, %v1240_v11 }
 0x27d   :  { %v1190_v23 = vmin.f32 %v1172_v56, %v1188_v1  ;;  %v1194_v50 = vmin.f32 %v1040_v58, %v1188_v1  ;;  %v1340_v26 = vand.u32 2147483647, %v1338_v20  ;;  %v1645_v13 = vsub.f32 %v1526_v57, %v1636_v3 }
 0x27e   :  { %v1324_v44 = vadd.f32 %v3314_v61, %v1318_v15  ;;  %v1064_v22 = vadd.f32 %v1062_v45, %v910_v43  ;;  %v1308_v14 = vmin.f32 %v1290_v38, %v3298_v37  ;;  %v1382_v31 = vadd.f32 %v1378_v6, %v1276_v18 }
 0x27f   :  { %v1208_v30 = vmin.f32 %v1190_v23, %v3320_v17  ;;  %v1212_v55 = vmin.f32 %v1058_v4, %v3320_v17  ;;  %v1360_v29 = vadd.f32 %v1358_v24, %v3330_v34  ;;  %v1342_v48 = vadd.f32 %v1340_v26, %v3323_v35  ;;  %1647 = vst [vmem:[#allocation6] sm:$0xff] %v1645_v13  ;;  %v3801_v34 = vld [vmem:[#allocation22_spill] sm:$0xff] }
 0x280   :  { %v1326_v9 = vmin.f32 %v1308_v14, %v1324_v44  ;;  %v1330_v61 = vmin.f32 %v1176_v0, %v1324_v44  ;;  %v1386_v57 = vadd.f32 %v1382_v31, %v1294_v10  ;;  %v1503_v4 = vmul.f32 %v3183_v25, %v1496_v5 }
 0x281   :  { %v1216_v53 = vmul.f32 0.0625, %v1208_v30  ;;  %v1348_v12 = vmin.f32 %v1194_v50, %v1342_v48  ;;  %v1366_v7 = vmin.f32 %v1212_v55, %v1360_v29  ;;  %v1489_v24 = vmul.f32 %v3708_v60, %v3801_v34 }
 0x282   :  { %v1344_v54 = vmin.f32 %v1326_v9, %v1342_v48  ;;  %v1390_v2 = vadd.f32 %v1386_v57, %v1312_v33 }
 0x283   :  { %v1218_v16 = vadd.f32 %v1216_v53, %v1064_v22  ;;  %v1505_v11 = vadd.f32 %v1503_v4, %v1489_v24 }
 0x284   :  { %v1362_v42 = vmin.f32 %v1344_v54, %v1360_v29  ;;  %v1394_v19 = vadd.f32 %v1390_v2, %v1330_v61 }
 0x286   :  { %v1370_v17 = vmul.f32 0.0625, %v1362_v42  ;;  %v1398_v35 = vadd.f32 %v1394_v19, %v1348_v12  ;;  %v1514_v63 = vpop.permute.xlu1 %1513 }
 0x287   :  { %v1521_v32 = vmul.f32 %v3802_v27, %v1514_v63 }
 0x288   :  { %v1372_v47 = vadd.f32 %v1370_v17, %v1218_v16  ;;  %v1402_v39 = vadd.f32 %v1398_v35, %v1366_v7 }
 0x289   :  { %v1523_v37 = vmul.f32 %v1521_v32, %v1505_v11 }
 0x28a   :  { %v1404_v41 = vmul.f32 0.0625, %v1402_v39 }
 0x28b   :  { %v1525_v33 = vsub.f32 1.0, %v1523_v37 }
 0x28c   :  { %v1406_v28 = vadd.f32 %v1404_v41, %v1372_v47 }
 0x28e   :  { %v1527_v21 = vadd.f32 %v1525_v33, %v1406_v28 }
 0x290   :  { %v1646_v25 = vsub.f32 %v1527_v21, %v3370_v59 }
 0x292   :  { %1648 = vst [vmem:[#allocation6 + $0x8] sm:$0xff] %v1646_v25 }
 0x293   :  { %1781 = shalt.err (!%p1778_p9)
}
 0x294   :  { %1660 = dma.vmem_to_hbm [thread:$0]  %s1655_s5, 256, %s3415_s4, [#allocation5], %s1795_s18, %s1795_s18, %s1796_s19  }
 0x295   :  { %1792 = dma.done.wait [#allocation5], 256  }
 0x296   :  { %1793 = vsyncadd [#allocation5], 4294967040 }
 0x297   :  { %1664 = vsyncpa [#allocation4], 1 }
 0x298   :  { %1665 = vsyncpa [#allocation5], 1 }

</bundles_post_ra>
